<compile_context>
chip_gen: v7x
topology: tpu7x:2x2x1
jax: 0.10.0
libtpu: 0.0.40
codegen_flags: <defaults>
</compile_context>

<pallas_src>
import functools

import jax
import jax.numpy as jnp
from jax.experimental import pallas as pl
from jax.experimental.pallas import tpu as pltpu

BN_EPS = 1e-5
_LANES = 128


def _round_up(x, m):
    return (x + m - 1) // m * m


def _cdiv(a, b):
    return -(-a // b)


def _vmem_limit_bytes():
    """Generation-aware VMEM limit: ~3/4 of physical (64 MiB v7x, 128 MiB v5e/v6e)."""
    cap = 64 << 20                                   # conservative fallback
    try:
        info_fn = getattr(pltpu, "get_tpu_info", None)
        if info_fn is not None:
            cap = int(getattr(info_fn(), "vmem_capacity_bytes", cap))
    except Exception:
        pass
    return min((cap * 3) // 4, 100 << 20)


def _pick_tile_m(m, per_row_bytes, fixed_bytes, budget):
    """Largest row tile whose double-buffered blocks fit the VMEM budget.

    Prefers an exact divisor of m (no ragged last block, no masking)."""
    cands = [t for t in (1024, 512, 256, 128, 64, 32, 16, 8)
             if 2 * t * per_row_bytes + fixed_bytes <= budget]
    if not cands:
        cands = [8]
    for t in cands:
        if m % t == 0:
            return t, False
    return min(cands[0], max(8, _round_up(m, 8))), True


def _cparams(vmem_limit):
    return pltpu.CompilerParams(dimension_semantics=("parallel",),
                                vmem_limit_bytes=vmem_limit)


# ---------------------------------------------------------------------------
# Stage 1: conv1 (1x1 matmul) -> y1 (bf16) + partial BN1 stats.
# ---------------------------------------------------------------------------
def _conv1_stats_kernel(x_ref, w_ref, y_ref, sum_ref, sq_ref,
                        *, need_mask, tile_m, m_valid):
    x = x_ref[...]                                           # (TM, Cp) f32
    if need_mask:                                            # zero rows >= M
        base = pl.program_id(0) * tile_m
        rows = jax.lax.broadcasted_iota(jnp.int32, x.shape, 0) + base
        x = jnp.where(rows < m_valid, x, 0.0)
    y = jnp.dot(x.astype(jnp.bfloat16), w_ref[...],
                preferred_element_type=jnp.float32)          # (TM, Pp)
    yb = y.astype(jnp.bfloat16)                              # bf16 intermediate
    y_ref[...] = yb
    yf = yb.astype(jnp.float32)                              # stats match what
    cout = yf.shape[1]                                       # stage 2 reads
    s = jnp.sum(yf, axis=0, keepdims=True)
    q = jnp.sum(yf * yf, axis=0, keepdims=True)
    sum_ref[...] = jnp.broadcast_to(s[None], (1, 8, cout))
    sq_ref[...] = jnp.broadcast_to(q[None], (1, 8, cout))


def _conv1_stats_call(x2d, w1p, *, tile_m, need_mask, vmem_limit):
    m, cp = x2d.shape
    pp = w1p.shape[1]
    g = _cdiv(m, tile_m)
    kernel = functools.partial(_conv1_stats_kernel, need_mask=need_mask,
                               tile_m=tile_m, m_valid=m)
    return pl.pallas_call(
        kernel,
        out_shape=(jax.ShapeDtypeStruct((m, pp), jnp.bfloat16),
                   jax.ShapeDtypeStruct((g, 8, pp), jnp.float32),
                   jax.ShapeDtypeStruct((g, 8, pp), jnp.float32)),
        grid=(g,),
        in_specs=[pl.BlockSpec((tile_m, cp), lambda i: (i, 0)),
                  pl.BlockSpec((cp, pp), lambda i: (0, 0))],
        out_specs=(pl.BlockSpec((tile_m, pp), lambda i: (i, 0)),
                   pl.BlockSpec((1, 8, pp), lambda i: (i, 0, 0)),
                   pl.BlockSpec((1, 8, pp), lambda i: (i, 0, 0))),
        compiler_params=_cparams(vmem_limit),
    )(x2d, w1p)


# ---------------------------------------------------------------------------
# Stage 2: bn1 + relu -> 3x3 conv (pad=1) -> y2 (bf16) + partial BN2 stats.
# One image per grid step; three (H*W, 3P) dy-chunk matmuls with f32 accum.
# ---------------------------------------------------------------------------
def _bn_relu_conv3x3_stats_kernel(y1_ref, w2_ref, scale_ref, shift_ref,
                                  y2_ref, sum_ref, sq_ref, pad_ref):
    _, h, wd, p = y1_ref.shape
    # bn1 + relu in f32 on the bf16-stored y1.
    y1n = jnp.maximum(y1_ref[0].astype(jnp.float32) * scale_ref[...]
                      + shift_ref[...], 0.0)

    # Zero ONLY the 1-pixel border of the padded scratch (done every step so
    # the kernel stays correct when the batch axis is split across cores).
    zero_row = jnp.zeros((1, wd + 2, p), pad_ref.dtype)
    zero_col = jnp.zeros((h + 2, 1, p), pad_ref.dtype)
    pad_ref[0:1, :, :] = zero_row
    pad_ref[h + 1:h + 2, :, :] = zero_row
    pad_ref[:, 0:1, :] = zero_col
    pad_ref[:, wd + 1:wd + 2, :] = zero_col
    pad_ref[1:h + 1, 1:wd + 1, :] = y1n

    # 3x3 conv as 3 dy-chunk matmuls (bf16 operands, f32 accumulation).
    # Tap order matches the (dy, dx, cin) weight reshape.
    acc = jnp.zeros((h * wd, p), jnp.float32)
    for dy in range(3):
        chunk = jnp.concatenate(
            [pad_ref[dy:dy + h, dx:dx + wd, :].astype(jnp.bfloat16)
             for dx in range(3)], axis=-1).reshape(h * wd, 3 * p)
        acc = acc + jnp.dot(chunk, w2_ref[dy * 3 * p:(dy + 1) * 3 * p, :],
                            preferred_element_type=jnp.float32)

    y2b = acc.astype(jnp.bfloat16)                           # bf16 intermediate
    y2_ref[...] = y2b.reshape(1, h, wd, p)
    yf = y2b.astype(jnp.float32)
    s = jnp.sum(yf, axis=0, keepdims=True)
    q = jnp.sum(yf * yf, axis=0, keepdims=True)
    sum_ref[...] = jnp.broadcast_to(s[None], (1, 8, p))
    sq_ref[...] = jnp.broadcast_to(q[None], (1, 8, p))


def _conv3x3_call(y1_nhwc, w2r, scale, shift, *, vmem_limit):
    n, h, wd, p = y1_nhwc.shape
    return pl.pallas_call(
        _bn_relu_conv3x3_stats_kernel,
        out_shape=(jax.ShapeDtypeStruct((n, h, wd, p), jnp.bfloat16),
                   jax.ShapeDtypeStruct((n, 8, p), jnp.float32),
                   jax.ShapeDtypeStruct((n, 8, p), jnp.float32)),
        grid=(n,),
        in_specs=[pl.BlockSpec((1, h, wd, p), lambda i: (i, 0, 0, 0)),
                  pl.BlockSpec((9 * p, p), lambda i: (0, 0)),
                  pl.BlockSpec((1, p), lambda i: (0, 0)),
                  pl.BlockSpec((1, p), lambda i: (0, 0))],
        out_specs=(pl.BlockSpec((1, h, wd, p), lambda i: (i, 0, 0, 0)),
                   pl.BlockSpec((1, 8, p), lambda i: (i, 0, 0)),
                   pl.BlockSpec((1, 8, p), lambda i: (i, 0, 0))),
        scratch_shapes=[pltpu.VMEM((h + 2, wd + 2, p), jnp.float32)],
        compiler_params=_cparams(vmem_limit),
    )(y1_nhwc, w2r, scale, shift)


# ---------------------------------------------------------------------------
# Stage 3a: bn2 + relu -> per-tile column sums + Gram of y2n (for analytic
# BN3 statistics).  Output is tiny, so y3 never needs to be materialized.
# ---------------------------------------------------------------------------
def _bn_relu_gram_kernel(y2_ref, scale_ref, shift_ref, colsum_ref, gram_ref,
                         *, need_mask, tile_m, m_valid):
    y2n = jnp.maximum(y2_ref[...].astype(jnp.float32) * scale_ref[...]
                      + shift_ref[...], 0.0)
    if need_mask:
        base = pl.program_id(0) * tile_m
        rows = jax.lax.broadcasted_iota(jnp.int32, y2n.shape, 0) + base
        y2n = jnp.where(rows < m_valid, y2n, 0.0)
    yb = y2n.astype(jnp.bfloat16)        # exactly what stage 3b feeds the MXU
    p = yb.shape[1]
    colsum = jnp.sum(yb.astype(jnp.float32), axis=0, keepdims=True)   # (1, P)
    gram = jax.lax.dot_general(yb, yb, (((0,), (0,)), ((), ())),
                               preferred_element_type=jnp.float32)    # (P, P)
    colsum_ref[...] = jnp.broadcast_to(colsum[None], (1, 8, p))
    gram_ref[...] = gram[None]


def _bn_relu_gram_call(y2, scale, shift, *, tile_m, need_mask, vmem_limit):
    m, p = y2.shape
    g = _cdiv(m, tile_m)
    kernel = functools.partial(_bn_relu_gram_kernel, need_mask=need_mask,
                               tile_m=tile_m, m_valid=m)
    return pl.pallas_call(
        kernel,
        out_shape=(jax.ShapeDtypeStruct((g, 8, p), jnp.float32),
                   jax.ShapeDtypeStruct((g, p, p), jnp.float32)),
        grid=(g,),
        in_specs=[pl.BlockSpec((tile_m, p), lambda i: (i, 0)),
                  pl.BlockSpec((1, p), lambda i: (0, 0)),
                  pl.BlockSpec((1, p), lambda i: (0, 0))],
        out_specs=(pl.BlockSpec((1, 8, p), lambda i: (i, 0, 0)),
                   pl.BlockSpec((1, p, p), lambda i: (i, 0, 0))),
        compiler_params=_cparams(vmem_limit),
    )(y2, scale, shift)


# ---------------------------------------------------------------------------
# Stage 3b (fused tail): bn2+relu -> conv3 (1x1) -> bn3 -> +residual -> relu.
# ---------------------------------------------------------------------------
def _fused_tail_kernel(y2_ref, x_ref, w3_ref, scale2_ref, shift2_ref,
                       scale3_ref, shift3_ref, out_ref):
    y2n = jnp.maximum(y2_ref[...].astype(jnp.float32) * scale2_ref[...]
                      + shift2_ref[...], 0.0)
    y3 = jnp.dot(y2n.astype(jnp.bfloat16), w3_ref[...],
                 preferred_element_type=jnp.float32)         # (TM, Cp)
    out_ref[...] = jnp.maximum(
        y3 * scale3_ref[...] + shift3_ref[...] + x_ref[...], 0.0)


def _fused_tail_call(y2, x2d, w3p, scale2, shift2, scale3, shift3,
                     *, tile_m, vmem_limit):
    m, p = y2.shape
    cp = w3p.shape[1]
    g = _cdiv(m, tile_m)
    return pl.pallas_call(
        _fused_tail_kernel,
        out_shape=jax.ShapeDtypeStruct((m, cp), jnp.float32),
        grid=(g,),
        in_specs=[pl.BlockSpec((tile_m, p), lambda i: (i, 0)),
                  pl.BlockSpec((tile_m, cp), lambda i: (i, 0)),
                  pl.BlockSpec((p, cp), lambda i: (0, 0)),
                  pl.BlockSpec((1, p), lambda i: (0, 0)),
                  pl.BlockSpec((1, p), lambda i: (0, 0)),
                  pl.BlockSpec((1, cp), lambda i: (0, 0)),
                  pl.BlockSpec((1, cp), lambda i: (0, 0))],
        out_specs=pl.BlockSpec((tile_m, cp), lambda i: (i, 0)),
        compiler_params=_cparams(vmem_limit),
    )(y2, x2d, w3p, scale2, shift2, scale3, shift3)


# ---------------------------------------------------------------------------
# BN finalization (plain JAX on tiny per-tile partials).
# ---------------------------------------------------------------------------
def _finalize_bn(s, q, count, gamma, beta):
    """Per-tile partial sums -> folded per-channel (scale, shift), f32."""
    # TODO(synk): single-pass variance in f32; a two-pass / Welford reduction
    #             would be more robust for extreme count / mean-to-std ratios.
    total = jnp.sum(s[:, 0, :], axis=0)
    total_sq = jnp.sum(q[:, 0, :], axis=0)
    mean = total / count
    var = jnp.maximum(total_sq / count - mean * mean, 0.0)   # biased variance
    scale = gamma * jax.lax.rsqrt(var[None, :] + BN_EPS)     # (1, C)
    shift = beta - mean[None, :] * scale
    return scale, shift


def _finalize_bn3_from_gram(colsum, gram, w3f, count, gamma, beta):
    """Analytic BN3 stats:  sum_i y3[i,c]   = (sum_i y2n[i,:]) @ w3[:,c]
                            sum_i y3[i,c]^2 = w3[:,c]^T (y2n^T y2n) w3[:,c]."""
    hi = jax.lax.Precision.HIGHEST
    csum = jnp.sum(colsum[:, 0, :], axis=0)                        # (P,)
    gsum = jnp.sum(gram, axis=0)                                   # (P, P)
    total = jnp.dot(csum, w3f, precision=hi)                       # (C,)
    gw = jnp.dot(gsum, w3f, precision=hi)                          # (P, C)
    total_sq = jnp.einsum('pc,pc->c', w3f, gw, precision=hi)       # (C,)
    mean = total / count
    var = jnp.maximum(total_sq / count - mean * mean, 0.0)
    scale = gamma * jax.lax.rsqrt(var[None, :] + BN_EPS)
    shift = beta - mean[None, :] * scale
    return scale, shift


# ---------------------------------------------------------------------------
# Public wrappers.
# ---------------------------------------------------------------------------
def bottleneck_forward_nhwc(x_nhwc, params):
    """Fused Bottleneck forward on NHWC input (channels on lanes)."""
    w1, w2, w3, g1, b1, g2, b2, g3, b3 = params
    n, h, wd, cin = x_nhwc.shape
    p = w1.shape[1]
    assert cin == w3.shape[1], "identity residual requires Cin == 4*planes"
    cp = _round_up(cin, _LANES)
    pp = _round_up(p, _LANES)
    m = n * h * wd

    vmem_limit = _vmem_limit_bytes()
    budget = (vmem_limit * 7) // 10          # headroom for compiler scratch

    def pad2(a, r, c):
        return jnp.pad(a, ((0, r - a.shape[0]), (0, c - a.shape[1])))

    # Pad channel dims to full 128-lane vregs; matmul weights -> bf16.
    w1p = pad2(w1, cp, pp).astype(jnp.bfloat16)
    w2p = jnp.pad(w2, ((0, 0), (0, 0), (0, pp - p), (0, pp - p)))
    w2p = w2p.reshape(9 * pp, pp).astype(jnp.bfloat16)
    w3p = pad2(w3, pp, cp).astype(jnp.bfloat16)
    w3f = w3p.astype(jnp.float32)            # exactly the weights the MXU sees
    g1p, b1p = pad2(g1, 1, pp), pad2(b1, 1, pp)
    g2p, b2p = pad2(g2, 1, pp), pad2(b2, 1, pp)
    g3p, b3p = pad2(g3, 1, cp), pad2(b3, 1, cp)

    x2d = x_nhwc.reshape(m, cin)
    if cp != cin:
        x2d = jnp.pad(x2d, ((0, 0), (0, cp - cin)))          # (M, Cp) f32

    # ---- stage 1: conv1 (1x1) -> y1 bf16 + partial BN1 stats ------------
    t1, mask1 = _pick_tile_m(m, 4 * cp + 2 * pp, 2 * cp * pp * 2, budget)
    y1, s1, q1 = _conv1_stats_call(x2d, w1p, tile_m=t1, need_mask=mask1,
                                   vmem_limit=vmem_limit)
    scale1, shift1 = _finalize_bn(s1, q1, m, g1p, b1p)

    # ---- stage 2: bn1+relu -> conv2 (3x3) -> y2 bf16 + partial BN2 stats -
    y1_nhwc = y1.reshape(n, h, wd, pp)
    y2_nhwc, s2, q2 = _conv3x3_call(y1_nhwc, w2p, scale1, shift1,
                                    vmem_limit=vmem_limit)
    scale2, shift2 = _finalize_bn(s2, q2, m, g2p, b2p)

    # ---- stage 3a: analytic BN3 stats (column sums + Gram of y2n) --------
    y2 = y2_nhwc.reshape(m, pp)
    t3, mask3 = _pick_tile_m(m, 2 * pp, 2 * (pp * pp * 4 + 8 * pp * 8), budget)
    s3, gram = _bn_relu_gram_call(y2, scale2, shift2, tile_m=t3,
                                  need_mask=mask3, vmem_limit=vmem_limit)
    scale3, shift3 = _finalize_bn3_from_gram(s3, gram, w3f, m, g3p, b3p)

    # ---- stage 3b: bn2+relu -> conv3 -> bn3 -> +residual -> relu (fused) --
    t4, _ = _pick_tile_m(m, 2 * pp + 8 * cp, 2 * pp * cp * 2, budget)
    out = _fused_tail_call(y2, x2d, w3p, scale2, shift2, scale3, shift3,
                           tile_m=t4, vmem_limit=vmem_limit)
    if cp != cin:
        out = out[:, :cin]
    return out.reshape(n, h, wd, cin)


@jax.jit
def bottleneck_forward(x_nchw, params):
    """x_nchw: (N, Cin, H, W) f32, Cin == 4*planes.  Returns NCHW.

    Note: each NCHW<->NHWC transpose costs a full HBM round trip; callers that
    can produce/consume NHWC should call bottleneck_forward_nhwc directly."""
    x_nhwc = jnp.transpose(x_nchw, (0, 2, 3, 1))
    out = bottleneck_forward_nhwc(x_nhwc, params)
    return jnp.transpose(out, (0, 3, 1, 2))


def init_params(key, inplanes, planes):
    """Deterministic synthetic init matching the nn.Module parameter shapes."""
    k1, k2, k3 = jax.random.split(key, 3)
    # PyTorch conv weights are (Cout, Cin, kh, kw); we store kernel-ready
    # layouts: (Cin, Cout) for 1x1 and (kh, kw, Cin, Cout) for 3x3.
    w1 = jax.random.normal(k1, (inplanes, planes), jnp.float32) * 0.1
    w2 = jax.random.normal(k2, (3, 3, planes, planes), jnp.float32) * 0.1
    w3 = jax.random.normal(k3, (planes, planes * 4), jnp.float32) * 0.1
    # BatchNorm2d default init: weight=1, bias=0 (kept (1, C) for TPU lanes).
    g1 = jnp.ones((1, planes), jnp.float32)
    b1 = jnp.zeros((1, planes), jnp.float32)
    g2 = jnp.ones((1, planes), jnp.float32)
    b2 = jnp.zeros((1, planes), jnp.float32)
    g3 = jnp.ones((1, planes * 4), jnp.float32)
    b3 = jnp.zeros((1, planes * 4), jnp.float32)
    return (w1, w2, w3, g1, b1, g2, b2, g3, b3)


def _reference(x_nchw, params):
    """Pure-JAX f32 reference with the PyTorch module's (train-mode) semantics."""
    w1, w2, w3, g1, b1, g2, b2, g3, b3 = params
    hi = jax.lax.Precision.HIGHEST

    def bn(y, g, b):
        mean = jnp.mean(y, axis=(0, 2, 3), keepdims=True)
        var = jnp.mean((y - mean) ** 2, axis=(0, 2, 3), keepdims=True)
        return ((y - mean) * jax.lax.rsqrt(var + BN_EPS)
                * g.reshape(1, -1, 1, 1) + b.reshape(1, -1, 1, 1))

    y = jnp.einsum('nchw,cp->nphw', x_nchw, w1, precision=hi)
    y = jax.nn.relu(bn(y, g1, b1))
    y = jax.lax.conv_general_dilated(
        y, w2, window_strides=(1, 1), padding=((1, 1), (1, 1)),
        dimension_numbers=('NCHW', 'HWIO', 'NCHW'), precision=hi)
    y = jax.nn.relu(bn(y, g2, b2))
    y = jnp.einsum('nphw,pc->nchw', y, w3, precision=hi)
    y = bn(y, g3, b3)
    return jax.nn.relu(y + x_nchw)


if __name__ == "__main__":
    key = jax.random.PRNGKey(0)
    planes = 8
    inplanes = planes * 4            # identity residual needs Cin == 4*planes
    n, h, w = 2, 16, 16

    kx, kp = jax.random.split(key)
    x = jax.random.normal(kx, (n, inplanes, h, w), jnp.float32)   # NCHW input
    params = init_params(kp, inplanes, planes)

    out = bottleneck_forward(x, params)
    jax.block_until_ready(out)

    assert out.shape == (n, inplanes, h, w)
    assert bool(jnp.all(out >= 0.0))                 # final ReLU sanity check
    ref = _reference(x, params)
    err = float(jnp.max(jnp.abs(out - ref)))
    # bf16 MXU operands + bf16 inter-stage activations (f32 accumulation, f32
    # BN math) => small mixed-precision deviation from the pure-f32 reference;
    # structural bugs would be O(1).
    assert err < 0.25, f"max abs error vs f32 reference too large: {err}"
    print("KERNEL_OK")
</pallas_src>

<mosaic_0001>
module attributes {stable_mosaic.version = 11 : i64} {
  func.func @_bn_relu_conv3x3_stats_kernel(%arg0: i32, %arg1: memref<1x16x16x128xbf16, #tpu.memory_space<vmem>>, %arg2: memref<1152x128xbf16, #tpu.memory_space<vmem>>, %arg3: memref<1x128xf32, #tpu.memory_space<vmem>>, %arg4: memref<1x128xf32, #tpu.memory_space<vmem>>, %arg5: memref<1x16x16x128xbf16, #tpu.memory_space<vmem>>, %arg6: memref<1x8x128xf32, #tpu.memory_space<vmem>>, %arg7: memref<1x8x128xf32, #tpu.memory_space<vmem>>, %arg8: memref<18x18x128xf32, #tpu.memory_space<vmem>>) attributes {dimension_semantics = [#tpu.dimension_semantics<parallel>], iteration_bounds = array<i64: 2>, scalar_prefetch = 0 : i64, scratch_operands = 1 : i64, tpu.core_type = #tpu.core_type<tc>, window_params = [{transform_indices = @transform_0, window_bounds = array<i64: 1, 16, 16, 128>}, {pipeline_mode = #tpu.pipeline_mode<synchronous>, transform_indices = @transform_1, window_bounds = array<i64: 1152, 128>}, {pipeline_mode = #tpu.pipeline_mode<synchronous>, transform_indices = @transform_2, window_bounds = array<i64: 1, 128>}, {pipeline_mode = #tpu.pipeline_mode<synchronous>, transform_indices = @transform_3, window_bounds = array<i64: 1, 128>}, {transform_indices = @transform_4, window_bounds = array<i64: 1, 16, 16, 128>}, {transform_indices = @transform_5, window_bounds = array<i64: 1, 8, 128>}, {transform_indices = @transform_6, window_bounds = array<i64: 1, 8, 128>}]} {
    %c0 = arith.constant 0 : index
    %c0_0 = arith.constant 0 : index
    %c0_1 = arith.constant 0 : index
    %c0_2 = arith.constant 0 : index
    %0 = vector.load %arg1[%c0, %c0_0, %c0_1, %c0_2] : memref<1x16x16x128xbf16, #tpu.memory_space<vmem>>, vector<1x16x16x128xbf16>
    %1 = vector.shape_cast %0 : vector<1x16x16x128xbf16> to vector<16x16x128xbf16>
    %2 = arith.extf %1 : vector<16x16x128xbf16> to vector<16x16x128xf32>
    %c0_3 = arith.constant 0 : index
    %c0_4 = arith.constant 0 : index
    %3 = vector.load %arg3[%c0_3, %c0_4] : memref<1x128xf32, #tpu.memory_space<vmem>>, vector<1x128xf32>
    %4 = vector.shape_cast %3 : vector<1x128xf32> to vector<1x1x128xf32>
    %5 = vector.broadcast %4 : vector<1x1x128xf32> to vector<16x16x128xf32>
    %6 = arith.mulf %2, %5 : vector<16x16x128xf32>
    %c0_5 = arith.constant 0 : index
    %c0_6 = arith.constant 0 : index
    %7 = vector.load %arg4[%c0_5, %c0_6] : memref<1x128xf32, #tpu.memory_space<vmem>>, vector<1x128xf32>
    %8 = vector.shape_cast %7 : vector<1x128xf32> to vector<1x1x128xf32>
    %9 = vector.broadcast %8 : vector<1x1x128xf32> to vector<16x16x128xf32>
    %10 = arith.addf %6, %9 : vector<16x16x128xf32>
    %cst = arith.constant 0.000000e+00 : f32
    %11 = vector.broadcast %cst : f32 to vector<16x16x128xf32>
    %12 = arith.maximumf %10, %11 : vector<16x16x128xf32>
    %cst_7 = arith.constant 0.000000e+00 : f32
    %13 = vector.broadcast %cst_7 : f32 to vector<1x18x128xf32>
    %cst_8 = arith.constant 0.000000e+00 : f32
    %14 = vector.broadcast %cst_8 : f32 to vector<18x1x128xf32>
    %c0_9 = arith.constant 0 : index
    %c0_10 = arith.constant 0 : index
    %c0_11 = arith.constant 0 : index
    %15 = vector.load %arg8[%c0_9, %c0_10, %c0_11] : memref<18x18x128xf32, #tpu.memory_space<vmem>>, vector<1x18x128xf32>
    tpu.vector_store %arg8[%c0_9, %c0_10, %c0_11], %13 {strides = array<i32>} : memref<18x18x128xf32, #tpu.memory_space<vmem>>, vector<1x18x128xf32>,
    %c17 = arith.constant 17 : index
    %c0_12 = arith.constant 0 : index
    %c0_13 = arith.constant 0 : index
    %16 = vector.load %arg8[%c17, %c0_12, %c0_13] : memref<18x18x128xf32, #tpu.memory_space<vmem>>, vector<1x18x128xf32>
    tpu.vector_store %arg8[%c17, %c0_12, %c0_13], %13 {strides = array<i32>} : memref<18x18x128xf32, #tpu.memory_space<vmem>>, vector<1x18x128xf32>,
    %c0_14 = arith.constant 0 : index
    %c0_15 = arith.constant 0 : index
    %c0_16 = arith.constant 0 : index
    %17 = vector.load %arg8[%c0_14, %c0_15, %c0_16] : memref<18x18x128xf32, #tpu.memory_space<vmem>>, vector<18x1x128xf32>
    tpu.vector_store %arg8[%c0_14, %c0_15, %c0_16], %14 {strides = array<i32>} : memref<18x18x128xf32, #tpu.memory_space<vmem>>, vector<18x1x128xf32>,
    %c0_17 = arith.constant 0 : index
    %c17_18 = arith.constant 17 : index
    %c0_19 = arith.constant 0 : index
    %18 = vector.load %arg8[%c0_17, %c17_18, %c0_19] : memref<18x18x128xf32, #tpu.memory_space<vmem>>, vector<18x1x128xf32>
    tpu.vector_store %arg8[%c0_17, %c17_18, %c0_19], %14 {strides = array<i32>} : memref<18x18x128xf32, #tpu.memory_space<vmem>>, vector<18x1x128xf32>,
    %c1 = arith.constant 1 : index
    %c1_20 = arith.constant 1 : index
    %c0_21 = arith.constant 0 : index
    %19 = vector.load %arg8[%c1, %c1_20, %c0_21] : memref<18x18x128xf32, #tpu.memory_space<vmem>>, vector<16x16x128xf32>
    tpu.vector_store %arg8[%c1, %c1_20, %c0_21], %12 {strides = array<i32>} : memref<18x18x128xf32, #tpu.memory_space<vmem>>, vector<16x16x128xf32>,
    %cst_22 = arith.constant 0.000000e+00 : f32
    %20 = vector.broadcast %cst_22 : f32 to vector<256x128xf32>
    %c0_23 = arith.constant 0 : index
    %c0_24 = arith.constant 0 : index
    %c0_25 = arith.constant 0 : index
    %21 = vector.load %arg8[%c0_23, %c0_24, %c0_25] : memref<18x18x128xf32, #tpu.memory_space<vmem>>, vector<16x16x128xf32>
    %22 = arith.truncf %21 : vector<16x16x128xf32> to vector<16x16x128xbf16>
    %c0_26 = arith.constant 0 : index
    %c1_27 = arith.constant 1 : index
    %c0_28 = arith.constant 0 : index
    %23 = vector.load %arg8[%c0_26, %c1_27, %c0_28] : memref<18x18x128xf32, #tpu.memory_space<vmem>>, vector<16x16x128xf32>
    %24 = arith.truncf %23 : vector<16x16x128xf32> to vector<16x16x128xbf16>
    %c0_29 = arith.constant 0 : index
    %c2 = arith.constant 2 : index
    %c0_30 = arith.constant 0 : index
    %25 = vector.load %arg8[%c0_29, %c2, %c0_30] : memref<18x18x128xf32, #tpu.memory_space<vmem>>, vector<16x16x128xf32>
    %26 = arith.truncf %25 : vector<16x16x128xf32> to vector<16x16x128xbf16>
    %27 = tpu.concatenate %22, %24, %26 in 2 : vector<16x16x128xbf16>, vector<16x16x128xbf16>, vector<16x16x128xbf16> -> vector<16x16x384xbf16>
    %28 = vector.shape_cast %27 : vector<16x16x384xbf16> to vector<256x384xbf16>
    %c0_31 = arith.constant 0 : index
    %c0_32 = arith.constant 0 : index
    %29 = vector.load %arg2[%c0_31, %c0_32] : memref<1152x128xbf16, #tpu.memory_space<vmem>>, vector<384x128xbf16>
    %cst_33 = arith.constant dense<0.000000e+00> : vector<256x128xf32>
    %30 = tpu.matmul %28, %29, %cst_33 {dimension_numbers = #tpu.dot_dimension_numbers<[1], [0], [0], [1], [0, 0, 1, 1], [], []>} : vector<256x384xbf16>, vector<384x128xbf16>, vector<256x128xf32> -> vector<256x128xf32>
    %31 = arith.addf %20, %30 : vector<256x128xf32>
    %c1_34 = arith.constant 1 : index
    %c0_35 = arith.constant 0 : index
    %c0_36 = arith.constant 0 : index
    %32 = vector.load %arg8[%c1_34, %c0_35, %c0_36] : memref<18x18x128xf32, #tpu.memory_space<vmem>>, vector<16x16x128xf32>
    %33 = arith.truncf %32 : vector<16x16x128xf32> to vector<16x16x128xbf16>
    %c1_37 = arith.constant 1 : index
    %c1_38 = arith.constant 1 : index
    %c0_39 = arith.constant 0 : index
    %34 = vector.load %arg8[%c1_37, %c1_38, %c0_39] : memref<18x18x128xf32, #tpu.memory_space<vmem>>, vector<16x16x128xf32>
    %35 = arith.truncf %34 : vector<16x16x128xf32> to vector<16x16x128xbf16>
    %c1_40 = arith.constant 1 : index
    %c2_41 = arith.constant 2 : index
    %c0_42 = arith.constant 0 : index
    %36 = vector.load %arg8[%c1_40, %c2_41, %c0_42] : memref<18x18x128xf32, #tpu.memory_space<vmem>>, vector<16x16x128xf32>
    %37 = arith.truncf %36 : vector<16x16x128xf32> to vector<16x16x128xbf16>
    %38 = tpu.concatenate %33, %35, %37 in 2 : vector<16x16x128xbf16>, vector<16x16x128xbf16>, vector<16x16x128xbf16> -> vector<16x16x384xbf16>
    %39 = vector.shape_cast %38 : vector<16x16x384xbf16> to vector<256x384xbf16>
    %c384 = arith.constant 384 : index
    %c0_43 = arith.constant 0 : index
    %40 = vector.load %arg2[%c384, %c0_43] : memref<1152x128xbf16, #tpu.memory_space<vmem>>, vector<384x128xbf16>
    %cst_44 = arith.constant dense<0.000000e+00> : vector<256x128xf32>
    %41 = tpu.matmul %39, %40, %cst_44 {dimension_numbers = #tpu.dot_dimension_numbers<[1], [0], [0], [1], [0, 0, 1, 1], [], []>} : vector<256x384xbf16>, vector<384x128xbf16>, vector<256x128xf32> -> vector<256x128xf32>
    %42 = arith.addf %31, %41 : vector<256x128xf32>
    %c2_45 = arith.constant 2 : index
    %c0_46 = arith.constant 0 : index
    %c0_47 = arith.constant 0 : index
    %43 = vector.load %arg8[%c2_45, %c0_46, %c0_47] : memref<18x18x128xf32, #tpu.memory_space<vmem>>, vector<16x16x128xf32>
    %44 = arith.truncf %43 : vector<16x16x128xf32> to vector<16x16x128xbf16>
    %c2_48 = arith.constant 2 : index
    %c1_49 = arith.constant 1 : index
    %c0_50 = arith.constant 0 : index
    %45 = vector.load %arg8[%c2_48, %c1_49, %c0_50] : memref<18x18x128xf32, #tpu.memory_space<vmem>>, vector<16x16x128xf32>
    %46 = arith.truncf %45 : vector<16x16x128xf32> to vector<16x16x128xbf16>
    %c2_51 = arith.constant 2 : index
    %c2_52 = arith.constant 2 : index
    %c0_53 = arith.constant 0 : index
    %47 = vector.load %arg8[%c2_51, %c2_52, %c0_53] : memref<18x18x128xf32, #tpu.memory_space<vmem>>, vector<16x16x128xf32>
    %48 = arith.truncf %47 : vector<16x16x128xf32> to vector<16x16x128xbf16>
    %49 = tpu.concatenate %44, %46, %48 in 2 : vector<16x16x128xbf16>, vector<16x16x128xbf16>, vector<16x16x128xbf16> -> vector<16x16x384xbf16>
    %50 = vector.shape_cast %49 : vector<16x16x384xbf16> to vector<256x384xbf16>
    %c768 = arith.constant 768 : index
    %c0_54 = arith.constant 0 : index
    %51 = vector.load %arg2[%c768, %c0_54] : memref<1152x128xbf16, #tpu.memory_space<vmem>>, vector<384x128xbf16>
    %cst_55 = arith.constant dense<0.000000e+00> : vector<256x128xf32>
    %52 = tpu.matmul %50, %51, %cst_55 {dimension_numbers = #tpu.dot_dimension_numbers<[1], [0], [0], [1], [0, 0, 1, 1], [], []>} : vector<256x384xbf16>, vector<384x128xbf16>, vector<256x128xf32> -> vector<256x128xf32>
    %53 = arith.addf %42, %52 : vector<256x128xf32>
    %54 = arith.truncf %53 : vector<256x128xf32> to vector<256x128xbf16>
    %55 = vector.shape_cast %54 : vector<256x128xbf16> to vector<1x16x16x128xbf16>
    %c0_56 = arith.constant 0 : index
    %c0_57 = arith.constant 0 : index
    %c0_58 = arith.constant 0 : index
    %c0_59 = arith.constant 0 : index
    %56 = vector.load %arg5[%c0_56, %c0_57, %c0_58, %c0_59] : memref<1x16x16x128xbf16, #tpu.memory_space<vmem>>, vector<1x16x16x128xbf16>
    tpu.vector_store %arg5[%c0_56, %c0_57, %c0_58, %c0_59], %55 {strides = array<i32>} : memref<1x16x16x128xbf16, #tpu.memory_space<vmem>>, vector<1x16x16x128xbf16>,
    %57 = arith.extf %54 : vector<256x128xbf16> to vector<256x128xf32>
    %cst_60 = arith.constant dense<0.000000e+00> : vector<128xf32>
    %58 = vector.multi_reduction <add>, %57, %cst_60 [0] : vector<256x128xf32> to vector<128xf32>
    %59 = vector.shape_cast %58 : vector<128xf32> to vector<1x128xf32>
    %60 = arith.mulf %57, %57 : vector<256x128xf32>
    %cst_61 = arith.constant dense<0.000000e+00> : vector<128xf32>
    %61 = vector.multi_reduction <add>, %60, %cst_61 [0] : vector<256x128xf32> to vector<128xf32>
    %62 = vector.shape_cast %61 : vector<128xf32> to vector<1x128xf32>
    %63 = vector.shape_cast %59 : vector<1x128xf32> to vector<1x1x128xf32>
    %64 = vector.shape_cast %63 : vector<1x1x128xf32> to vector<1x1x128xf32>
    %65 = vector.broadcast %64 : vector<1x1x128xf32> to vector<1x8x128xf32>
    %c0_62 = arith.constant 0 : index
    %c0_63 = arith.constant 0 : index
    %c0_64 = arith.constant 0 : index
    %66 = vector.load %arg6[%c0_62, %c0_63, %c0_64] : memref<1x8x128xf32, #tpu.memory_space<vmem>>, vector<1x8x128xf32>
    tpu.vector_store %arg6[%c0_62, %c0_63, %c0_64], %65 {strides = array<i32>} : memref<1x8x128xf32, #tpu.memory_space<vmem>>, vector<1x8x128xf32>,
    %67 = vector.shape_cast %62 : vector<1x128xf32> to vector<1x1x128xf32>
    %68 = vector.shape_cast %67 : vector<1x1x128xf32> to vector<1x1x128xf32>
    %69 = vector.broadcast %68 : vector<1x1x128xf32> to vector<1x8x128xf32>
    %c0_65 = arith.constant 0 : index
    %c0_66 = arith.constant 0 : index
    %c0_67 = arith.constant 0 : index
    %70 = vector.load %arg7[%c0_65, %c0_66, %c0_67] : memref<1x8x128xf32, #tpu.memory_space<vmem>>, vector<1x8x128xf32>
    tpu.vector_store %arg7[%c0_65, %c0_66, %c0_67], %69 {strides = array<i32>} : memref<1x8x128xf32, #tpu.memory_space<vmem>>, vector<1x8x128xf32>,
    return
  }
  func.func @transform_0(%arg0: i32) -> (i32, i32, i32, i32) {
    %c0_i32 = arith.constant 0 : i32
    %c0_i32_0 = arith.constant 0 : i32
    %c0_i32_1 = arith.constant 0 : i32
    %c0_i32_2 = arith.constant 0 : i32
    return %arg0, %c0_i32, %c0_i32_0, %c0_i32_1 : i32, i32, i32, i32
  }
  func.func @transform_1(%arg0: i32) -> (i32, i32) {
    %c0_i32 = arith.constant 0 : i32
    %c0_i32_0 = arith.constant 0 : i32
    %c0_i32_1 = arith.constant 0 : i32
    return %c0_i32, %c0_i32_0 : i32, i32
  }
  func.func @transform_2(%arg0: i32) -> (i32, i32) {
    %c0_i32 = arith.constant 0 : i32
    %c0_i32_0 = arith.constant 0 : i32
    %c0_i32_1 = arith.constant 0 : i32
    return %c0_i32, %c0_i32_0 : i32, i32
  }
  func.func @transform_3(%arg0: i32) -> (i32, i32) {
    %c0_i32 = arith.constant 0 : i32
    %c0_i32_0 = arith.constant 0 : i32
    %c0_i32_1 = arith.constant 0 : i32
    return %c0_i32, %c0_i32_0 : i32, i32
  }
  func.func @transform_4(%arg0: i32) -> (i32, i32, i32, i32) {
    %c0_i32 = arith.constant 0 : i32
    %c0_i32_0 = arith.constant 0 : i32
    %c0_i32_1 = arith.constant 0 : i32
    %c0_i32_2 = arith.constant 0 : i32
    return %arg0, %c0_i32, %c0_i32_0, %c0_i32_1 : i32, i32, i32, i32
  }
  func.func @transform_5(%arg0: i32) -> (i32, i32, i32) {
    %c0_i32 = arith.constant 0 : i32
    %c0_i32_0 = arith.constant 0 : i32
    %c0_i32_1 = arith.constant 0 : i32
    return %arg0, %c0_i32, %c0_i32_0 : i32, i32, i32
  }
  func.func @transform_6(%arg0: i32) -> (i32, i32, i32) {
    %c0_i32 = arith.constant 0 : i32
    %c0_i32_0 = arith.constant 0 : i32
    %c0_i32_1 = arith.constant 0 : i32
    return %arg0, %c0_i32, %c0_i32_0 : i32, i32, i32
  }
}

module attributes {stable_mosaic.version = 11 : i64} {
  func.func @_conv1_stats_kernel(%arg0: i32, %arg1: memref<512x128xf32, #tpu.memory_space<vmem>>, %arg2: memref<128x128xbf16, #tpu.memory_space<vmem>>, %arg3: memref<512x128xbf16, #tpu.memory_space<vmem>>, %arg4: memref<1x8x128xf32, #tpu.memory_space<vmem>>, %arg5: memref<1x8x128xf32, #tpu.memory_space<vmem>>) attributes {dimension_semantics = [#tpu.dimension_semantics<parallel>], iteration_bounds = array<i64: 1>, scalar_prefetch = 0 : i64, scratch_operands = 0 : i64, tpu.core_type = #tpu.core_type<tc>, window_params = [{transform_indices = @transform_0, window_bounds = array<i64: 512, 128>}, {pipeline_mode = #tpu.pipeline_mode<synchronous>, transform_indices = @transform_1, window_bounds = array<i64: 128, 128>}, {transform_indices = @transform_2, window_bounds = array<i64: 512, 128>}, {transform_indices = @transform_3, window_bounds = array<i64: 1, 8, 128>}, {transform_indices = @transform_4, window_bounds = array<i64: 1, 8, 128>}]} {
    %c0 = arith.constant 0 : index
    %c0_0 = arith.constant 0 : index
    %0 = vector.load %arg1[%c0, %c0_0] : memref<512x128xf32, #tpu.memory_space<vmem>>, vector<512x128xf32>
    %1 = arith.truncf %0 : vector<512x128xf32> to vector<512x128xbf16>
    %c0_1 = arith.constant 0 : index
    %c0_2 = arith.constant 0 : index
    %2 = vector.load %arg2[%c0_1, %c0_2] : memref<128x128xbf16, #tpu.memory_space<vmem>>, vector<128x128xbf16>
    %cst = arith.constant dense<0.000000e+00> : vector<512x128xf32>
    %3 = tpu.matmul %1, %2, %cst {dimension_numbers = #tpu.dot_dimension_numbers<[1], [0], [0], [1], [0, 0, 1, 1], [], []>} : vector<512x128xbf16>, vector<128x128xbf16>, vector<512x128xf32> -> vector<512x128xf32>
    %4 = arith.truncf %3 : vector<512x128xf32> to vector<512x128xbf16>
    %c0_3 = arith.constant 0 : index
    %c0_4 = arith.constant 0 : index
    %5 = vector.load %arg3[%c0_3, %c0_4] : memref<512x128xbf16, #tpu.memory_space<vmem>>, vector<512x128xbf16>
    tpu.vector_store %arg3[%c0_3, %c0_4], %4 {strides = array<i32>} : memref<512x128xbf16, #tpu.memory_space<vmem>>, vector<512x128xbf16>,
    %6 = arith.extf %4 : vector<512x128xbf16> to vector<512x128xf32>
    %cst_5 = arith.constant dense<0.000000e+00> : vector<128xf32>
    %7 = vector.multi_reduction <add>, %6, %cst_5 [0] : vector<512x128xf32> to vector<128xf32>
    %8 = vector.shape_cast %7 : vector<128xf32> to vector<1x128xf32>
    %9 = arith.mulf %6, %6 : vector<512x128xf32>
    %cst_6 = arith.constant dense<0.000000e+00> : vector<128xf32>
    %10 = vector.multi_reduction <add>, %9, %cst_6 [0] : vector<512x128xf32> to vector<128xf32>
    %11 = vector.shape_cast %10 : vector<128xf32> to vector<1x128xf32>
    %12 = vector.shape_cast %8 : vector<1x128xf32> to vector<1x1x128xf32>
    %13 = vector.shape_cast %12 : vector<1x1x128xf32> to vector<1x1x128xf32>
    %14 = vector.broadcast %13 : vector<1x1x128xf32> to vector<1x8x128xf32>
    %c0_7 = arith.constant 0 : index
    %c0_8 = arith.constant 0 : index
    %c0_9 = arith.constant 0 : index
    %15 = vector.load %arg4[%c0_7, %c0_8, %c0_9] : memref<1x8x128xf32, #tpu.memory_space<vmem>>, vector<1x8x128xf32>
    tpu.vector_store %arg4[%c0_7, %c0_8, %c0_9], %14 {strides = array<i32>} : memref<1x8x128xf32, #tpu.memory_space<vmem>>, vector<1x8x128xf32>,
    %16 = vector.shape_cast %11 : vector<1x128xf32> to vector<1x1x128xf32>
    %17 = vector.shape_cast %16 : vector<1x1x128xf32> to vector<1x1x128xf32>
    %18 = vector.broadcast %17 : vector<1x1x128xf32> to vector<1x8x128xf32>
    %c0_10 = arith.constant 0 : index
    %c0_11 = arith.constant 0 : index
    %c0_12 = arith.constant 0 : index
    %19 = vector.load %arg5[%c0_10, %c0_11, %c0_12] : memref<1x8x128xf32, #tpu.memory_space<vmem>>, vector<1x8x128xf32>
    tpu.vector_store %arg5[%c0_10, %c0_11, %c0_12], %18 {strides = array<i32>} : memref<1x8x128xf32, #tpu.memory_space<vmem>>, vector<1x8x128xf32>,
    return
  }
  func.func @transform_0(%arg0: i32) -> (i32, i32) {
    %c0_i32 = arith.constant 0 : i32
    %c0_i32_0 = arith.constant 0 : i32
    return %arg0, %c0_i32 : i32, i32
  }
  func.func @transform_1(%arg0: i32) -> (i32, i32) {
    %c0_i32 = arith.constant 0 : i32
    %c0_i32_0 = arith.constant 0 : i32
    %c0_i32_1 = arith.constant 0 : i32
    return %c0_i32, %c0_i32_0 : i32, i32
  }
  func.func @transform_2(%arg0: i32) -> (i32, i32) {
    %c0_i32 = arith.constant 0 : i32
    %c0_i32_0 = arith.constant 0 : i32
    return %arg0, %c0_i32 : i32, i32
  }
  func.func @transform_3(%arg0: i32) -> (i32, i32, i32) {
    %c0_i32 = arith.constant 0 : i32
    %c0_i32_0 = arith.constant 0 : i32
    %c0_i32_1 = arith.constant 0 : i32
    return %arg0, %c0_i32, %c0_i32_0 : i32, i32, i32
  }
  func.func @transform_4(%arg0: i32) -> (i32, i32, i32) {
    %c0_i32 = arith.constant 0 : i32
    %c0_i32_0 = arith.constant 0 : i32
    %c0_i32_1 = arith.constant 0 : i32
    return %arg0, %c0_i32, %c0_i32_0 : i32, i32, i32
  }
}

module attributes {stable_mosaic.version = 11 : i64} {
  func.func @_bn_relu_gram_kernel(%arg0: i32, %arg1: memref<512x128xbf16, #tpu.memory_space<vmem>>, %arg2: memref<1x128xf32, #tpu.memory_space<vmem>>, %arg3: memref<1x128xf32, #tpu.memory_space<vmem>>, %arg4: memref<1x8x128xf32, #tpu.memory_space<vmem>>, %arg5: memref<1x128x128xf32, #tpu.memory_space<vmem>>) attributes {dimension_semantics = [#tpu.dimension_semantics<parallel>], iteration_bounds = array<i64: 1>, scalar_prefetch = 0 : i64, scratch_operands = 0 : i64, tpu.core_type = #tpu.core_type<tc>, window_params = [{transform_indices = @transform_0, window_bounds = array<i64: 512, 128>}, {pipeline_mode = #tpu.pipeline_mode<synchronous>, transform_indices = @transform_1, window_bounds = array<i64: 1, 128>}, {pipeline_mode = #tpu.pipeline_mode<synchronous>, transform_indices = @transform_2, window_bounds = array<i64: 1, 128>}, {transform_indices = @transform_3, window_bounds = array<i64: 1, 8, 128>}, {transform_indices = @transform_4, window_bounds = array<i64: 1, 128, 128>}]} {
    %c0 = arith.constant 0 : index
    %c0_0 = arith.constant 0 : index
    %0 = vector.load %arg1[%c0, %c0_0] : memref<512x128xbf16, #tpu.memory_space<vmem>>, vector<512x128xbf16>
    %1 = arith.extf %0 : vector<512x128xbf16> to vector<512x128xf32>
    %c0_1 = arith.constant 0 : index
    %c0_2 = arith.constant 0 : index
    %2 = vector.load %arg2[%c0_1, %c0_2] : memref<1x128xf32, #tpu.memory_space<vmem>>, vector<1x128xf32>
    %3 = vector.broadcast %2 : vector<1x128xf32> to vector<512x128xf32>
    %4 = arith.mulf %1, %3 : vector<512x128xf32>
    %c0_3 = arith.constant 0 : index
    %c0_4 = arith.constant 0 : index
    %5 = vector.load %arg3[%c0_3, %c0_4] : memref<1x128xf32, #tpu.memory_space<vmem>>, vector<1x128xf32>
    %6 = vector.broadcast %5 : vector<1x128xf32> to vector<512x128xf32>
    %7 = arith.addf %4, %6 : vector<512x128xf32>
    %cst = arith.constant 0.000000e+00 : f32
    %8 = vector.broadcast %cst : f32 to vector<512x128xf32>
    %9 = arith.maximumf %7, %8 : vector<512x128xf32>
    %10 = arith.truncf %9 : vector<512x128xf32> to vector<512x128xbf16>
    %11 = arith.extf %10 : vector<512x128xbf16> to vector<512x128xf32>
    %cst_5 = arith.constant dense<0.000000e+00> : vector<128xf32>
    %12 = vector.multi_reduction <add>, %11, %cst_5 [0] : vector<512x128xf32> to vector<128xf32>
    %13 = vector.shape_cast %12 : vector<128xf32> to vector<1x128xf32>
    %cst_6 = arith.constant dense<0.000000e+00> : vector<128x128xf32>
    %14 = tpu.matmul %10, %10, %cst_6 {dimension_numbers = #tpu.dot_dimension_numbers<[0], [0], [1], [1], [0, 1, 1, 1], [], []>} : vector<512x128xbf16>, vector<512x128xbf16>, vector<128x128xf32> -> vector<128x128xf32>
    %15 = vector.shape_cast %13 : vector<1x128xf32> to vector<1x1x128xf32>
    %16 = vector.shape_cast %15 : vector<1x1x128xf32> to vector<1x1x128xf32>
    %17 = vector.broadcast %16 : vector<1x1x128xf32> to vector<1x8x128xf32>
    %c0_7 = arith.constant 0 : index
    %c0_8 = arith.constant 0 : index
    %c0_9 = arith.constant 0 : index
    %18 = vector.load %arg4[%c0_7, %c0_8, %c0_9] : memref<1x8x128xf32, #tpu.memory_space<vmem>>, vector<1x8x128xf32>
    tpu.vector_store %arg4[%c0_7, %c0_8, %c0_9], %17 {strides = array<i32>} : memref<1x8x128xf32, #tpu.memory_space<vmem>>, vector<1x8x128xf32>,
    %19 = vector.shape_cast %14 : vector<128x128xf32> to vector<1x128x128xf32>
    %c0_10 = arith.constant 0 : index
    %c0_11 = arith.constant 0 : index
    %c0_12 = arith.constant 0 : index
    %20 = vector.load %arg5[%c0_10, %c0_11, %c0_12] : memref<1x128x128xf32, #tpu.memory_space<vmem>>, vector<1x128x128xf32>
    tpu.vector_store %arg5[%c0_10, %c0_11, %c0_12], %19 {strides = array<i32>} : memref<1x128x128xf32, #tpu.memory_space<vmem>>, vector<1x128x128xf32>,
    return
  }
  func.func @transform_0(%arg0: i32) -> (i32, i32) {
    %c0_i32 = arith.constant 0 : i32
    %c0_i32_0 = arith.constant 0 : i32
    return %arg0, %c0_i32 : i32, i32
  }
  func.func @transform_1(%arg0: i32) -> (i32, i32) {
    %c0_i32 = arith.constant 0 : i32
    %c0_i32_0 = arith.constant 0 : i32
    %c0_i32_1 = arith.constant 0 : i32
    return %c0_i32, %c0_i32_0 : i32, i32
  }
  func.func @transform_2(%arg0: i32) -> (i32, i32) {
    %c0_i32 = arith.constant 0 : i32
    %c0_i32_0 = arith.constant 0 : i32
    %c0_i32_1 = arith.constant 0 : i32
    return %c0_i32, %c0_i32_0 : i32, i32
  }
  func.func @transform_3(%arg0: i32) -> (i32, i32, i32) {
    %c0_i32 = arith.constant 0 : i32
    %c0_i32_0 = arith.constant 0 : i32
    %c0_i32_1 = arith.constant 0 : i32
    return %arg0, %c0_i32, %c0_i32_0 : i32, i32, i32
  }
  func.func @transform_4(%arg0: i32) -> (i32, i32, i32) {
    %c0_i32 = arith.constant 0 : i32
    %c0_i32_0 = arith.constant 0 : i32
    %c0_i32_1 = arith.constant 0 : i32
    return %arg0, %c0_i32, %c0_i32_0 : i32, i32, i32
  }
}

module attributes {stable_mosaic.version = 11 : i64} {
  func.func @_fused_tail_kernel(%arg0: i32, %arg1: memref<512x128xbf16, #tpu.memory_space<vmem>>, %arg2: memref<512x128xf32, #tpu.memory_space<vmem>>, %arg3: memref<128x128xbf16, #tpu.memory_space<vmem>>, %arg4: memref<1x128xf32, #tpu.memory_space<vmem>>, %arg5: memref<1x128xf32, #tpu.memory_space<vmem>>, %arg6: memref<1x128xf32, #tpu.memory_space<vmem>>, %arg7: memref<1x128xf32, #tpu.memory_space<vmem>>, %arg8: memref<512x128xf32, #tpu.memory_space<vmem>>) attributes {dimension_semantics = [#tpu.dimension_semantics<parallel>], iteration_bounds = array<i64: 1>, scalar_prefetch = 0 : i64, scratch_operands = 0 : i64, tpu.core_type = #tpu.core_type<tc>, window_params = [{transform_indices = @transform_0, window_bounds = array<i64: 512, 128>}, {transform_indices = @transform_1, window_bounds = array<i64: 512, 128>}, {pipeline_mode = #tpu.pipeline_mode<synchronous>, transform_indices = @transform_2, window_bounds = array<i64: 128, 128>}, {pipeline_mode = #tpu.pipeline_mode<synchronous>, transform_indices = @transform_3, window_bounds = array<i64: 1, 128>}, {pipeline_mode = #tpu.pipeline_mode<synchronous>, transform_indices = @transform_4, window_bounds = array<i64: 1, 128>}, {pipeline_mode = #tpu.pipeline_mode<synchronous>, transform_indices = @transform_5, window_bounds = array<i64: 1, 128>}, {pipeline_mode = #tpu.pipeline_mode<synchronous>, transform_indices = @transform_6, window_bounds = array<i64: 1, 128>}, {transform_indices = @transform_7, window_bounds = array<i64: 512, 128>}]} {
    %c0 = arith.constant 0 : index
    %c0_0 = arith.constant 0 : index
    %0 = vector.load %arg1[%c0, %c0_0] : memref<512x128xbf16, #tpu.memory_space<vmem>>, vector<512x128xbf16>
    %1 = arith.extf %0 : vector<512x128xbf16> to vector<512x128xf32>
    %c0_1 = arith.constant 0 : index
    %c0_2 = arith.constant 0 : index
    %2 = vector.load %arg4[%c0_1, %c0_2] : memref<1x128xf32, #tpu.memory_space<vmem>>, vector<1x128xf32>
    %3 = vector.broadcast %2 : vector<1x128xf32> to vector<512x128xf32>
    %4 = arith.mulf %1, %3 : vector<512x128xf32>
    %c0_3 = arith.constant 0 : index
    %c0_4 = arith.constant 0 : index
    %5 = vector.load %arg5[%c0_3, %c0_4] : memref<1x128xf32, #tpu.memory_space<vmem>>, vector<1x128xf32>
    %6 = vector.broadcast %5 : vector<1x128xf32> to vector<512x128xf32>
    %7 = arith.addf %4, %6 : vector<512x128xf32>
    %cst = arith.constant 0.000000e+00 : f32
    %8 = vector.broadcast %cst : f32 to vector<512x128xf32>
    %9 = arith.maximumf %7, %8 : vector<512x128xf32>
    %10 = arith.truncf %9 : vector<512x128xf32> to vector<512x128xbf16>
    %c0_5 = arith.constant 0 : index
    %c0_6 = arith.constant 0 : index
    %11 = vector.load %arg3[%c0_5, %c0_6] : memref<128x128xbf16, #tpu.memory_space<vmem>>, vector<128x128xbf16>
    %cst_7 = arith.constant dense<0.000000e+00> : vector<512x128xf32>
    %12 = tpu.matmul %10, %11, %cst_7 {dimension_numbers = #tpu.dot_dimension_numbers<[1], [0], [0], [1], [0, 0, 1, 1], [], []>} : vector<512x128xbf16>, vector<128x128xbf16>, vector<512x128xf32> -> vector<512x128xf32>
    %c0_8 = arith.constant 0 : index
    %c0_9 = arith.constant 0 : index
    %13 = vector.load %arg6[%c0_8, %c0_9] : memref<1x128xf32, #tpu.memory_space<vmem>>, vector<1x128xf32>
    %14 = vector.broadcast %13 : vector<1x128xf32> to vector<512x128xf32>
    %15 = arith.mulf %12, %14 : vector<512x128xf32>
    %c0_10 = arith.constant 0 : index
    %c0_11 = arith.constant 0 : index
    %16 = vector.load %arg7[%c0_10, %c0_11] : memref<1x128xf32, #tpu.memory_space<vmem>>, vector<1x128xf32>
    %17 = vector.broadcast %16 : vector<1x128xf32> to vector<512x128xf32>
    %18 = arith.addf %15, %17 : vector<512x128xf32>
    %c0_12 = arith.constant 0 : index
    %c0_13 = arith.constant 0 : index
    %19 = vector.load %arg2[%c0_12, %c0_13] : memref<512x128xf32, #tpu.memory_space<vmem>>, vector<512x128xf32>
    %20 = arith.addf %18, %19 : vector<512x128xf32>
    %cst_14 = arith.constant 0.000000e+00 : f32
    %21 = vector.broadcast %cst_14 : f32 to vector<512x128xf32>
    %22 = arith.maximumf %20, %21 : vector<512x128xf32>
    %c0_15 = arith.constant 0 : index
    %c0_16 = arith.constant 0 : index
    %23 = vector.load %arg8[%c0_15, %c0_16] : memref<512x128xf32, #tpu.memory_space<vmem>>, vector<512x128xf32>
    tpu.vector_store %arg8[%c0_15, %c0_16], %22 {strides = array<i32>} : memref<512x128xf32, #tpu.memory_space<vmem>>, vector<512x128xf32>,
    return
  }
  func.func @transform_0(%arg0: i32) -> (i32, i32) {
    %c0_i32 = arith.constant 0 : i32
    %c0_i32_0 = arith.constant 0 : i32
    return %arg0, %c0_i32 : i32, i32
  }
  func.func @transform_1(%arg0: i32) -> (i32, i32) {
    %c0_i32 = arith.constant 0 : i32
    %c0_i32_0 = arith.constant 0 : i32
    return %arg0, %c0_i32 : i32, i32
  }
  func.func @transform_2(%arg0: i32) -> (i32, i32) {
    %c0_i32 = arith.constant 0 : i32
    %c0_i32_0 = arith.constant 0 : i32
    %c0_i32_1 = arith.constant 0 : i32
    return %c0_i32, %c0_i32_0 : i32, i32
  }
  func.func @transform_3(%arg0: i32) -> (i32, i32) {
    %c0_i32 = arith.constant 0 : i32
    %c0_i32_0 = arith.constant 0 : i32
    %c0_i32_1 = arith.constant 0 : i32
    return %c0_i32, %c0_i32_0 : i32, i32
  }
  func.func @transform_4(%arg0: i32) -> (i32, i32) {
    %c0_i32 = arith.constant 0 : i32
    %c0_i32_0 = arith.constant 0 : i32
    %c0_i32_1 = arith.constant 0 : i32
    return %c0_i32, %c0_i32_0 : i32, i32
  }
  func.func @transform_5(%arg0: i32) -> (i32, i32) {
    %c0_i32 = arith.constant 0 : i32
    %c0_i32_0 = arith.constant 0 : i32
    %c0_i32_1 = arith.constant 0 : i32
    return %c0_i32, %c0_i32_0 : i32, i32
  }
  func.func @transform_6(%arg0: i32) -> (i32, i32) {
    %c0_i32 = arith.constant 0 : i32
    %c0_i32_0 = arith.constant 0 : i32
    %c0_i32_1 = arith.constant 0 : i32
    return %c0_i32, %c0_i32_0 : i32, i32
  }
  func.func @transform_7(%arg0: i32) -> (i32, i32) {
    %c0_i32 = arith.constant 0 : i32
    %c0_i32_0 = arith.constant 0 : i32
    return %arg0, %c0_i32 : i32, i32
  }
}

</mosaic_0001>

<bundles_post_ra>
// kernel: bottleneck_forward.6
= control target key start
LH: loop header
LB: loop body
LE: loop exit
PB: predicated region body
PF: predicated region fallthrough
CT: control target
= control target key end

     0   :  { %s1578_s0 = inlined_call_operand.vmem [shape: bf16[512,128], index: 0, kind: input, shape index: {}]   ;;  %s1579_s1 = inlined_call_operand.vmem [shape: f32[1,128], index: 1, kind: input, shape index: {}]   ;;  %s1580_s2 = inlined_call_operand.vmem [shape: f32[1,128], index: 2, kind: input, shape index: {}]   ;;  %s1581_s3 = inlined_call_operand.vmem [shape: f32[1,8,128], index: 3, kind: output, shape index: {0}]   ;;  %s1582_s4 = inlined_call_operand.vmem [shape: f32[1,128,128], index: 4, kind: output, shape index: {1}]  }
   0x1   :  { %v952_v0 = vld [vmem:[%s1578_s0 + $0xc0] sm:$0xff]   ;;  %v953_v5 = vld [vmem:[%s1578_s0 + $0xc8] sm:$0xff]   ;;  %v954_v28 = vld [vmem:[%s1578_s0 + $0xd0] sm:$0xff]  }
   0x2   :  { %v1119_v1 = vld [vmem:[%s1579_s1] ss:$0 sm:$0xff]  ;;  %v899_v2 = vunpack.c.l.bf16 %v952_v0  ;;  %v900_v3 = vunpack.c.h.bf16 %v952_v0  ;;  %v937_v6 = vld [vmem:[%s1578_s0 + $0x48] sm:$0xff]   ;;  %v903_v10 = vunpack.c.l.bf16 %v953_v5  ;;  %v904_v11 = vunpack.c.h.bf16 %v953_v5  ;;  %v938_v33 = vld [vmem:[%s1578_s0 + $0x50] sm:$0xff]  }
   0x3   :  { %v936_v4 = vld [vmem:[%s1578_s0 + $0x40] sm:$0xff]   ;;  %v839_v14 = vunpack.c.l.bf16 %v937_v6  ;;  %v840_v15 = vunpack.c.h.bf16 %v937_v6  ;;  %v907_v41 = vunpack.c.l.bf16 %v954_v28  ;;  %v908_v43 = vunpack.c.h.bf16 %v954_v28  ;;  %v955_v47 = vld [vmem:[%s1578_s0 + $0xd8] sm:$0xff]  }
   0x4   :  { %v1133_v7 = vld [vmem:[%s1580_s2] ss:$0 sm:$0xff]  ;;  %v835_v8 = vunpack.c.l.bf16 %v936_v4  ;;  %v836_v9 = vunpack.c.h.bf16 %v936_v4  ;;  %v200_v12 = vmul.f32 %v899_v2, %v1119_v1  ;;  %v201_v13 = vmul.f32 %v900_v3, %v1119_v1  ;;  %v939_v49 = vld [vmem:[%s1578_s0 + $0x58] sm:$0xff]  }
   0x5   :  { %v202_v18 = vmul.f32 %v903_v10, %v1119_v1  ;;  %v203_v19 = vmul.f32 %v904_v11, %v1119_v1  ;;  %v170_v22 = vmul.f32 %v839_v14, %v1119_v1  ;;  %v171_v23 = vmul.f32 %v840_v15, %v1119_v1  ;;  %v956_v56 = vld [vmem:[%s1578_s0 + $0xe0] sm:$0xff]  }
   0x6   :  { %v168_v16 = vmul.f32 %v835_v8, %v1119_v1  ;;  %v169_v17 = vmul.f32 %v836_v9, %v1119_v1  ;;  %v271_v20 = vadd.f32 %v1133_v7, %v200_v12  ;;  %v272_v21 = vadd.f32 %v1133_v7, %v201_v13 }
   0x7   :  { %v273_v26 = vadd.f32 %v1133_v7, %v202_v18  ;;  %v274_v27 = vadd.f32 %v1133_v7, %v203_v19  ;;  %v241_v31 = vadd.f32 %v1133_v7, %v170_v22  ;;  %v242_v32 = vadd.f32 %v1133_v7, %v171_v23  ;;  %v940_v19 = vld [vmem:[%s1578_s0 + $0x60] sm:$0xff]  }
   0x8   :  { %v239_v24 = vadd.f32 %v1133_v7, %v168_v16  ;;  %v240_v25 = vadd.f32 %v1133_v7, %v169_v17  ;;  %v335_v29 = vmax.f32 %v271_v20, 0.0  ;;  %v336_v30 = vmax.f32 %v272_v21, 0.0  ;;  %v957_v20 = vld [vmem:[%s1578_s0 + $0xe8] sm:$0xff]  }
   0x9   :  { %v337_v36 = vmax.f32 %v273_v26, 0.0  ;;  %v338_v37 = vmax.f32 %v274_v27, 0.0  ;;  %v305_v39 = vmax.f32 %v241_v31, 0.0  ;;  %v306_v40 = vmax.f32 %v242_v32, 0.0  ;;  %v941_v31 = vld [vmem:[%s1578_s0 + $0x68] sm:$0xff]   ;;  %v958_v32 = vld [vmem:[%s1578_s0 + $0xf0] sm:$0xff]  }
   0xa   :  { %v303_v34 = vmax.f32 %v239_v24, 0.0  ;;  %v304_v35 = vmax.f32 %v240_v25, 0.0  ;;  %v1157_v38 = vpack.c.bf16 %v336_v30, %v335_v29  ;;  %v843_v44 = vunpack.c.l.bf16 %v938_v33 }
   0xb   :  { %v1162_v45 = vpack.c.bf16 %v338_v37, %v337_v36  ;;  %v204_v46 = vmul.f32 %v907_v41, %v1119_v1  ;;  %v1170_v48 = vpack.c.bf16 %v306_v40, %v305_v39  ;;  %v205_v50 = vmul.f32 %v908_v43, %v1119_v1 }
   0xc   :  { %v1159_v42 = vpack.c.bf16 %v304_v35, %v303_v34  ;;  %564 = vxpose.xlu1.c.b16.start [1/8] %v1157_v38, 128  ;;  %1024 = vmatprep.subr.bf16.mxu1 %v1157_v38  ;;  %v844_v52 = vunpack.c.h.bf16 %v938_v33  ;;  %v172_v53 = vmul.f32 %v843_v44, %v1119_v1  ;;  %v911_v54 = vunpack.c.l.bf16 %v955_v47 }
   0xd   :  { %v275_v51 = vadd.f32 %v1133_v7, %v204_v46  ;;  %v912_v55 = vunpack.c.h.bf16 %v955_v47  ;;  %v276_v57 = vadd.f32 %v1133_v7, %v205_v50  ;;  %v847_v59 = vunpack.c.l.bf16 %v939_v49 }
   0xe   :  { %532 = vxpose.xlu0.c.b16.start [1/8] %v1159_v42, 128  ;;  %960 = vmatprep.subr.bf16.mxu0 %v1159_v42  ;;  %v848_v60 = vunpack.c.h.bf16 %v939_v49  ;;  %v173_v61 = vmul.f32 %v844_v52, %v1119_v1  ;;  %v243_v62 = vadd.f32 %v1133_v7, %v172_v53  ;;  %v206_v63 = vmul.f32 %v911_v54, %v1119_v1 }
   0xf   :  { %v339_v58 = vmax.f32 %v275_v51, 0.0  ;;  %v207_v0 = vmul.f32 %v912_v55, %v1119_v1  ;;  %v340_v2 = vmax.f32 %v276_v57, 0.0  ;;  %v174_v3 = vmul.f32 %v847_v59, %v1119_v1  ;;  %v942_v59 = vld [vmem:[%s1578_s0 + $0x70] sm:$0xff]  }
  0x10   :  { %565 = vxpose.xlu1.c.b16.cont [2/8] %v1162_v45, 128  ;;  %v175_v4 = vmul.f32 %v848_v60, %v1119_v1  ;;  %v915_v5 = vunpack.c.l.bf16 %v956_v56  ;;  %v244_v6 = vadd.f32 %v1133_v7, %v173_v61  ;;  %v307_v8 = vmax.f32 %v243_v62, 0.0 }
  0x11   :  { %v277_v9 = vadd.f32 %v1133_v7, %v206_v63  ;;  %v278_v10 = vadd.f32 %v1133_v7, %v207_v0  ;;  %v1194_v11 = vpack.c.bf16 %v340_v2, %v339_v58  ;;  %v245_v12 = vadd.f32 %v1133_v7, %v174_v3 }
  0x12   :  { %533 = vxpose.xlu0.c.b16.cont [2/8] %v1170_v48, 128  ;;  %v246_v13 = vadd.f32 %v1133_v7, %v175_v4  ;;  %v916_v14 = vunpack.c.h.bf16 %v956_v56  ;;  %v308_v15 = vmax.f32 %v244_v6, 0.0  ;;  %v208_v18 = vmul.f32 %v915_v5, %v1119_v1 }
  0x13   :  { %v341_v16 = vmax.f32 %v277_v9, 0.0  ;;  %v342_v17 = vmax.f32 %v278_v10, 0.0  ;;  %v309_v21 = vmax.f32 %v245_v12, 0.0  ;;  %v851_v27 = vunpack.c.l.bf16 %v940_v19 }
  0x14   :  { %566 = vxpose.xlu1.c.b16.cont [3/8] %v1194_v11, 128  ;;  %v310_v22 = vmax.f32 %v246_v13, 0.0  ;;  %v1206_v23 = vpack.c.bf16 %v308_v15, %v307_v8  ;;  %v209_v25 = vmul.f32 %v916_v14, %v1119_v1  ;;  %v279_v26 = vadd.f32 %v1133_v7, %v208_v18  ;;  %v959_v8 = vld [vmem:[%s1578_s0 + $0xf8] sm:$0xff]  }
  0x15   :  { %v1208_v24 = vpack.c.bf16 %v342_v17, %v341_v16  ;;  %v852_v28 = vunpack.c.h.bf16 %v940_v19  ;;  %v919_v29 = vunpack.c.l.bf16 %v957_v20  ;;  %v176_v35 = vmul.f32 %v851_v27, %v1119_v1  ;;  %v943_v16 = vld [vmem:[%s1578_s0 + $0x78] sm:$0xff]   ;;  %v944_v19 = vld [vmem:[%s1578_s0 + $0x80] sm:$0xff]  }
  0x16   :  { %534 = vxpose.xlu0.c.b16.cont [3/8] %v1206_v23, 128  ;;  %v1213_v30 = vpack.c.bf16 %v310_v22, %v309_v21  ;;  %v280_v33 = vadd.f32 %v1133_v7, %v209_v25  ;;  %v343_v34 = vmax.f32 %v279_v26, 0.0  ;;  %v920_v37 = vunpack.c.h.bf16 %v957_v20 }
  0x17   :  { %v177_v36 = vmul.f32 %v852_v28, %v1119_v1  ;;  %v210_v39 = vmul.f32 %v919_v29, %v1119_v1  ;;  %v855_v41 = vunpack.c.l.bf16 %v941_v31  ;;  %v856_v43 = vunpack.c.h.bf16 %v941_v31 }
  0x18   :  { %567 = vxpose.xlu1.c.b16.cont [4/8] %v1208_v24, 128  ;;  %v344_v40 = vmax.f32 %v280_v33, 0.0  ;;  %v923_v44 = vunpack.c.l.bf16 %v958_v32  ;;  %v247_v46 = vadd.f32 %v1133_v7, %v176_v35  ;;  %v211_v49 = vmul.f32 %v920_v37, %v1119_v1  ;;  %v802_v37 = vld [vmem:[%s1578_s0] sm:$0xff]  }
  0x19   :  { %v248_v47 = vadd.f32 %v1133_v7, %v177_v36  ;;  %v281_v50 = vadd.f32 %v1133_v7, %v210_v39  ;;  %v178_v52 = vmul.f32 %v855_v41, %v1119_v1  ;;  %v179_v53 = vmul.f32 %v856_v43, %v1119_v1 }
  0x1a   :  { %535 = vxpose.xlu0.c.b16.cont [4/8] %v1213_v30, 128  ;;  %v1231_v51 = vpack.c.bf16 %v344_v40, %v343_v34  ;;  %v924_v54 = vunpack.c.h.bf16 %v958_v32  ;;  %v311_v55 = vmax.f32 %v247_v46, 0.0  ;;  %v282_v57 = vadd.f32 %v1133_v7, %v211_v49 }
  0x1b   :  { %v312_v56 = vmax.f32 %v248_v47, 0.0  ;;  %v345_v58 = vmax.f32 %v281_v50, 0.0  ;;  %v249_v60 = vadd.f32 %v1133_v7, %v178_v52  ;;  %v250_v61 = vadd.f32 %v1133_v7, %v179_v53  ;;  %v945_v53 = vld [vmem:[%s1578_s0 + $0x88] sm:$0xff]  }
  0x1c   :  { %568 = vxpose.xlu1.c.b16.cont [5/8] %v1231_v51, 128  ;;  %v346_v63 = vmax.f32 %v282_v57, 0.0  ;;  %v212_v0 = vmul.f32 %v923_v44, %v1119_v1  ;;  %v213_v2 = vmul.f32 %v924_v54, %v1119_v1  ;;  %v859_v5 = vunpack.c.l.bf16 %v942_v59 }
  0x1d   :  { %v1242_v62 = vpack.c.bf16 %v312_v56, %v311_v55  ;;  %v313_v3 = vmax.f32 %v249_v60, 0.0  ;;  %v314_v4 = vmax.f32 %v250_v61, 0.0  ;;  %v860_v6 = vunpack.c.h.bf16 %v942_v59 }
  0x1e   :  { %v1250_v9 = vpack.c.bf16 %v346_v63, %v345_v58  ;;  %v283_v10 = vadd.f32 %v1133_v7, %v212_v0  ;;  %v284_v13 = vadd.f32 %v1133_v7, %v213_v2  ;;  %v180_v14 = vmul.f32 %v859_v5, %v1119_v1 }
  0x1f   :  { %536 = vxpose.xlu0.c.b16.cont [5/8] %v1242_v62, 128  ;;  %v1253_v12 = vpack.c.bf16 %v314_v4, %v313_v3  ;;  %v181_v15 = vmul.f32 %v860_v6, %v1119_v1  ;;  %v927_v18 = vunpack.c.l.bf16 %v959_v8  ;;  %v928_v25 = vunpack.c.h.bf16 %v959_v8  ;;  %v929_v6 = vld [vmem:[%s1578_s0 + $0x8] sm:$0xff]  }
  0x20   :  { %569 = vxpose.xlu1.c.b16.cont [6/8] %v1250_v9, 128  ;;  %v347_v17 = vmax.f32 %v283_v10, 0.0  ;;  %v348_v20 = vmax.f32 %v284_v13, 0.0  ;;  %v251_v21 = vadd.f32 %v1133_v7, %v180_v14  ;;  %v863_v27 = vunpack.c.l.bf16 %v943_v16 }
  0x21   :  { %v252_v22 = vadd.f32 %v1133_v7, %v181_v15  ;;  %v214_v26 = vmul.f32 %v927_v18, %v1119_v1  ;;  %v864_v31 = vunpack.c.h.bf16 %v943_v16  ;;  %v867_v32 = vunpack.c.l.bf16 %v944_v19  ;;  %v946_v15 = vld [vmem:[%s1578_s0 + $0x90] sm:$0xff]  }
  0x22   :  { %v1269_v28 = vpack.c.bf16 %v348_v20, %v347_v17  ;;  %v315_v29 = vmax.f32 %v251_v21, 0.0  ;;  %v215_v34 = vmul.f32 %v928_v25, %v1119_v1  ;;  %v182_v36 = vmul.f32 %v863_v27, %v1119_v1  ;;  %v930_v20 = vld [vmem:[%s1578_s0 + $0x10] sm:$0xff]  }
  0x23   :  { %537 = vxpose.xlu0.c.b16.cont [6/8] %v1253_v12, 128  ;;  %v316_v33 = vmax.f32 %v252_v22, 0.0  ;;  %v285_v35 = vadd.f32 %v1133_v7, %v214_v26  ;;  %v183_v39 = vmul.f32 %v864_v31, %v1119_v1  ;;  %v868_v40 = vunpack.c.h.bf16 %v944_v19 }
  0x24   :  { %570 = vxpose.xlu1.c.b16.cont [7/8] %v1269_v28, 128  ;;  %v286_v43 = vadd.f32 %v1133_v7, %v215_v34  ;;  %v253_v46 = vadd.f32 %v1133_v7, %v182_v36  ;;  %v184_v49 = vmul.f32 %v867_v32, %v1119_v1  ;;  %v803_v52 = vunpack.c.l.bf16 %v802_v37 }
  0x25   :  { %v1279_v41 = vpack.c.bf16 %v316_v33, %v315_v29  ;;  %v349_v44 = vmax.f32 %v285_v35, 0.0  ;;  %v254_v47 = vadd.f32 %v1133_v7, %v183_v39  ;;  %v185_v50 = vmul.f32 %v868_v40, %v1119_v1 }
  0x26   :  { %v350_v54 = vmax.f32 %v286_v43, 0.0  ;;  %v317_v55 = vmax.f32 %v253_v46, 0.0  ;;  %v255_v57 = vadd.f32 %v1133_v7, %v184_v49  ;;  %v804_v59 = vunpack.c.h.bf16 %v802_v37 }
  0x27   :  { %538 = vxpose.xlu0.c.b16.cont [7/8] %v1279_v41, 128  ;;  %v318_v56 = vmax.f32 %v254_v47, 0.0  ;;  %v256_v58 = vadd.f32 %v1133_v7, %v185_v50  ;;  %v152_v61 = vmul.f32 %v803_v52, %v1119_v1  ;;  %v871_v63 = vunpack.c.l.bf16 %v945_v53 }
  0x28   :  { %v1292_v60 = vpack.c.bf16 %v350_v54, %v349_v44  ;;  %v872_v0 = vunpack.c.h.bf16 %v945_v53  ;;  %v319_v3 = vmax.f32 %v255_v57, 0.0  ;;  %v153_v5 = vmul.f32 %v804_v59, %v1119_v1  ;;  %v947_v53 = vld [vmem:[%s1578_s0 + $0x98] sm:$0xff]  }
  0x29   :  { %v1295_v2 = vpack.c.bf16 %v318_v56, %v317_v55  ;;  %v320_v4 = vmax.f32 %v256_v58, 0.0  ;;  %v223_v8 = vadd.f32 %v1133_v7, %v152_v61  ;;  %v186_v10 = vmul.f32 %v871_v63, %v1119_v1  ;;  %v931_v57 = vld [vmem:[%s1578_s0 + $0x18] sm:$0xff]  }
  0x2a   :  { %571 = vxpose.xlu1.c.b16.end [8/8] %v1292_v60, 128  ;;  %v224_v14 = vadd.f32 %v1133_v7, %v153_v5  ;;  %v187_v17 = vmul.f32 %v872_v0, %v1119_v1  ;;  %v807_v19 = vunpack.c.l.bf16 %v929_v6  ;;  %v808_v22 = vunpack.c.h.bf16 %v929_v6 }
  0x2b   :  { %539 = vxpose.xlu0.c.b16.end [8/8] %v1295_v2, 128  ;;  %v1305_v13 = vpack.c.bf16 %v320_v4, %v319_v3  ;;  %v287_v16 = vmax.f32 %v223_v8, 0.0  ;;  %v257_v18 = vadd.f32 %v1133_v7, %v186_v10  ;;  %v875_v29 = vunpack.c.l.bf16 %v946_v15 }
  0x2c   :  { %v288_v21 = vmax.f32 %v224_v14, 0.0  ;;  %v258_v25 = vadd.f32 %v1133_v7, %v187_v17  ;;  %v154_v27 = vmul.f32 %v807_v19, %v1119_v1  ;;  %v155_v32 = vmul.f32 %v808_v22, %v1119_v1  ;;  %v948_v22 = vld [vmem:[%s1578_s0 + $0xa0] sm:$0xff]  }
  0x2d   :  { %1025 = vmatpush3.bf16.msra.mxu1 %v1305_v13  ;;  %v321_v26 = vmax.f32 %v257_v18, 0.0  ;;  %v876_v33 = vunpack.c.h.bf16 %v946_v15  ;;  %v811_v34 = vunpack.c.l.bf16 %v930_v20  ;;  %v188_v37 = vmul.f32 %v875_v29, %v1119_v1 }
  0x2e   :  { %548 = vxpose.xlu1.c.b16.start [1/8] %v1305_v13, 128  ;;  %1026 = vmatprep.subr.bf16.mxu1 %v1162_v45  ;;  %v351_v31 = vpack.c.bf16 %v288_v21, %v287_v16  ;;  %v322_v35 = vmax.f32 %v258_v25, 0.0  ;;  %v225_v36 = vadd.f32 %v1133_v7, %v154_v27  ;;  %v812_v39 = vunpack.c.h.bf16 %v930_v20 }
  0x2f   :  { %v226_v44 = vadd.f32 %v1133_v7, %v155_v32  ;;  %v189_v46 = vmul.f32 %v876_v33, %v1119_v1  ;;  %v259_v50 = vadd.f32 %v1133_v7, %v188_v37  ;;  %v156_v52 = vmul.f32 %v811_v34, %v1119_v1  ;;  %v932_v33 = vld [vmem:[%s1578_s0 + $0x20] sm:$0xff]  }
  0x30   :  { %516 = vxpose.xlu0.c.b16.start [1/8] %v351_v31, 128  ;;  %v383_v40 = vunpack.c.l.bf16 %v351_v31  ;;  %v384_v43 = vunpack.c.h.bf16 %v351_v31  ;;  %961 = vmatpush3.bf16.msra.mxu0 %v351_v31  ;;  %v1326_v47 = vpack.c.bf16 %v322_v35, %v321_v26  ;;  %v289_v49 = vmax.f32 %v225_v36, 0.0 }
  0x31   :  { %962 = vmatprep.subr.bf16.mxu0 %v1170_v48  ;;  %v290_v54 = vmax.f32 %v226_v44, 0.0  ;;  %v260_v55 = vadd.f32 %v1133_v7, %v189_v46  ;;  %v157_v56 = vmul.f32 %v812_v39, %v1119_v1  ;;  %v323_v59 = vmax.f32 %v259_v50, 0.0  ;;  %v949_v39 = vld [vmem:[%s1578_s0 + $0xa8] sm:$0xff]  }
  0x32   :  { %v447_v58 = vadd.f32 %v384_v43, %v383_v40  ;;  %549 = vxpose.xlu1.c.b16.cont [2/8] %v1326_v47, 128  ;;  %v227_v61 = vadd.f32 %v1133_v7, %v156_v52  ;;  %1027 = vmatpush3.bf16.msra.mxu1 %v1326_v47  ;;  %v879_v4 = vunpack.c.l.bf16 %v947_v53  ;;  %v880_v6 = vunpack.c.h.bf16 %v947_v53 }
  0x33   :  { %v352_v63 = vpack.c.bf16 %v290_v54, %v289_v49  ;;  %v324_v0 = vmax.f32 %v260_v55, 0.0  ;;  %v228_v3 = vadd.f32 %v1133_v7, %v157_v56  ;;  %1028 = vmatprep.subr.bf16.mxu1 %v1194_v11  ;;  %v815_v8 = vunpack.c.l.bf16 %v931_v57 }
  0x34   :  { %v291_v5 = vmax.f32 %v227_v61, 0.0  ;;  %v816_v10 = vunpack.c.h.bf16 %v931_v57  ;;  %v190_v18 = vmul.f32 %v879_v4, %v1119_v1  ;;  %v191_v19 = vmul.f32 %v880_v6, %v1119_v1 }
  0x35   :  { %v385_v14 = vunpack.c.l.bf16 %v352_v63  ;;  %v386_v15 = vunpack.c.h.bf16 %v352_v63  ;;  %517 = vxpose.xlu0.c.b16.cont [2/8] %v352_v63, 128  ;;  %v1344_v16 = vpack.c.bf16 %v324_v0, %v323_v59  ;;  %v292_v17 = vmax.f32 %v228_v3, 0.0  ;;  %963 = vmatpush3.bf16.msra.mxu0 %v352_v63  ;;  %v933_v0 = vld [vmem:[%s1578_s0 + $0x28] sm:$0xff]  }
  0x36   :  { %v158_v20 = vmul.f32 %v815_v8, %v1119_v1  ;;  %v159_v21 = vmul.f32 %v816_v10, %v1119_v1  ;;  %964 = vmatprep.subr.bf16.mxu0 %v1206_v23  ;;  %v261_v27 = vadd.f32 %v1133_v7, %v190_v18  ;;  %v262_v29 = vadd.f32 %v1133_v7, %v191_v19  ;;  %v950_v19 = vld [vmem:[%s1578_s0 + $0xb0] sm:$0xff]  }
  0x37   :  { %v448_v25 = vadd.f32 %v447_v58, %v385_v14  ;;  %550 = vxpose.xlu1.c.b16.cont [3/8] %v1344_v16, 128  ;;  %v353_v26 = vpack.c.bf16 %v292_v17, %v291_v5  ;;  %1029 = vmatpush3.bf16.msra.mxu1 %v1344_v16  ;;  %v883_v37 = vunpack.c.l.bf16 %v948_v22  ;;  %v884_v50 = vunpack.c.h.bf16 %v948_v22 }
  0x38   :  { %v229_v31 = vadd.f32 %v1133_v7, %v158_v20  ;;  %v230_v32 = vadd.f32 %v1133_v7, %v159_v21  ;;  %1030 = vmatprep.subr.bf16.mxu1 %v1208_v24  ;;  %v325_v40 = vmax.f32 %v261_v27, 0.0  ;;  %v326_v43 = vmax.f32 %v262_v29, 0.0 }
  0x39   :  { %v449_v34 = vadd.f32 %v448_v25, %v386_v15  ;;  %v387_v35 = vunpack.c.l.bf16 %v353_v26  ;;  %v388_v36 = vunpack.c.h.bf16 %v353_v26  ;;  %518 = vxpose.xlu0.c.b16.cont [3/8] %v353_v26, 128  ;;  %965 = vmatpush3.bf16.msra.mxu0 %v353_v26  ;;  %v192_v52 = vmul.f32 %v883_v37, %v1119_v1 }
  0x3a   :  { %v293_v44 = vmax.f32 %v229_v31, 0.0  ;;  %v294_v46 = vmax.f32 %v230_v32, 0.0  ;;  %966 = vmatprep.subr.bf16.mxu0 %v1213_v30  ;;  %v819_v53 = vunpack.c.l.bf16 %v932_v33  ;;  %v1369_v54 = vpack.c.bf16 %v326_v43, %v325_v40  ;;  %v934_v40 = vld [vmem:[%s1578_s0 + $0x30] sm:$0xff]  }
  0x3b   :  { %v450_v49 = vadd.f32 %v449_v34, %v387_v35  ;;  %v820_v56 = vunpack.c.h.bf16 %v932_v33  ;;  %v887_v57 = vunpack.c.l.bf16 %v949_v39  ;;  %v193_v59 = vmul.f32 %v884_v50, %v1119_v1 }
  0x3c   :  { %v354_v55 = vpack.c.bf16 %v294_v46, %v293_v44  ;;  %v263_v61 = vadd.f32 %v1133_v7, %v192_v52  ;;  %v160_v63 = vmul.f32 %v819_v53, %v1119_v1  ;;  %551 = vxpose.xlu1.c.b16.cont [4/8] %v1369_v54, 128  ;;  %1031 = vmatpush3.bf16.msra.mxu1 %v1369_v54  ;;  %v888_v15 = vunpack.c.h.bf16 %v949_v39 }
  0x3d   :  { %v451_v58 = vadd.f32 %v450_v49, %v388_v36  ;;  %v264_v5 = vadd.f32 %v1133_v7, %v193_v59  ;;  %v161_v8 = vmul.f32 %v820_v56, %v1119_v1  ;;  %v194_v17 = vmul.f32 %v887_v57, %v1119_v1  ;;  %1032 = vmatprep.subr.bf16.mxu1 %v1231_v51 }
  0x3e   :  { %v389_v3 = vunpack.c.l.bf16 %v354_v55  ;;  %v390_v4 = vunpack.c.h.bf16 %v354_v55  ;;  %519 = vxpose.xlu0.c.b16.cont [4/8] %v354_v55, 128  ;;  %v327_v6 = vmax.f32 %v263_v61, 0.0  ;;  %v231_v10 = vadd.f32 %v1133_v7, %v160_v63  ;;  %967 = vmatpush3.bf16.msra.mxu0 %v354_v55  ;;  %v951_v55 = vld [vmem:[%s1578_s0 + $0xb8] sm:$0xff]  }
  0x3f   :  { %v823_v18 = vunpack.c.l.bf16 %v933_v0  ;;  %968 = vmatprep.subr.bf16.mxu0 %v1242_v62  ;;  %v328_v20 = vmax.f32 %v264_v5, 0.0  ;;  %v232_v21 = vadd.f32 %v1133_v7, %v161_v8  ;;  %v824_v25 = vunpack.c.h.bf16 %v933_v0 }
  0x40   :  { %v452_v14 = vadd.f32 %v451_v58, %v389_v3  ;;  %v295_v22 = vmax.f32 %v231_v10, 0.0  ;;  %v195_v26 = vmul.f32 %v888_v15, %v1119_v1  ;;  %v265_v27 = vadd.f32 %v1133_v7, %v194_v17  ;;  %v935_v15 = vld [vmem:[%s1578_s0 + $0x38] sm:$0xff]  }
  0x41   :  { %v162_v29 = vmul.f32 %v823_v18, %v1119_v1  ;;  %v1392_v31 = vpack.c.bf16 %v328_v20, %v327_v6  ;;  %v296_v32 = vmax.f32 %v232_v21, 0.0  ;;  %v163_v33 = vmul.f32 %v824_v25, %v1119_v1 }
  0x42   :  { %v891_v34 = vunpack.c.l.bf16 %v950_v19  ;;  %v266_v35 = vadd.f32 %v1133_v7, %v195_v26  ;;  %v329_v36 = vmax.f32 %v265_v27, 0.0  ;;  %v892_v39 = vunpack.c.h.bf16 %v950_v19 }
  0x43   :  { %v233_v37 = vadd.f32 %v1133_v7, %v162_v29  ;;  %v453_v43 = vadd.f32 %v452_v14, %v390_v4  ;;  %552 = vxpose.xlu1.c.b16.cont [5/8] %v1392_v31, 128  ;;  %v355_v44 = vpack.c.bf16 %v296_v32, %v295_v22  ;;  %v234_v46 = vadd.f32 %v1133_v7, %v163_v33 }
  0x44   :  { %1033 = vmatpush3.bf16.msra.mxu1 %v1392_v31  ;;  %v330_v49 = vmax.f32 %v266_v35, 0.0  ;;  %v196_v52 = vmul.f32 %v891_v34, %v1119_v1  ;;  %v197_v53 = vmul.f32 %v892_v39, %v1119_v1  ;;  %v827_v59 = vunpack.c.l.bf16 %v934_v40 }
  0x45   :  { %v297_v50 = vmax.f32 %v233_v37, 0.0  ;;  %1034 = vmatprep.subr.bf16.mxu1 %v1250_v9  ;;  %v391_v56 = vunpack.c.l.bf16 %v355_v44  ;;  %v392_v57 = vunpack.c.h.bf16 %v355_v44  ;;  %520 = vxpose.xlu0.c.b16.cont [5/8] %v355_v44, 128  ;;  %v298_v58 = vmax.f32 %v234_v46, 0.0 }
  0x46   :  { %969 = vmatpush3.bf16.msra.mxu0 %v355_v44  ;;  %v1409_v61 = vpack.c.bf16 %v330_v49, %v329_v36  ;;  %v267_v63 = vadd.f32 %v1133_v7, %v196_v52  ;;  %v268_v0 = vadd.f32 %v1133_v7, %v197_v53  ;;  %v828_v3 = vunpack.c.h.bf16 %v934_v40 }
  0x47   :  { %970 = vmatprep.subr.bf16.mxu0 %v1253_v12  ;;  %v454_v4 = vadd.f32 %v453_v43, %v391_v56  ;;  %v356_v5 = vpack.c.bf16 %v298_v58, %v297_v50  ;;  %v164_v6 = vmul.f32 %v827_v59, %v1119_v1  ;;  %v895_v8 = vunpack.c.l.bf16 %v951_v55 }
  0x48   :  { %553 = vxpose.xlu1.c.b16.cont [6/8] %v1409_v61, 128  ;;  %v331_v10 = vmax.f32 %v267_v63, 0.0  ;;  %v332_v14 = vmax.f32 %v268_v0, 0.0  ;;  %1035 = vmatpush3.bf16.msra.mxu1 %v1409_v61  ;;  %v165_v20 = vmul.f32 %v828_v3, %v1119_v1  ;;  %v896_v25 = vunpack.c.h.bf16 %v951_v55 }
  0x49   :  { %v455_v17 = vadd.f32 %v454_v4, %v392_v57  ;;  %v393_v18 = vunpack.c.l.bf16 %v356_v5  ;;  %v394_v19 = vunpack.c.h.bf16 %v356_v5  ;;  %521 = vxpose.xlu0.c.b16.cont [6/8] %v356_v5, 128  ;;  %v235_v22 = vadd.f32 %v1133_v7, %v164_v6  ;;  %1036 = vmatprep.subr.bf16.mxu1 %v1269_v28 }
  0x4a   :  { %971 = vmatpush3.bf16.msra.mxu0 %v356_v5  ;;  %v1421_v21 = vpack.c.bf16 %v332_v14, %v331_v10  ;;  %v198_v26 = vmul.f32 %v895_v8, %v1119_v1  ;;  %v236_v29 = vadd.f32 %v1133_v7, %v165_v20  ;;  %v831_v32 = vunpack.c.l.bf16 %v935_v15 }
  0x4b   :  { %972 = vmatprep.subr.bf16.mxu0 %v1279_v41  ;;  %v456_v27 = vadd.f32 %v455_v17, %v393_v18  ;;  %v832_v33 = vunpack.c.h.bf16 %v935_v15  ;;  %v299_v34 = vmax.f32 %v235_v22, 0.0  ;;  %v199_v35 = vmul.f32 %v896_v25, %v1119_v1 }
  0x4c   :  { %554 = vxpose.xlu1.c.b16.cont [7/8] %v1421_v21, 128  ;;  %1037 = vmatpush3.bf16.msra.mxu1 %v1421_v21  ;;  %v300_v36 = vmax.f32 %v236_v29, 0.0  ;;  %v269_v37 = vadd.f32 %v1133_v7, %v198_v26  ;;  %v166_v39 = vmul.f32 %v831_v32, %v1119_v1  ;;  %v400_v6 = vunpack.c.h.bf16 %v1159_v42 }
  0x4d   :  { %1038 = vmatprep.subr.bf16.mxu1 %v1292_v60  ;;  %v270_v40 = vadd.f32 %v1133_v7, %v199_v35  ;;  %v167_v43 = vmul.f32 %v832_v33, %v1119_v1  ;;  %v457_v44 = vadd.f32 %v456_v27, %v394_v19  ;;  %v401_v10 = vunpack.c.l.bf16 %v1170_v48 }
  0x4e   :  { %v357_v46 = vpack.c.bf16 %v300_v36, %v299_v34  ;;  %v333_v49 = vmax.f32 %v269_v37, 0.0  ;;  %v237_v50 = vadd.f32 %v1133_v7, %v166_v39  ;;  %v402_v15 = vunpack.c.h.bf16 %v1170_v48 }
  0x4f   :  { %v334_v52 = vmax.f32 %v270_v40, 0.0  ;;  %v238_v53 = vadd.f32 %v1133_v7, %v167_v43  ;;  %v399_v7 = vunpack.c.l.bf16 %v1159_v42  ;;  %v403_v18 = vunpack.c.l.bf16 %v1206_v23 }
  0x50   :  { %v395_v55 = vunpack.c.l.bf16 %v357_v46  ;;  %v396_v56 = vunpack.c.h.bf16 %v357_v46  ;;  %522 = vxpose.xlu0.c.b16.cont [7/8] %v357_v46, 128  ;;  %v301_v57 = vmax.f32 %v237_v50, 0.0  ;;  %973 = vmatpush3.bf16.msra.mxu0 %v357_v46  ;;  %v404_v20 = vunpack.c.h.bf16 %v1206_v23 }
  0x51   :  { %v1438_v58 = vpack.c.bf16 %v334_v52, %v333_v49  ;;  %v302_v59 = vmax.f32 %v238_v53, 0.0  ;;  %974 = vmatprep.subr.bf16.mxu0 %v1295_v2  ;;  %v405_v25 = vunpack.c.l.bf16 %v1213_v30  ;;  %v406_v27 = vunpack.c.h.bf16 %v1213_v30 }
  0x52   :  { %v458_v63 = vadd.f32 %v457_v44, %v395_v55  ;;  %v407_v42 = vunpack.c.l.bf16 %v1242_v62  ;;  %v408_v33 = vunpack.c.h.bf16 %v1242_v62  ;;  %v409_v48 = vunpack.c.l.bf16 %v1253_v12 }
  0x53   :  { %555 = vxpose.xlu1.c.b16.end [8/8] %v1438_v58, 128  ;;  %v358_v1 = vpack.c.bf16 %v302_v59, %v301_v57  ;;  %1039 = vmatpush3.bf16.msra.mxu1 %v1438_v58  ;;  %v410_v36 = vunpack.c.h.bf16 %v1253_v12  ;;  %v411_v23 = vunpack.c.l.bf16 %v1279_v41  ;;  %v412_v30 = vunpack.c.h.bf16 %v1279_v41 }
  0x54   :  { %v459_v0 = vadd.f32 %v458_v63, %v396_v56  ;;  %v413_v46 = vunpack.c.l.bf16 %v1295_v2  ;;  %v414_v50 = vunpack.c.h.bf16 %v1295_v2  ;;  %v415_v12 = vunpack.c.l.bf16 %v1305_v13 }
  0x55   :  { %v397_v3 = vunpack.c.l.bf16 %v358_v1  ;;  %v398_v4 = vunpack.c.h.bf16 %v358_v1  ;;  %523 = vxpose.xlu0.c.b16.end [8/8] %v358_v1, 128  ;;  %975 = vmatpush3.bf16.msra.mxu0 %v358_v1  ;;  %v416_v56 = vunpack.c.h.bf16 %v1305_v13  ;;  %v417_v41 = vunpack.c.l.bf16 %v1326_v47 }
  0x56   :  { %v419_v2 = vunpack.c.l.bf16 %v1344_v16 }
  0x57   :  { %v460_v5 = vadd.f32 %v459_v0, %v397_v3  ;;  %v418_v0 = vunpack.c.h.bf16 %v1326_v47  ;;  %v423_v47 = vunpack.c.l.bf16 %v1392_v31 }
  0x59   :  { %v461_v8 = vadd.f32 %v460_v5, %v398_v4  ;;  %v420_v5 = vunpack.c.h.bf16 %v1344_v16  ;;  %v425_v16 = vunpack.c.l.bf16 %v1409_v61 }
  0x5b   :  { %v462_v14 = vadd.f32 %v461_v8, %v399_v7  ;;  %v421_v8 = vunpack.c.l.bf16 %v1369_v54 }
  0x5d   :  { %v463_v17 = vadd.f32 %v462_v14, %v400_v6  ;;  %v422_v14 = vunpack.c.h.bf16 %v1369_v54 }
  0x5f   :  { %v464_v19 = vadd.f32 %v463_v17, %v401_v10 }
  0x61   :  { %v465_v22 = vadd.f32 %v464_v19, %v402_v15 }
  0x63   :  { %v466_v26 = vadd.f32 %v465_v22, %v403_v18 }
  0x65   :  { %v467_v29 = vadd.f32 %v466_v26, %v404_v20  ;;  %v424_v20 = vunpack.c.h.bf16 %v1392_v31  ;;  %v429_v31 = vunpack.c.l.bf16 %v1438_v58 }
  0x67   :  { %v468_v32 = vadd.f32 %v467_v29, %v405_v25 }
  0x69   :  { %v469_v34 = vadd.f32 %v468_v32, %v406_v27  ;;  %v426_v27 = vunpack.c.h.bf16 %v1409_v61  ;;  %v431_v61 = vunpack.c.l.bf16 %v1157_v38 }
  0x6b   :  { %v470_v35 = vadd.f32 %v469_v34, %v407_v42  ;;  %v427_v42 = vunpack.c.l.bf16 %v1421_v21 }
  0x6d   :  { %v471_v37 = vadd.f32 %v470_v35, %v408_v33  ;;  %v428_v33 = vunpack.c.h.bf16 %v1421_v21 }
  0x6f   :  { %v472_v39 = vadd.f32 %v471_v37, %v409_v48  ;;  %v430_v37 = vunpack.c.h.bf16 %v1438_v58  ;;  %v435_v58 = vunpack.c.l.bf16 %v1194_v11 }
  0x71   :  { %v473_v44 = vadd.f32 %v472_v39, %v410_v36 }
  0x73   :  { %v474_v62 = vadd.f32 %v473_v44, %v411_v23  ;;  %v433_v44 = vunpack.c.l.bf16 %v1162_v45 }
  0x74   :  { %v572_v40 = vpop.trf.xlu1 }
  0x75   :  { %v540_v43 = vpop.trf.xlu0  ;;  %709 = vmatprep.mubr.bf16.mxu1 %v572_v40  ;;  %v475_v52 = vadd.f32 %v474_v62, %v412_v30  ;;  %v434_v62 = vunpack.c.h.bf16 %v1162_v45 }
  0x76   :  { %612 = vmatprep.mubr.bf16.mxu0 %v540_v43  ;;  %v432_v43 = vunpack.c.h.bf16 %v1157_v38 }
  0x77   :  { %v476_v55 = vadd.f32 %v475_v52, %v413_v46 }
  0x78   :  { %v573_v49 = vpop.trf.xlu1 }
  0x79   :  { %v541_v53 = vpop.trf.xlu0  ;;  %v477_v57 = vadd.f32 %v476_v55, %v414_v50 }
  0x7b   :  { %v478_v63 = vadd.f32 %v477_v57, %v415_v12  ;;  %v437_v57 = vunpack.c.l.bf16 %v1208_v24 }
  0x7c   :  { %v1461_v59 = vpop.trf.xlu1 }
  0x7d   :  { %v1464_v1 = vpop.trf.xlu0  ;;  %v479_v3 = vadd.f32 %v478_v63, %v416_v56  ;;  %v436_v56 = vunpack.c.h.bf16 %v1194_v11 }
  0x7f   :  { %v480_v4 = vadd.f32 %v479_v3, %v417_v41 }
  0x80   :  { %v1468_v7 = vpop.trf.xlu1 }
  0x81   :  { %v481_v6 = vadd.f32 %v480_v4, %v418_v0  ;;  %v1471_v13 = vpop.trf.xlu0  ;;  %v438_v0 = vunpack.c.h.bf16 %v1208_v24  ;;  %v442_v24 = vunpack.c.h.bf16 %v1250_v9 }
  0x83   :  { %v482_v10 = vadd.f32 %v481_v6, %v419_v2  ;;  %v439_v2 = vunpack.c.l.bf16 %v1231_v51 }
  0x84   :  { %v1475_v17 = vpop.trf.xlu1 }
  0x85   :  { %v483_v15 = vadd.f32 %v482_v10, %v420_v5  ;;  %v1478_v19 = vpop.trf.xlu0 }
  0x87   :  { %v484_v18 = vadd.f32 %v483_v15, %v421_v8 }
  0x88   :  { %v1482_v26 = vpop.trf.xlu1 }
  0x89   :  { %v485_v22 = vadd.f32 %v484_v18, %v422_v14  ;;  %v1485_v54 = vpop.trf.xlu0  ;;  %v443_v14 = vunpack.c.l.bf16 %v1269_v28 }
  0x8b   :  { %v486_v25 = vadd.f32 %v485_v22, %v423_v47 }
  0x8c   :  { %v1489_v48 = vpop.trf.xlu1 }
  0x8d   :  { %v487_v29 = vadd.f32 %v486_v25, %v424_v20  ;;  %v1492_v36 = vpop.trf.xlu0 }
  0x8f   :  { %v488_v32 = vadd.f32 %v487_v29, %v425_v16 }
  0x90   :  { %v1496_v40 = vpop.trf.xlu1 }
  0x91   :  { %v489_v34 = vadd.f32 %v488_v32, %v426_v27  ;;  %v1499_v21 = vpop.trf.xlu0 }
  0x93   :  { %v490_v35 = vadd.f32 %v489_v34, %v427_v42 }
  0x95   :  { %v491_v23 = vadd.f32 %v490_v35, %v428_v33 }
  0x97   :  { %v492_v39 = vadd.f32 %v491_v23, %v429_v31 }
  0x99   :  { %v493_v30 = vadd.f32 %v492_v39, %v430_v37 }
  0x9b   :  { %v494_v46 = vadd.f32 %v493_v30, %v431_v61 }
  0x9d   :  { %v495_v50 = vadd.f32 %v494_v46, %v432_v43  ;;  %v556_v52 = vpop.trf.xlu1 }
  0x9e   :  { %710 = vmatmul.mubr.bf16.vlgmr.msra.gmra.mrb[0].mxu1 %v556_v52 }
  0x9f   :  { %v496_v12 = vadd.f32 %v495_v50, %v433_v44  ;;  %v524_v55 = vpop.trf.xlu0  ;;  %717 = vmatprep.mubr.bf16.mxu1 %v573_v49  ;;  %v440_v49 = vunpack.c.h.bf16 %v1231_v51  ;;  %v444_v51 = vunpack.c.h.bf16 %v1269_v28 }
  0xa0   :  { %613 = vmatmul.mubr.bf16.vlgmr.msra.gmra.mrb[0].mxu0 %v524_v55 }
  0xa1   :  { %v497_v38 = vadd.f32 %v496_v12, %v434_v62  ;;  %620 = vmatprep.mubr.bf16.mxu0 %v541_v53  ;;  %v557_v63 = vpop.trf.xlu1  ;;  %v441_v53 = vunpack.c.l.bf16 %v1250_v9  ;;  %v446_v9 = vunpack.c.h.bf16 %v1292_v60 }
  0xa3   :  { %v498_v41 = vadd.f32 %v497_v38, %v435_v58  ;;  %v525_v3 = vpop.trf.xlu0 }
  0xa5   :  { %v499_v45 = vadd.f32 %v498_v41, %v436_v56  ;;  %v558_v6 = vpop.trf.xlu1 }
  0xa6   :  { %718 = vmatmul.mubr.bf16.gmra.mrb[4].mxu1 %v557_v63 }
  0xa7   :  { %v500_v4 = vadd.f32 %v499_v45, %v437_v57  ;;  %725 = vmatprep.mubr.bf16.mxu1 %v1461_v59  ;;  %v526_v10 = vpop.trf.xlu0 }
  0xa8   :  { %621 = vmatmul.mubr.bf16.gmra.mrb[4].mxu0 %v525_v3 }
  0xa9   :  { %v501_v11 = vadd.f32 %v500_v4, %v438_v0  ;;  %628 = vmatprep.mubr.bf16.mxu0 %v1464_v1  ;;  %v445_v1 = vunpack.c.l.bf16 %v1292_v60  ;;  %v559_v18 = vpop.trf.xlu1 }
  0xab   :  { %v502_v5 = vadd.f32 %v501_v11, %v439_v2  ;;  %v527_v22 = vpop.trf.xlu0 }
  0xad   :  { %v503_v8 = vadd.f32 %v502_v5, %v440_v49  ;;  %v560_v25 = vpop.trf.xlu1 }
  0xae   :  { %726 = vmatmul.mubr.bf16.gmra.mrb[8].mxu1 %v558_v6 }
  0xaf   :  { %v504_v15 = vadd.f32 %v503_v8, %v441_v53  ;;  %733 = vmatprep.mubr.bf16.mxu1 %v1468_v7 }
  0xb0   :  { %629 = vmatmul.mubr.bf16.gmra.mrb[8].mxu0 %v526_v10 }
  0xb1   :  { %v505_v59 = vadd.f32 %v504_v15, %v442_v24  ;;  %636 = vmatprep.mubr.bf16.mxu0 %v1471_v13  ;;  %v528_v13 = vpop.trf.xlu0  ;;  %v561_v32 = vpop.trf.xlu1 }
  0xb3   :  { %v506_v47 = vadd.f32 %v505_v59, %v443_v14 }
  0xb5   :  { %v507_v20 = vadd.f32 %v506_v47, %v444_v51 }
  0xb6   :  { %734 = vmatmul.mubr.bf16.gmra.mrb[12].mxu1 %v559_v18 }
  0xb7   :  { %v508_v16 = vadd.f32 %v507_v20, %v445_v1  ;;  %741 = vmatprep.mubr.bf16.mxu1 %v1475_v17  ;;  %v529_v17 = vpop.trf.xlu0 }
  0xb8   :  { %637 = vmatmul.mubr.bf16.gmra.mrb[12].mxu0 %v527_v22 }
  0xb9   :  { %v509_v7 = vadd.f32 %v508_v16, %v446_v9  ;;  %644 = vmatprep.mubr.bf16.mxu0 %v1478_v19  ;;  %v562_v19 = vpop.trf.xlu1 }
  0xbb   :  { %v510_v28 = vrot.slane %v509_v7, 4 }
  0xbd   :  { %v511_v27 = vadd.f32 %v510_v28, %v509_v7 }
  0xbe   :  { %742 = vmatmul.mubr.bf16.gmra.mrb[16].mxu1 %v560_v25 }
  0xbf   :  { %v512_v29 = vrot.slane %v511_v27, 2  ;;  %749 = vmatprep.mubr.bf16.mxu1 %v1482_v26  ;;  %v530_v26 = vpop.trf.xlu0 }
  0xc0   :  { %645 = vmatmul.mubr.bf16.gmra.mrb[16].mxu0 %v528_v13 }
  0xc1   :  { %v513_v60 = vadd.f32 %v512_v29, %v511_v27  ;;  %652 = vmatprep.mubr.bf16.mxu0 %v1485_v54  ;;  %v563_v54 = vpop.trf.xlu1 }
  0xc3   :  { %v514_v42 = vrot.slane %v513_v60, 1  ;;  %v531_v34 = vpop.trf.xlu0 }
  0xc5   :  { %v515_v33 = vadd.f32 %v514_v42, %v513_v60 }
  0xc6   :  { %750 = vmatmul.mubr.bf16.gmra.mrb[20].mxu1 %v561_v32 }
  0xc7   :  { %774 = vst [vmem:[%s1581_s3] sm:$0xff] %v515_v33  ;;  %757 = vmatprep.mubr.bf16.mxu1 %v1489_v48 }
  0xc8   :  { %653 = vmatmul.mubr.bf16.gmra.mrb[20].mxu0 %v529_v17 }
  0xc9   :  { %660 = vmatprep.mubr.bf16.mxu0 %v1492_v36 }
  0xce   :  { %758 = vmatmul.mubr.bf16.gmra.mrb[24].mxu1 %v562_v19 }
  0xcf   :  { %765 = vmatprep.mubr.bf16.mxu1 %v1496_v40 }
  0xd0   :  { %661 = vmatmul.mubr.bf16.gmra.mrb[24].mxu0 %v530_v26 }
  0xd1   :  { %668 = vmatprep.mubr.bf16.mxu0 %v1499_v21 }
  0xd6   :  { %766 = vmatmul.mubr.bf16.gmra.mrb[28].mxu1 %v563_v54 }
  0xd8   :  { %669 = vmatmul.mubr.bf16.gmra.mrb[28].mxu0 %v531_v34 }
 0x171   :  { %v1040_v31 = vpop.f32.mrb[0].mxu1 }
 0x172   :  { %v1041_v35 = vpop.f32.mrb[1].mxu1 }
 0x173   :  { %v976_v37 = vpop.f32.mrb[0].mxu0  ;;  %v1042_v23 = vadd.f32 %v1041_v35, %v1040_v31  ;;  %v1043_v48 = vpop.f32.mrb[2].mxu1 }
 0x174   :  { %v977_v61 = vpop.f32.mrb[1].mxu0  ;;  %v1044_v39 = vpop.f32.mrb[3].mxu1 }
 0x175   :  { %v978_v36 = vadd.f32 %v977_v61, %v976_v37  ;;  %v979_v43 = vpop.f32.mrb[2].mxu0  ;;  %v1045_v30 = vadd.f32 %v1044_v39, %v1043_v48 }
 0x176   :  { %v980_v44 = vpop.f32.mrb[3].mxu0 }
 0x177   :  { %v712_v46 = vadd.f32 %v1042_v23, %v978_v36  ;;  %v981_v40 = vadd.f32 %v980_v44, %v979_v43 }
 0x179   :  { %775 = vst [vmem:[%s1582_s4] sm:$0xff] %v712_v46  ;;  %v715_v21 = vadd.f32 %v1045_v30, %v981_v40  ;;  %v1046_v62 = vpop.f32.mrb[4].mxu1 }
 0x17a   :  { %v1047_v50 = vpop.f32.mrb[5].mxu1 }
 0x17b   :  { %776 = vst [vmem:[%s1582_s4 + $0x8] sm:$0xff] %v715_v21  ;;  %v982_v52 = vpop.f32.mrb[4].mxu0  ;;  %v1048_v58 = vadd.f32 %v1047_v50, %v1046_v62  ;;  %v1049_v12 = vpop.f32.mrb[6].mxu1 }
 0x17c   :  { %v983_v55 = vpop.f32.mrb[5].mxu0  ;;  %v1050_v56 = vpop.f32.mrb[7].mxu1 }
 0x17d   :  { %v984_v38 = vadd.f32 %v983_v55, %v982_v52  ;;  %v985_v57 = vpop.f32.mrb[6].mxu0  ;;  %v1051_v41 = vadd.f32 %v1050_v56, %v1049_v12 }
 0x17e   :  { %v986_v63 = vpop.f32.mrb[7].mxu0 }
 0x17f   :  { %v720_v0 = vadd.f32 %v1048_v58, %v984_v38  ;;  %v987_v45 = vadd.f32 %v986_v63, %v985_v57 }
 0x181   :  { %777 = vst [vmem:[%s1582_s4 + $0x10] sm:$0xff] %v720_v0  ;;  %v723_v3 = vadd.f32 %v1051_v41, %v987_v45  ;;  %v1052_v2 = vpop.f32.mrb[8].mxu1 }
 0x182   :  { %v1053_v4 = vpop.f32.mrb[9].mxu1 }
 0x183   :  { %778 = vst [vmem:[%s1582_s4 + $0x18] sm:$0xff] %v723_v3  ;;  %v988_v49 = vpop.f32.mrb[8].mxu0  ;;  %v1054_v11 = vadd.f32 %v1053_v4, %v1052_v2  ;;  %v1055_v53 = vpop.f32.mrb[10].mxu1 }
 0x184   :  { %v989_v5 = vpop.f32.mrb[9].mxu0  ;;  %v1056_v6 = vpop.f32.mrb[11].mxu1 }
 0x185   :  { %v990_v24 = vadd.f32 %v989_v5, %v988_v49  ;;  %v991_v8 = vpop.f32.mrb[10].mxu0  ;;  %v1057_v10 = vadd.f32 %v1056_v6, %v1055_v53 }
 0x186   :  { %v992_v14 = vpop.f32.mrb[11].mxu0 }
 0x187   :  { %v728_v15 = vadd.f32 %v1054_v11, %v990_v24  ;;  %v993_v51 = vadd.f32 %v992_v14, %v991_v8 }
 0x189   :  { %779 = vst [vmem:[%s1582_s4 + $0x20] sm:$0xff] %v728_v15  ;;  %v731_v59 = vadd.f32 %v1057_v10, %v993_v51  ;;  %v1058_v1 = vpop.f32.mrb[12].mxu1 }
 0x18a   :  { %v1059_v47 = vpop.f32.mrb[13].mxu1 }
 0x18b   :  { %780 = vst [vmem:[%s1582_s4 + $0x28] sm:$0xff] %v731_v59  ;;  %v994_v18 = vpop.f32.mrb[12].mxu0  ;;  %v1060_v9 = vadd.f32 %v1059_v47, %v1058_v1  ;;  %v1061_v20 = vpop.f32.mrb[14].mxu1 }
 0x18c   :  { %v995_v22 = vpop.f32.mrb[13].mxu0  ;;  %v1062_v16 = vpop.f32.mrb[15].mxu1 }
 0x18d   :  { %v996_v7 = vadd.f32 %v995_v22, %v994_v18  ;;  %v997_v28 = vpop.f32.mrb[14].mxu0  ;;  %v1063_v25 = vadd.f32 %v1062_v16, %v1061_v20 }
 0x18e   :  { %v998_v27 = vpop.f32.mrb[15].mxu0 }
 0x18f   :  { %v736_v13 = vadd.f32 %v1060_v9, %v996_v7  ;;  %v999_v29 = vadd.f32 %v998_v27, %v997_v28 }
 0x191   :  { %781 = vst [vmem:[%s1582_s4 + $0x30] sm:$0xff] %v736_v13  ;;  %v739_v60 = vadd.f32 %v1063_v25, %v999_v29  ;;  %v1064_v42 = vpop.f32.mrb[16].mxu1 }
 0x192   :  { %v1065_v32 = vpop.f32.mrb[17].mxu1 }
 0x193   :  { %782 = vst [vmem:[%s1582_s4 + $0x38] sm:$0xff] %v739_v60  ;;  %v1000_v33 = vpop.f32.mrb[16].mxu0  ;;  %v1066_v17 = vadd.f32 %v1065_v32, %v1064_v42  ;;  %v1067_v19 = vpop.f32.mrb[18].mxu1 }
 0x194   :  { %v1001_v26 = vpop.f32.mrb[17].mxu0  ;;  %v1068_v54 = vpop.f32.mrb[19].mxu1 }
 0x195   :  { %v1002_v34 = vadd.f32 %v1001_v26, %v1000_v33  ;;  %v1003_v31 = vpop.f32.mrb[18].mxu0  ;;  %v1069_v35 = vadd.f32 %v1068_v54, %v1067_v19 }
 0x196   :  { %v1004_v37 = vpop.f32.mrb[19].mxu0 }
 0x197   :  { %v744_v23 = vadd.f32 %v1066_v17, %v1002_v34  ;;  %v1005_v48 = vadd.f32 %v1004_v37, %v1003_v31 }
 0x199   :  { %783 = vst [vmem:[%s1582_s4 + $0x40] sm:$0xff] %v744_v23  ;;  %v747_v61 = vadd.f32 %v1069_v35, %v1005_v48  ;;  %v1070_v39 = vpop.f32.mrb[20].mxu1 }
 0x19a   :  { %v1071_v36 = vpop.f32.mrb[21].mxu1 }
 0x19b   :  { %784 = vst [vmem:[%s1582_s4 + $0x48] sm:$0xff] %v747_v61  ;;  %v1006_v43 = vpop.f32.mrb[20].mxu0  ;;  %v1072_v30 = vadd.f32 %v1071_v36, %v1070_v39  ;;  %v1073_v44 = vpop.f32.mrb[22].mxu1 }
 0x19c   :  { %v1007_v46 = vpop.f32.mrb[21].mxu0  ;;  %v1074_v40 = vpop.f32.mrb[23].mxu1 }
 0x19d   :  { %v1008_v21 = vadd.f32 %v1007_v46, %v1006_v43  ;;  %v1009_v62 = vpop.f32.mrb[22].mxu0  ;;  %v1075_v50 = vadd.f32 %v1074_v40, %v1073_v44 }
 0x19e   :  { %v1010_v52 = vpop.f32.mrb[23].mxu0 }
 0x19f   :  { %v752_v58 = vadd.f32 %v1072_v30, %v1008_v21  ;;  %v1011_v12 = vadd.f32 %v1010_v52, %v1009_v62 }
 0x1a1   :  { %785 = vst [vmem:[%s1582_s4 + $0x50] sm:$0xff] %v752_v58  ;;  %v755_v55 = vadd.f32 %v1075_v50, %v1011_v12  ;;  %v1076_v56 = vpop.f32.mrb[24].mxu1 }
 0x1a2   :  { %v1077_v38 = vpop.f32.mrb[25].mxu1 }
 0x1a3   :  { %786 = vst [vmem:[%s1582_s4 + $0x58] sm:$0xff] %v755_v55  ;;  %v1012_v57 = vpop.f32.mrb[24].mxu0  ;;  %v1078_v41 = vadd.f32 %v1077_v38, %v1076_v56  ;;  %v1079_v63 = vpop.f32.mrb[26].mxu1 }
 0x1a4   :  { %v1013_v0 = vpop.f32.mrb[25].mxu0  ;;  %v1080_v45 = vpop.f32.mrb[27].mxu1 }
 0x1a5   :  { %v1014_v3 = vadd.f32 %v1013_v0, %v1012_v57  ;;  %v1015_v2 = vpop.f32.mrb[26].mxu0  ;;  %v1081_v4 = vadd.f32 %v1080_v45, %v1079_v63 }
 0x1a6   :  { %v1016_v49 = vpop.f32.mrb[27].mxu0 }
 0x1a7   :  { %v760_v11 = vadd.f32 %v1078_v41, %v1014_v3  ;;  %v1017_v53 = vadd.f32 %v1016_v49, %v1015_v2 }
 0x1a9   :  { %787 = vst [vmem:[%s1582_s4 + $0x60] sm:$0xff] %v760_v11  ;;  %v763_v5 = vadd.f32 %v1081_v4, %v1017_v53  ;;  %v1082_v6 = vpop.f32.mrb[28].mxu1 }
 0x1aa   :  { %v1083_v24 = vpop.f32.mrb[29].mxu1 }
 0x1ab   :  { %788 = vst [vmem:[%s1582_s4 + $0x68] sm:$0xff] %v763_v5  ;;  %v1018_v8 = vpop.f32.mrb[28].mxu0  ;;  %v1084_v10 = vadd.f32 %v1083_v24, %v1082_v6  ;;  %v1085_v14 = vpop.f32.mrb[30].mxu1 }
 0x1ac   :  { %v1019_v15 = vpop.f32.mrb[29].mxu0  ;;  %v1086_v51 = vpop.f32.mrb[31].mxu1 }
 0x1ad   :  { %v1020_v59 = vadd.f32 %v1019_v15, %v1018_v8  ;;  %v1021_v1 = vpop.f32.mrb[30].mxu0  ;;  %v1087_v47 = vadd.f32 %v1086_v51, %v1085_v14 }
 0x1ae   :  { %v1022_v18 = vpop.f32.mrb[31].mxu0 }
 0x1af   :  { %v768_v9 = vadd.f32 %v1084_v10, %v1020_v59  ;;  %v1023_v20 = vadd.f32 %v1022_v18, %v1021_v1 }
 0x1b1   :  { %789 = vst [vmem:[%s1582_s4 + $0x70] sm:$0xff] %v768_v9  ;;  %v771_v22 = vadd.f32 %v1087_v47, %v1023_v20 }
 0x1b3   :  { %790 = vst [vmem:[%s1582_s4 + $0x78] sm:$0xff] %v771_v22 }

// kernel: bottleneck_forward.4
= control target key start
LH: loop header
LB: loop body
LE: loop exit
PB: predicated region body
PF: predicated region fallthrough
CT: control target
= control target key end

     0   :  { %s1958_s1 = inlined_call_operand.vmem [shape: bf16[128,128], index: 1, kind: input, shape index: {}]   ;;  %s1959_s0 = inlined_call_operand.vmem [shape: f32[512,128], index: 0, kind: input, shape index: {}]   ;;  %s1960_s2 = inlined_call_operand.vmem [shape: bf16[512,128], index: 2, kind: output, shape index: {0}]   ;;  %s1961_s3 = inlined_call_operand.vmem [shape: f32[1,8,128], index: 3, kind: output, shape index: {1}]   ;;  %s1962_s4 = inlined_call_operand.vmem [shape: f32[1,8,128], index: 4, kind: output, shape index: {2}]  }
   0x1   :  { %v1527_v0 = vld [vmem:[%s1958_s1] sm:$0xff]   ;;  %v1528_v1 = vld [vmem:[%s1958_s1 + $0x8] sm:$0xff]   ;;  %v1529_v2 = vld [vmem:[%s1958_s1 + $0x10] sm:$0xff]  }
   0x2   :  { %1431 = vmatprep.subr.bf16.mxu0 %v1527_v0  ;;  %1511 = vmatprep.subr.bf16.mxu1 %v1527_v0  ;;  %v1530_v3 = vld [vmem:[%s1958_s1 + $0x18] sm:$0xff]   ;;  %v15_v4 = vld [vmem:[%s1959_s0] sm:$0xff]  ;;  %v16_v5 = vld [vmem:[%s1959_s0 + $0x8] sm:$0xff] }
   0x3   :  { %1432 = vmatpush3.bf16.msra.mxu0 %v1527_v0  ;;  %1519 = vmatpush3.bf16.msra.mxu1 %v1527_v0  ;;  %v79_v6 = vpack.c.bf16 %v16_v5, %v15_v4  ;;  %v1531_v7 = vld [vmem:[%s1958_s1 + $0x20] sm:$0xff]   ;;  %v1532_v8 = vld [vmem:[%s1958_s1 + $0x28] sm:$0xff]   ;;  %v1533_v11 = vld [vmem:[%s1958_s1 + $0x30] sm:$0xff]  }
   0x4   :  { %1433 = vmatprep.subr.bf16.mxu0 %v1528_v1  ;;  %1512 = vmatprep.subr.bf16.mxu1 %v1528_v1  ;;  %v47_v9 = vld [vmem:[%s1959_s0 + $0x100] sm:$0xff]  ;;  %v48_v10 = vld [vmem:[%s1959_s0 + $0x108] sm:$0xff]  ;;  %v1534_v13 = vld [vmem:[%s1958_s1 + $0x38] sm:$0xff]  }
   0x5   :  { %1447 = vmatprep.mubr.bf16.mxu0 %v79_v6  ;;  %v95_v12 = vpack.c.bf16 %v48_v10, %v47_v9  ;;  %v17_v14 = vld [vmem:[%s1959_s0 + $0x10] sm:$0xff]  ;;  %v18_v15 = vld [vmem:[%s1959_s0 + $0x18] sm:$0xff]  ;;  %v19_v16 = vld [vmem:[%s1959_s0 + $0x20] sm:$0xff] }
   0x6   :  { %v20_v17 = vld [vmem:[%s1959_s0 + $0x28] sm:$0xff]  ;;  %v49_v18 = vld [vmem:[%s1959_s0 + $0x110] sm:$0xff]  ;;  %v50_v19 = vld [vmem:[%s1959_s0 + $0x118] sm:$0xff]  ;;  %v80_v22 = vpack.c.bf16 %v18_v15, %v17_v14 }
   0x7   :  { %1434 = vmatpush3.bf16.msra.mxu0 %v1528_v1  ;;  %1520 = vmatpush3.bf16.msra.mxu1 %v1528_v1  ;;  %v51_v20 = vld [vmem:[%s1959_s0 + $0x120] sm:$0xff]  ;;  %v52_v21 = vld [vmem:[%s1959_s0 + $0x128] sm:$0xff]  ;;  %v81_v23 = vpack.c.bf16 %v20_v17, %v19_v16  ;;  %v96_v24 = vpack.c.bf16 %v50_v19, %v49_v18  ;;  %v21_v26 = vld [vmem:[%s1959_s0 + $0x30] sm:$0xff] }
   0x8   :  { %1435 = vmatprep.subr.bf16.mxu0 %v1529_v2  ;;  %1513 = vmatprep.subr.bf16.mxu1 %v1529_v2  ;;  %v97_v25 = vpack.c.bf16 %v52_v21, %v51_v20  ;;  %v22_v27 = vld [vmem:[%s1959_s0 + $0x38] sm:$0xff]  ;;  %v23_v28 = vld [vmem:[%s1959_s0 + $0x40] sm:$0xff]  ;;  %v24_v29 = vld [vmem:[%s1959_s0 + $0x48] sm:$0xff] }
   0x9   :  { %1479 = vmatprep.mubr.bf16.mxu1 %v95_v12  ;;  %v53_v30 = vld [vmem:[%s1959_s0 + $0x130] sm:$0xff]  ;;  %v54_v31 = vld [vmem:[%s1959_s0 + $0x138] sm:$0xff]  ;;  %v55_v32 = vld [vmem:[%s1959_s0 + $0x140] sm:$0xff]  ;;  %v82_v34 = vpack.c.bf16 %v22_v27, %v21_v26  ;;  %v83_v35 = vpack.c.bf16 %v24_v29, %v23_v28 }
   0xa   :  { %v56_v33 = vld [vmem:[%s1959_s0 + $0x148] sm:$0xff]  ;;  %v98_v36 = vpack.c.bf16 %v54_v31, %v53_v30  ;;  %v25_v38 = vld [vmem:[%s1959_s0 + $0x50] sm:$0xff]  ;;  %v26_v39 = vld [vmem:[%s1959_s0 + $0x58] sm:$0xff] }
   0xb   :  { %1436 = vmatpush3.bf16.msra.mxu0 %v1529_v2  ;;  %1521 = vmatpush3.bf16.msra.mxu1 %v1529_v2  ;;  %v99_v37 = vpack.c.bf16 %v56_v33, %v55_v32  ;;  %v27_v40 = vld [vmem:[%s1959_s0 + $0x60] sm:$0xff]  ;;  %v28_v41 = vld [vmem:[%s1959_s0 + $0x68] sm:$0xff]  ;;  %v57_v42 = vld [vmem:[%s1959_s0 + $0x150] sm:$0xff]  ;;  %v84_v46 = vpack.c.bf16 %v26_v39, %v25_v38 }
   0xc   :  { %1437 = vmatprep.subr.bf16.mxu0 %v1530_v3  ;;  %1514 = vmatprep.subr.bf16.mxu1 %v1530_v3  ;;  %v58_v43 = vld [vmem:[%s1959_s0 + $0x158] sm:$0xff]  ;;  %v59_v44 = vld [vmem:[%s1959_s0 + $0x160] sm:$0xff]  ;;  %v60_v45 = vld [vmem:[%s1959_s0 + $0x168] sm:$0xff]  ;;  %v85_v47 = vpack.c.bf16 %v28_v41, %v27_v40 }
   0xd   :  { %v100_v48 = vpack.c.bf16 %v58_v43, %v57_v42  ;;  %v101_v49 = vpack.c.bf16 %v60_v45, %v59_v44  ;;  %v29_v50 = vld [vmem:[%s1959_s0 + $0x70] sm:$0xff]  ;;  %v30_v51 = vld [vmem:[%s1959_s0 + $0x78] sm:$0xff]  ;;  %v31_v52 = vld [vmem:[%s1959_s0 + $0x80] sm:$0xff] }
   0xe   :  { %v32_v53 = vld [vmem:[%s1959_s0 + $0x88] sm:$0xff]  ;;  %v61_v54 = vld [vmem:[%s1959_s0 + $0x170] sm:$0xff]  ;;  %v62_v55 = vld [vmem:[%s1959_s0 + $0x178] sm:$0xff]  ;;  %v86_v58 = vpack.c.bf16 %v30_v51, %v29_v50 }
   0xf   :  { %1438 = vmatpush3.bf16.msra.mxu0 %v1530_v3  ;;  %1522 = vmatpush3.bf16.msra.mxu1 %v1530_v3  ;;  %v63_v56 = vld [vmem:[%s1959_s0 + $0x180] sm:$0xff]  ;;  %v64_v57 = vld [vmem:[%s1959_s0 + $0x188] sm:$0xff]  ;;  %v87_v59 = vpack.c.bf16 %v32_v53, %v31_v52  ;;  %v102_v60 = vpack.c.bf16 %v62_v55, %v61_v54  ;;  %v33_v62 = vld [vmem:[%s1959_s0 + $0x90] sm:$0xff] }
  0x10   :  { %1439 = vmatprep.subr.bf16.mxu0 %v1531_v7  ;;  %1515 = vmatprep.subr.bf16.mxu1 %v1531_v7  ;;  %v103_v61 = vpack.c.bf16 %v64_v57, %v63_v56  ;;  %v34_v63 = vld [vmem:[%s1959_s0 + $0x98] sm:$0xff]  ;;  %v35_v0 = vld [vmem:[%s1959_s0 + $0xa0] sm:$0xff]  ;;  %v36_v1 = vld [vmem:[%s1959_s0 + $0xa8] sm:$0xff] }
  0x11   :  { %v65_v2 = vld [vmem:[%s1959_s0 + $0x190] sm:$0xff]  ;;  %v66_v3 = vld [vmem:[%s1959_s0 + $0x198] sm:$0xff]  ;;  %v67_v4 = vld [vmem:[%s1959_s0 + $0x1a0] sm:$0xff]  ;;  %v88_v6 = vpack.c.bf16 %v34_v63, %v33_v62 }
  0x12   :  { %v68_v5 = vld [vmem:[%s1959_s0 + $0x1a8] sm:$0xff]  ;;  %v37_v10 = vld [vmem:[%s1959_s0 + $0xb0] sm:$0xff]  ;;  %v39_v12 = vld [vmem:[%s1959_s0 + $0xc0] sm:$0xff] }
  0x13   :  { %1440 = vmatpush3.bf16.msra.mxu0 %v1531_v7  ;;  %1523 = vmatpush3.bf16.msra.mxu1 %v1531_v7  ;;  %v89_v7 = vpack.c.bf16 %v36_v1, %v35_v0  ;;  %v105_v9 = vpack.c.bf16 %v68_v5, %v67_v4  ;;  %v69_v14 = vld [vmem:[%s1959_s0 + $0x1b0] sm:$0xff]  ;;  %v70_v15 = vld [vmem:[%s1959_s0 + $0x1b8] sm:$0xff]  ;;  %v71_v16 = vld [vmem:[%s1959_s0 + $0x1c0] sm:$0xff] }
  0x14   :  { %1441 = vmatprep.subr.bf16.mxu0 %v1532_v8  ;;  %1516 = vmatprep.subr.bf16.mxu1 %v1532_v8  ;;  %v72_v17 = vld [vmem:[%s1959_s0 + $0x1c8] sm:$0xff]  ;;  %v106_v20 = vpack.c.bf16 %v70_v15, %v69_v14  ;;  %v73_v26 = vld [vmem:[%s1959_s0 + $0x1d0] sm:$0xff]  ;;  %v74_v27 = vld [vmem:[%s1959_s0 + $0x1d8] sm:$0xff] }
  0x15   :  { %v107_v21 = vpack.c.bf16 %v72_v17, %v71_v16  ;;  %v75_v28 = vld [vmem:[%s1959_s0 + $0x1e0] sm:$0xff]  ;;  %v76_v29 = vld [vmem:[%s1959_s0 + $0x1e8] sm:$0xff]  ;;  %v108_v32 = vpack.c.bf16 %v74_v27, %v73_v26 }
  0x16   :  { %v109_v33 = vpack.c.bf16 %v76_v29, %v75_v28 }
  0x17   :  { %1442 = vmatpush3.bf16.msra.mxu0 %v1532_v8  ;;  %1524 = vmatpush3.bf16.msra.mxu1 %v1532_v8  ;;  %v104_v8 = vpack.c.bf16 %v66_v3, %v65_v2 }
  0x18   :  { %1443 = vmatprep.subr.bf16.mxu0 %v1533_v11  ;;  %1517 = vmatprep.subr.bf16.mxu1 %v1533_v11 }
  0x1b   :  { %1444 = vmatpush3.bf16.msra.mxu0 %v1533_v11  ;;  %1525 = vmatpush3.bf16.msra.mxu1 %v1533_v11  ;;  %v38_v11 = vld [vmem:[%s1959_s0 + $0xb8] sm:$0xff] }
  0x1c   :  { %1445 = vmatprep.subr.bf16.mxu0 %v1534_v13  ;;  %1518 = vmatprep.subr.bf16.mxu1 %v1534_v13  ;;  %v90_v18 = vpack.c.bf16 %v38_v11, %v37_v10 }
  0x1f   :  { %1446 = vmatpush3.bf16.msra.mxu0 %v1534_v13  ;;  %1526 = vmatpush3.bf16.msra.mxu1 %v1534_v13  ;;  %v40_v13 = vld [vmem:[%s1959_s0 + $0xc8] sm:$0xff] }
  0x20   :  { %v91_v19 = vpack.c.bf16 %v40_v13, %v39_v12 }
  0x22   :  { %1448 = vmatmul.mubr.bf16.vlgmr.msra.gmra.mrb[0].mxu0 %v80_v22  ;;  %1480 = vmatmul.mubr.bf16.vlgmr.msra.gmra.mrb[0].mxu1 %v96_v24  ;;  %v41_v22 = vld [vmem:[%s1959_s0 + $0xd0] sm:$0xff]  ;;  %v43_v24 = vld [vmem:[%s1959_s0 + $0xe0] sm:$0xff] }
  0x23   :  { %1451 = vmatprep.mubr.bf16.mxu0 %v81_v23  ;;  %1483 = vmatprep.mubr.bf16.mxu1 %v97_v25  ;;  %v42_v23 = vld [vmem:[%s1959_s0 + $0xd8] sm:$0xff]  ;;  %v44_v25 = vld [vmem:[%s1959_s0 + $0xe8] sm:$0xff] }
  0x24   :  { %v92_v30 = vpack.c.bf16 %v42_v23, %v41_v22  ;;  %v93_v31 = vpack.c.bf16 %v44_v25, %v43_v24 }
  0x2a   :  { %1452 = vmatmul.mubr.bf16.gmra.mrb[4].mxu0 %v82_v34  ;;  %1484 = vmatmul.mubr.bf16.gmra.mrb[4].mxu1 %v98_v36  ;;  %v45_v34 = vld [vmem:[%s1959_s0 + $0xf0] sm:$0xff] }
  0x2b   :  { %1455 = vmatprep.mubr.bf16.mxu0 %v83_v35  ;;  %1487 = vmatprep.mubr.bf16.mxu1 %v99_v37  ;;  %v46_v35 = vld [vmem:[%s1959_s0 + $0xf8] sm:$0xff]  ;;  %v77_v36 = vld [vmem:[%s1959_s0 + $0x1f0] sm:$0xff] }
  0x2c   :  { %v78_v37 = vld [vmem:[%s1959_s0 + $0x1f8] sm:$0xff]  ;;  %v94_v38 = vpack.c.bf16 %v46_v35, %v45_v34 }
  0x2d   :  { %v110_v39 = vpack.c.bf16 %v78_v37, %v77_v36 }
  0x32   :  { %1456 = vmatmul.mubr.bf16.gmra.mrb[8].mxu0 %v84_v46  ;;  %1488 = vmatmul.mubr.bf16.gmra.mrb[8].mxu1 %v100_v48 }
  0x33   :  { %1459 = vmatprep.mubr.bf16.mxu0 %v85_v47  ;;  %1491 = vmatprep.mubr.bf16.mxu1 %v101_v49 }
  0x3a   :  { %1460 = vmatmul.mubr.bf16.gmra.mrb[12].mxu0 %v86_v58  ;;  %1492 = vmatmul.mubr.bf16.gmra.mrb[12].mxu1 %v102_v60 }
  0x3b   :  { %1463 = vmatprep.mubr.bf16.mxu0 %v87_v59  ;;  %1495 = vmatprep.mubr.bf16.mxu1 %v103_v61 }
  0x42   :  { %1464 = vmatmul.mubr.bf16.gmra.mrb[16].mxu0 %v88_v6  ;;  %1496 = vmatmul.mubr.bf16.gmra.mrb[16].mxu1 %v104_v8 }
  0x43   :  { %1467 = vmatprep.mubr.bf16.mxu0 %v89_v7  ;;  %1499 = vmatprep.mubr.bf16.mxu1 %v105_v9 }
  0x4a   :  { %1468 = vmatmul.mubr.bf16.gmra.mrb[20].mxu0 %v90_v18  ;;  %1500 = vmatmul.mubr.bf16.gmra.mrb[20].mxu1 %v106_v20 }
  0x4b   :  { %1471 = vmatprep.mubr.bf16.mxu0 %v91_v19  ;;  %1503 = vmatprep.mubr.bf16.mxu1 %v107_v21 }
  0x52   :  { %1472 = vmatmul.mubr.bf16.gmra.mrb[24].mxu0 %v92_v30  ;;  %1504 = vmatmul.mubr.bf16.gmra.mrb[24].mxu1 %v108_v32 }
  0x53   :  { %1475 = vmatprep.mubr.bf16.mxu0 %v93_v31  ;;  %1507 = vmatprep.mubr.bf16.mxu1 %v109_v33 }
  0x5a   :  { %1476 = vmatmul.mubr.bf16.gmra.mrb[28].mxu0 %v94_v38  ;;  %1508 = vmatmul.mubr.bf16.gmra.mrb[28].mxu1 %v110_v39 }
  0xf5   :  { %v1449_v40 = vpop.f32.mrb[0].mxu0  ;;  %v1481_v42 = vpop.f32.mrb[0].mxu1 }
  0xf6   :  { %v209_v41 = vpop.f32.mrb[1].mxu0  ;;  %v337_v44 = vpop.f32.mrb[1].mxu1 }
  0xf7   :  { %v1450_v43 = vpop.f32.mrb[2].mxu0  ;;  %v1482_v47 = vpop.f32.mrb[2].mxu1 }
  0xf8   :  { %v465_v45 = vpack.c.bf16 %v1450_v43, %v1449_v40  ;;  %v212_v46 = vpop.f32.mrb[3].mxu0  ;;  %v1776_v49 = vpack.c.bf16 %v1482_v47, %v1481_v42  ;;  %v340_v50 = vpop.f32.mrb[3].mxu1 }
  0xf9   :  { %v464_v48 = vpack.c.bf16 %v212_v46, %v209_v41  ;;  %v1781_v51 = vpack.c.bf16 %v340_v50, %v337_v44 }
  0xfa   :  { %1360 = vst [vmem:[%s1960_s2 + $0x8] sm:$0xff] %v465_v45   ;;  %v786_v52 = vunpack.c.l.bf16 %v465_v45  ;;  %1376 = vst [vmem:[%s1960_s2 + $0x88] sm:$0xff] %v1776_v49   ;;  %v787_v55 = vunpack.c.h.bf16 %v465_v45 }
  0xfb   :  { %1204 = vst [vmem:[%s1960_s2] sm:$0xff] %v464_v48   ;;  %v784_v53 = vunpack.c.l.bf16 %v464_v48  ;;  %v785_v54 = vunpack.c.h.bf16 %v464_v48  ;;  %1375 = vst [vmem:[%s1960_s2 + $0x80] sm:$0xff] %v1781_v51  }
  0xfc   :  { %v919_v62 = vmul.f32 %v786_v52, %v786_v52  ;;  %v920_v3 = vmul.f32 %v787_v55, %v787_v55 }
  0xfd   :  { %v848_v56 = vadd.f32 %v785_v54, %v784_v53  ;;  %v917_v57 = vmul.f32 %v784_v53, %v784_v53  ;;  %v918_v58 = vmul.f32 %v785_v54, %v785_v54  ;;  %v1453_v59 = vpop.f32.mrb[4].mxu0  ;;  %v1485_v61 = vpop.f32.mrb[4].mxu1 }
  0xfe   :  { %v225_v60 = vpop.f32.mrb[5].mxu0  ;;  %v353_v2 = vpop.f32.mrb[5].mxu1 }
  0xff   :  { %v849_v63 = vadd.f32 %v848_v56, %v786_v52  ;;  %v981_v0 = vadd.f32 %v918_v58, %v917_v57  ;;  %v1454_v1 = vpop.f32.mrb[6].mxu0  ;;  %v1486_v6 = vpop.f32.mrb[6].mxu1 }
 0x100   :  { %v467_v4 = vpack.c.bf16 %v1454_v1, %v1453_v59  ;;  %v228_v5 = vpop.f32.mrb[7].mxu0  ;;  %v1794_v10 = vpack.c.bf16 %v1486_v6, %v1485_v61  ;;  %v356_v11 = vpop.f32.mrb[7].mxu1 }
 0x101   :  { %v982_v7 = vadd.f32 %v981_v0, %v919_v62  ;;  %v466_v8 = vpack.c.bf16 %v228_v5, %v225_v60  ;;  %v850_v9 = vadd.f32 %v849_v63, %v787_v55  ;;  %v1799_v12 = vpack.c.bf16 %v356_v11, %v353_v2 }
 0x102   :  { %1362 = vst [vmem:[%s1960_s2 + $0x18] sm:$0xff] %v467_v4   ;;  %1378 = vst [vmem:[%s1960_s2 + $0x98] sm:$0xff] %v1794_v10   ;;  %v790_v16 = vunpack.c.l.bf16 %v467_v4  ;;  %v791_v20 = vunpack.c.h.bf16 %v467_v4 }
 0x103   :  { %1361 = vst [vmem:[%s1960_s2 + $0x10] sm:$0xff] %v466_v8   ;;  %v788_v13 = vunpack.c.l.bf16 %v466_v8  ;;  %v789_v14 = vunpack.c.h.bf16 %v466_v8  ;;  %v983_v15 = vadd.f32 %v982_v7, %v920_v3  ;;  %1377 = vst [vmem:[%s1960_s2 + $0x90] sm:$0xff] %v1799_v12  }
 0x104   :  { %v923_v28 = vmul.f32 %v790_v16, %v790_v16  ;;  %v924_v37 = vmul.f32 %v791_v20, %v791_v20 }
 0x105   :  { %v851_v17 = vadd.f32 %v850_v9, %v788_v13  ;;  %v921_v18 = vmul.f32 %v788_v13, %v788_v13  ;;  %v1457_v19 = vpop.f32.mrb[8].mxu0  ;;  %v1489_v22 = vpop.f32.mrb[8].mxu1  ;;  %v922_v24 = vmul.f32 %v789_v14, %v789_v14 }
 0x106   :  { %v241_v21 = vpop.f32.mrb[9].mxu0  ;;  %v369_v27 = vpop.f32.mrb[9].mxu1 }
 0x107   :  { %v852_v23 = vadd.f32 %v851_v17, %v789_v14  ;;  %v984_v25 = vadd.f32 %v983_v15, %v921_v18  ;;  %v1458_v26 = vpop.f32.mrb[10].mxu0  ;;  %v1490_v31 = vpop.f32.mrb[10].mxu1 }
 0x108   :  { %v469_v29 = vpack.c.bf16 %v1458_v26, %v1457_v19  ;;  %v244_v30 = vpop.f32.mrb[11].mxu0  ;;  %v1812_v35 = vpack.c.bf16 %v1490_v31, %v1489_v22  ;;  %v372_v36 = vpop.f32.mrb[11].mxu1 }
 0x109   :  { %v853_v32 = vadd.f32 %v852_v23, %v790_v16  ;;  %v985_v33 = vadd.f32 %v984_v25, %v922_v24  ;;  %v468_v34 = vpack.c.bf16 %v244_v30, %v241_v21  ;;  %v1817_v38 = vpack.c.bf16 %v372_v36, %v369_v27 }
 0x10a   :  { %1364 = vst [vmem:[%s1960_s2 + $0x28] sm:$0xff] %v469_v29   ;;  %1380 = vst [vmem:[%s1960_s2 + $0xa8] sm:$0xff] %v1812_v35   ;;  %v794_v43 = vunpack.c.l.bf16 %v469_v29  ;;  %v795_v48 = vunpack.c.h.bf16 %v469_v29 }
 0x10b   :  { %v986_v39 = vadd.f32 %v985_v33, %v923_v28  ;;  %1363 = vst [vmem:[%s1960_s2 + $0x20] sm:$0xff] %v468_v34   ;;  %v792_v40 = vunpack.c.l.bf16 %v468_v34  ;;  %v793_v41 = vunpack.c.h.bf16 %v468_v34  ;;  %v854_v42 = vadd.f32 %v853_v32, %v791_v20  ;;  %1379 = vst [vmem:[%s1960_s2 + $0xa0] sm:$0xff] %v1817_v38  }
 0x10c   :  { %v927_v58 = vmul.f32 %v794_v43, %v794_v43  ;;  %v928_v3 = vmul.f32 %v795_v48, %v795_v48 }
 0x10d   :  { %v855_v44 = vadd.f32 %v854_v42, %v792_v40  ;;  %v925_v45 = vmul.f32 %v792_v40, %v792_v40  ;;  %v987_v46 = vadd.f32 %v986_v39, %v924_v37  ;;  %v1461_v47 = vpop.f32.mrb[12].mxu0  ;;  %v1493_v52 = vpop.f32.mrb[12].mxu1  ;;  %v926_v54 = vmul.f32 %v793_v41, %v793_v41 }
 0x10e   :  { %v257_v50 = vpop.f32.mrb[13].mxu0  ;;  %v385_v57 = vpop.f32.mrb[13].mxu1 }
 0x10f   :  { %v856_v53 = vadd.f32 %v855_v44, %v793_v41  ;;  %v988_v55 = vadd.f32 %v987_v46, %v925_v45  ;;  %v1462_v56 = vpop.f32.mrb[14].mxu0  ;;  %v1494_v61 = vpop.f32.mrb[14].mxu1 }
 0x110   :  { %v471_v59 = vpack.c.bf16 %v1462_v56, %v1461_v47  ;;  %v260_v60 = vpop.f32.mrb[15].mxu0  ;;  %v1830_v1 = vpack.c.bf16 %v1494_v61, %v1493_v52  ;;  %v388_v2 = vpop.f32.mrb[15].mxu1 }
 0x111   :  { %v857_v62 = vadd.f32 %v856_v53, %v794_v43  ;;  %v989_v63 = vadd.f32 %v988_v55, %v926_v54  ;;  %v470_v0 = vpack.c.bf16 %v260_v60, %v257_v50  ;;  %v1835_v4 = vpack.c.bf16 %v388_v2, %v385_v57 }
 0x112   :  { %1366 = vst [vmem:[%s1960_s2 + $0x38] sm:$0xff] %v471_v59   ;;  %1382 = vst [vmem:[%s1960_s2 + $0xb8] sm:$0xff] %v1830_v1   ;;  %v798_v9 = vunpack.c.l.bf16 %v471_v59  ;;  %v799_v16 = vunpack.c.h.bf16 %v471_v59 }
 0x113   :  { %v990_v5 = vadd.f32 %v989_v63, %v927_v58  ;;  %1365 = vst [vmem:[%s1960_s2 + $0x30] sm:$0xff] %v470_v0   ;;  %v796_v6 = vunpack.c.l.bf16 %v470_v0  ;;  %v797_v7 = vunpack.c.h.bf16 %v470_v0  ;;  %v858_v8 = vadd.f32 %v857_v62, %v795_v48  ;;  %1381 = vst [vmem:[%s1960_s2 + $0xb0] sm:$0xff] %v1835_v4  }
 0x114   :  { %v931_v24 = vmul.f32 %v798_v9, %v798_v9  ;;  %v932_v33 = vmul.f32 %v799_v16, %v799_v16 }
 0x115   :  { %v859_v11 = vadd.f32 %v858_v8, %v796_v6  ;;  %v929_v13 = vmul.f32 %v796_v6, %v796_v6  ;;  %v991_v14 = vadd.f32 %v990_v5, %v928_v3  ;;  %v1465_v15 = vpop.f32.mrb[16].mxu0  ;;  %v1497_v18 = vpop.f32.mrb[16].mxu1  ;;  %v930_v20 = vmul.f32 %v797_v7, %v797_v7 }
 0x116   :  { %v273_v17 = vpop.f32.mrb[17].mxu0  ;;  %v401_v23 = vpop.f32.mrb[17].mxu1 }
 0x117   :  { %v860_v19 = vadd.f32 %v859_v11, %v797_v7  ;;  %v992_v21 = vadd.f32 %v991_v14, %v929_v13  ;;  %v1466_v22 = vpop.f32.mrb[18].mxu0  ;;  %v1498_v27 = vpop.f32.mrb[18].mxu1 }
 0x118   :  { %v473_v25 = vpack.c.bf16 %v1466_v22, %v1465_v15  ;;  %v276_v26 = vpop.f32.mrb[19].mxu0  ;;  %v1848_v31 = vpack.c.bf16 %v1498_v27, %v1497_v18  ;;  %v404_v32 = vpop.f32.mrb[19].mxu1 }
 0x119   :  { %v861_v28 = vadd.f32 %v860_v19, %v798_v9  ;;  %v993_v29 = vadd.f32 %v992_v21, %v930_v20  ;;  %v472_v30 = vpack.c.bf16 %v276_v26, %v273_v17  ;;  %v1853_v34 = vpack.c.bf16 %v404_v32, %v401_v23 }
 0x11a   :  { %1368 = vst [vmem:[%s1960_s2 + $0x48] sm:$0xff] %v473_v25   ;;  %1384 = vst [vmem:[%s1960_s2 + $0xc8] sm:$0xff] %v1848_v31   ;;  %v802_v41 = vunpack.c.l.bf16 %v473_v25  ;;  %v803_v46 = vunpack.c.h.bf16 %v473_v25 }
 0x11b   :  { %v994_v36 = vadd.f32 %v993_v29, %v931_v24  ;;  %1367 = vst [vmem:[%s1960_s2 + $0x40] sm:$0xff] %v472_v30   ;;  %v800_v37 = vunpack.c.l.bf16 %v472_v30  ;;  %v801_v39 = vunpack.c.h.bf16 %v472_v30  ;;  %v862_v40 = vadd.f32 %v861_v28, %v799_v16  ;;  %1383 = vst [vmem:[%s1960_s2 + $0xc0] sm:$0xff] %v1853_v34  }
 0x11c   :  { %v935_v56 = vmul.f32 %v802_v41, %v802_v41  ;;  %v936_v2 = vmul.f32 %v803_v46, %v803_v46 }
 0x11d   :  { %v863_v42 = vadd.f32 %v862_v40, %v800_v37  ;;  %v933_v43 = vmul.f32 %v800_v37, %v800_v37  ;;  %v995_v44 = vadd.f32 %v994_v36, %v932_v33  ;;  %v1469_v45 = vpop.f32.mrb[20].mxu0  ;;  %v1501_v48 = vpop.f32.mrb[20].mxu1  ;;  %v934_v52 = vmul.f32 %v801_v39, %v801_v39 }
 0x11e   :  { %v289_v47 = vpop.f32.mrb[21].mxu0  ;;  %v417_v55 = vpop.f32.mrb[21].mxu1 }
 0x11f   :  { %v864_v50 = vadd.f32 %v863_v42, %v801_v39  ;;  %v996_v53 = vadd.f32 %v995_v44, %v933_v43  ;;  %v1470_v54 = vpop.f32.mrb[22].mxu0  ;;  %v1502_v59 = vpop.f32.mrb[22].mxu1 }
 0x120   :  { %v475_v57 = vpack.c.bf16 %v1470_v54, %v1469_v45  ;;  %v292_v58 = vpop.f32.mrb[23].mxu0  ;;  %v1866_v63 = vpack.c.bf16 %v1502_v59, %v1501_v48  ;;  %v420_v0 = vpop.f32.mrb[23].mxu1 }
 0x121   :  { %v865_v60 = vadd.f32 %v864_v50, %v802_v41  ;;  %v997_v61 = vadd.f32 %v996_v53, %v934_v52  ;;  %v474_v62 = vpack.c.bf16 %v292_v58, %v289_v47  ;;  %v1871_v3 = vpack.c.bf16 %v420_v0, %v417_v55 }
 0x122   :  { %1370 = vst [vmem:[%s1960_s2 + $0x58] sm:$0xff] %v475_v57   ;;  %1386 = vst [vmem:[%s1960_s2 + $0xd8] sm:$0xff] %v1866_v63   ;;  %v806_v9 = vunpack.c.l.bf16 %v475_v57  ;;  %v807_v16 = vunpack.c.h.bf16 %v475_v57 }
 0x123   :  { %v998_v5 = vadd.f32 %v997_v61, %v935_v56  ;;  %1369 = vst [vmem:[%s1960_s2 + $0x50] sm:$0xff] %v474_v62   ;;  %v804_v6 = vunpack.c.l.bf16 %v474_v62  ;;  %v805_v7 = vunpack.c.h.bf16 %v474_v62  ;;  %v866_v8 = vadd.f32 %v865_v60, %v803_v46  ;;  %1385 = vst [vmem:[%s1960_s2 + $0xd0] sm:$0xff] %v1871_v3  }
 0x124   :  { %v939_v24 = vmul.f32 %v806_v9, %v806_v9  ;;  %v940_v36 = vmul.f32 %v807_v16, %v807_v16 }
 0x125   :  { %v867_v11 = vadd.f32 %v866_v8, %v804_v6  ;;  %v937_v13 = vmul.f32 %v804_v6, %v804_v6  ;;  %v999_v14 = vadd.f32 %v998_v5, %v936_v2  ;;  %v1473_v15 = vpop.f32.mrb[24].mxu0  ;;  %v1505_v18 = vpop.f32.mrb[24].mxu1  ;;  %v938_v20 = vmul.f32 %v805_v7, %v805_v7 }
 0x126   :  { %v305_v17 = vpop.f32.mrb[25].mxu0  ;;  %v433_v23 = vpop.f32.mrb[25].mxu1 }
 0x127   :  { %v868_v19 = vadd.f32 %v867_v11, %v805_v7  ;;  %v1000_v21 = vadd.f32 %v999_v14, %v937_v13  ;;  %v1474_v22 = vpop.f32.mrb[26].mxu0  ;;  %v1506_v27 = vpop.f32.mrb[26].mxu1 }
 0x128   :  { %v477_v25 = vpack.c.bf16 %v1474_v22, %v1473_v15  ;;  %v308_v26 = vpop.f32.mrb[27].mxu0  ;;  %v1884_v32 = vpack.c.bf16 %v1506_v27, %v1505_v18  ;;  %v436_v33 = vpop.f32.mrb[27].mxu1 }
 0x129   :  { %v869_v28 = vadd.f32 %v868_v19, %v806_v9  ;;  %v1001_v29 = vadd.f32 %v1000_v21, %v938_v20  ;;  %v476_v30 = vpack.c.bf16 %v308_v26, %v305_v17  ;;  %v1889_v37 = vpack.c.bf16 %v436_v33, %v433_v23 }
 0x12a   :  { %1372 = vst [vmem:[%s1960_s2 + $0x68] sm:$0xff] %v477_v25   ;;  %1388 = vst [vmem:[%s1960_s2 + $0xe8] sm:$0xff] %v1884_v32   ;;  %v810_v43 = vunpack.c.l.bf16 %v477_v25  ;;  %v811_v48 = vunpack.c.h.bf16 %v477_v25  ;;  %v816_v26 = vunpack.c.l.bf16 %v1781_v51  ;;  %v818_v33 = vunpack.c.l.bf16 %v1776_v49 }
 0x12b   :  { %v1002_v39 = vadd.f32 %v1001_v29, %v939_v24  ;;  %1371 = vst [vmem:[%s1960_s2 + $0x60] sm:$0xff] %v476_v30   ;;  %v808_v40 = vunpack.c.l.bf16 %v476_v30  ;;  %v809_v41 = vunpack.c.h.bf16 %v476_v30  ;;  %v870_v42 = vadd.f32 %v869_v28, %v807_v16  ;;  %1387 = vst [vmem:[%s1960_s2 + $0xe0] sm:$0xff] %v1889_v37  }
 0x12c   :  { %v943_v58 = vmul.f32 %v810_v43, %v810_v43  ;;  %v944_v7 = vmul.f32 %v811_v48, %v811_v48  ;;  %v817_v29 = vunpack.c.h.bf16 %v1781_v51  ;;  %v821_v51 = vunpack.c.h.bf16 %v1799_v12 }
 0x12d   :  { %v871_v44 = vadd.f32 %v870_v42, %v808_v40  ;;  %v941_v45 = vmul.f32 %v808_v40, %v808_v40  ;;  %v1003_v46 = vadd.f32 %v1002_v39, %v940_v36  ;;  %v1477_v47 = vpop.f32.mrb[28].mxu0  ;;  %v1509_v52 = vpop.f32.mrb[28].mxu1  ;;  %v942_v54 = vmul.f32 %v809_v41, %v809_v41 }
 0x12e   :  { %v321_v50 = vpop.f32.mrb[29].mxu0  ;;  %v449_v57 = vpop.f32.mrb[29].mxu1  ;;  %v949_v39 = vmul.f32 %v816_v26, %v816_v26 }
 0x12f   :  { %v872_v53 = vadd.f32 %v871_v44, %v809_v41  ;;  %v1004_v55 = vadd.f32 %v1003_v46, %v941_v45  ;;  %v1478_v56 = vpop.f32.mrb[30].mxu0  ;;  %v1510_v61 = vpop.f32.mrb[30].mxu1  ;;  %v819_v41 = vunpack.c.h.bf16 %v1776_v49  ;;  %v951_v45 = vmul.f32 %v818_v33, %v818_v33 }
 0x130   :  { %v479_v59 = vpack.c.bf16 %v1478_v56, %v1477_v47  ;;  %v324_v60 = vpop.f32.mrb[31].mxu0  ;;  %v1902_v5 = vpack.c.bf16 %v1510_v61, %v1509_v52  ;;  %v452_v6 = vpop.f32.mrb[31].mxu1  ;;  %v823_v49 = vunpack.c.h.bf16 %v1794_v10 }
 0x131   :  { %v873_v62 = vadd.f32 %v872_v53, %v810_v43  ;;  %v1005_v0 = vadd.f32 %v1004_v55, %v942_v54  ;;  %v478_v2 = vpack.c.bf16 %v324_v60, %v321_v50  ;;  %v1907_v8 = vpack.c.bf16 %v452_v6, %v449_v57 }
 0x132   :  { %1374 = vst [vmem:[%s1960_s2 + $0x78] sm:$0xff] %v479_v59   ;;  %1390 = vst [vmem:[%s1960_s2 + $0xf8] sm:$0xff] %v1902_v5   ;;  %v814_v15 = vunpack.c.l.bf16 %v479_v59  ;;  %v815_v19 = vunpack.c.h.bf16 %v479_v59  ;;  %v950_v43 = vmul.f32 %v817_v29, %v817_v29  ;;  %v952_v50 = vmul.f32 %v819_v41, %v819_v41 }
 0x133   :  { %v1006_v9 = vadd.f32 %v1005_v0, %v943_v58  ;;  %1373 = vst [vmem:[%s1960_s2 + $0x70] sm:$0xff] %v478_v2   ;;  %v812_v11 = vunpack.c.l.bf16 %v478_v2  ;;  %v813_v13 = vunpack.c.h.bf16 %v478_v2  ;;  %v874_v14 = vadd.f32 %v873_v62, %v811_v48  ;;  %1389 = vst [vmem:[%s1960_s2 + $0xf0] sm:$0xff] %v1907_v8  }
 0x134   :  { %v947_v23 = vmul.f32 %v814_v15, %v814_v15  ;;  %v948_v27 = vmul.f32 %v815_v19, %v815_v19  ;;  %v820_v48 = vunpack.c.l.bf16 %v1799_v12  ;;  %v822_v54 = vunpack.c.l.bf16 %v1794_v10 }
 0x135   :  { %v875_v16 = vadd.f32 %v874_v14, %v812_v11  ;;  %v945_v17 = vmul.f32 %v812_v11, %v812_v11  ;;  %v1007_v18 = vadd.f32 %v1006_v9, %v944_v7  ;;  %v946_v21 = vmul.f32 %v813_v13, %v813_v13 }
 0x136   :  { %v953_v56 = vmul.f32 %v820_v48, %v820_v48  ;;  %v954_v59 = vmul.f32 %v821_v51, %v821_v51  ;;  %v955_v61 = vmul.f32 %v822_v54, %v822_v54  ;;  %v824_v2 = vunpack.c.l.bf16 %v1817_v38 }
 0x137   :  { %v876_v20 = vadd.f32 %v875_v16, %v813_v13  ;;  %v1008_v22 = vadd.f32 %v1007_v18, %v945_v17  ;;  %v956_v6 = vmul.f32 %v823_v49, %v823_v49  ;;  %v825_v12 = vunpack.c.h.bf16 %v1817_v38 }
 0x138   :  { %v826_v11 = vunpack.c.l.bf16 %v1812_v35  ;;  %v957_v14 = vmul.f32 %v824_v2, %v824_v2  ;;  %v827_v10 = vunpack.c.h.bf16 %v1812_v35  ;;  %v829_v38 = vunpack.c.h.bf16 %v1835_v4 }
 0x139   :  { %v877_v24 = vadd.f32 %v876_v20, %v814_v15  ;;  %v1009_v25 = vadd.f32 %v1008_v22, %v946_v21  ;;  %v958_v17 = vmul.f32 %v825_v12, %v825_v12  ;;  %v828_v22 = vunpack.c.l.bf16 %v1835_v4 }
 0x13a   :  { %v831_v35 = vunpack.c.h.bf16 %v1830_v1  ;;  %v833_v4 = vunpack.c.h.bf16 %v1853_v34 }
 0x13b   :  { %v1010_v28 = vadd.f32 %v1009_v25, %v947_v23  ;;  %v878_v30 = vadd.f32 %v877_v24, %v815_v19  ;;  %v959_v19 = vmul.f32 %v826_v11, %v826_v11  ;;  %v960_v23 = vmul.f32 %v827_v10, %v827_v10 }
 0x13d   :  { %v879_v36 = vadd.f32 %v878_v30, %v816_v26  ;;  %v1011_v40 = vadd.f32 %v1010_v28, %v948_v27  ;;  %v830_v26 = vunpack.c.l.bf16 %v1830_v1  ;;  %v961_v28 = vmul.f32 %v828_v22, %v828_v22 }
 0x13e   :  { %v835_v1 = vunpack.c.h.bf16 %v1848_v31 }
 0x13f   :  { %v880_v42 = vadd.f32 %v879_v36, %v817_v29  ;;  %v1012_v44 = vadd.f32 %v1011_v40, %v949_v39  ;;  %v963_v39 = vmul.f32 %v830_v26, %v830_v26 }
 0x141   :  { %v881_v46 = vadd.f32 %v880_v42, %v818_v33  ;;  %v1013_v47 = vadd.f32 %v1012_v44, %v950_v43  ;;  %v962_v33 = vmul.f32 %v829_v38, %v829_v38  ;;  %v832_v42 = vunpack.c.l.bf16 %v1853_v34 }
 0x142   :  { %v964_v43 = vmul.f32 %v831_v35, %v831_v35  ;;  %v837_v34 = vunpack.c.h.bf16 %v1871_v3 }
 0x143   :  { %v1014_v52 = vadd.f32 %v1013_v47, %v951_v45  ;;  %v882_v53 = vadd.f32 %v881_v46, %v819_v41  ;;  %v834_v46 = vunpack.c.l.bf16 %v1848_v31  ;;  %v839_v31 = vunpack.c.h.bf16 %v1866_v63 }
 0x145   :  { %v883_v55 = vadd.f32 %v882_v53, %v820_v48  ;;  %v1015_v57 = vadd.f32 %v1014_v52, %v952_v50  ;;  %v965_v48 = vmul.f32 %v832_v42, %v832_v42 }
 0x147   :  { %v884_v58 = vadd.f32 %v883_v55, %v821_v51  ;;  %v1016_v60 = vadd.f32 %v1015_v57, %v953_v56  ;;  %v966_v51 = vmul.f32 %v833_v4, %v833_v4  ;;  %v836_v57 = vunpack.c.l.bf16 %v1871_v3 }
 0x148   :  { %v841_v3 = vunpack.c.h.bf16 %v1889_v37 }
 0x149   :  { %v885_v62 = vadd.f32 %v884_v58, %v822_v54  ;;  %v1017_v0 = vadd.f32 %v1016_v60, %v954_v59  ;;  %v967_v54 = vmul.f32 %v834_v46, %v834_v46  ;;  %v838_v60 = vunpack.c.l.bf16 %v1866_v63 }
 0x14a   :  { %v843_v63 = vunpack.c.h.bf16 %v1884_v32 }
 0x14b   :  { %v1018_v7 = vadd.f32 %v1017_v0, %v955_v61  ;;  %v886_v9 = vadd.f32 %v885_v62, %v823_v49  ;;  %v968_v49 = vmul.f32 %v835_v1, %v835_v1  ;;  %v969_v62 = vmul.f32 %v836_v57, %v836_v57 }
 0x14d   :  { %v887_v13 = vadd.f32 %v886_v9, %v824_v2  ;;  %v1019_v15 = vadd.f32 %v1018_v7, %v956_v6  ;;  %v970_v6 = vmul.f32 %v837_v34, %v837_v34 }
 0x14f   :  { %v888_v16 = vadd.f32 %v887_v13, %v825_v12  ;;  %v1020_v18 = vadd.f32 %v1019_v15, %v957_v14  ;;  %v971_v12 = vmul.f32 %v838_v60, %v838_v60  ;;  %v840_v13 = vunpack.c.l.bf16 %v1889_v37 }
 0x150   :  { %v972_v14 = vmul.f32 %v839_v31, %v839_v31  ;;  %v845_v37 = vunpack.c.h.bf16 %v1907_v8 }
 0x151   :  { %v889_v20 = vadd.f32 %v888_v16, %v826_v11  ;;  %v1021_v21 = vadd.f32 %v1020_v18, %v958_v17  ;;  %v842_v16 = vunpack.c.l.bf16 %v1884_v32  ;;  %v973_v18 = vmul.f32 %v840_v13, %v840_v13 }
 0x152   :  { %v847_v32 = vunpack.c.h.bf16 %v1902_v5 }
 0x153   :  { %v1022_v24 = vadd.f32 %v1021_v21, %v959_v19  ;;  %v890_v25 = vadd.f32 %v889_v20, %v827_v10  ;;  %v974_v21 = vmul.f32 %v841_v3, %v841_v3 }
 0x155   :  { %v891_v27 = vadd.f32 %v890_v25, %v828_v22  ;;  %v1023_v29 = vadd.f32 %v1022_v24, %v960_v23  ;;  %v975_v23 = vmul.f32 %v842_v16, %v842_v16  ;;  %v844_v25 = vunpack.c.l.bf16 %v1907_v8 }
 0x157   :  { %v892_v30 = vadd.f32 %v891_v27, %v829_v38  ;;  %v1024_v36 = vadd.f32 %v1023_v29, %v961_v28  ;;  %v846_v29 = vunpack.c.l.bf16 %v1902_v5 }
 0x159   :  { %v893_v40 = vadd.f32 %v892_v30, %v830_v26  ;;  %v1025_v41 = vadd.f32 %v1024_v36, %v962_v33  ;;  %v976_v26 = vmul.f32 %v843_v63, %v843_v63  ;;  %v977_v30 = vmul.f32 %v844_v25, %v844_v25 }
 0x15b   :  { %v1026_v44 = vadd.f32 %v1025_v41, %v963_v39  ;;  %v894_v45 = vadd.f32 %v893_v40, %v831_v35  ;;  %v978_v39 = vmul.f32 %v845_v37, %v845_v37  ;;  %v979_v41 = vmul.f32 %v846_v29, %v846_v29 }
 0x15d   :  { %v895_v47 = vadd.f32 %v894_v45, %v832_v42  ;;  %v1027_v50 = vadd.f32 %v1026_v44, %v964_v43  ;;  %v980_v44 = vmul.f32 %v847_v32, %v847_v32 }
 0x15f   :  { %v896_v52 = vadd.f32 %v895_v47, %v833_v4  ;;  %v1028_v53 = vadd.f32 %v1027_v50, %v965_v48 }
 0x161   :  { %v897_v55 = vadd.f32 %v896_v52, %v834_v46  ;;  %v1029_v56 = vadd.f32 %v1028_v53, %v966_v51 }
 0x163   :  { %v1030_v58 = vadd.f32 %v1029_v56, %v967_v54  ;;  %v898_v59 = vadd.f32 %v897_v55, %v835_v1 }
 0x165   :  { %v899_v61 = vadd.f32 %v898_v59, %v836_v57  ;;  %v1031_v0 = vadd.f32 %v1030_v58, %v968_v49 }
 0x167   :  { %v900_v2 = vadd.f32 %v899_v61, %v837_v34  ;;  %v1032_v7 = vadd.f32 %v1031_v0, %v969_v62 }
 0x169   :  { %v901_v9 = vadd.f32 %v900_v2, %v838_v60  ;;  %v1033_v11 = vadd.f32 %v1032_v7, %v970_v6 }
 0x16b   :  { %v1034_v15 = vadd.f32 %v1033_v11, %v971_v12  ;;  %v902_v10 = vadd.f32 %v901_v9, %v839_v31 }
 0x16d   :  { %v903_v17 = vadd.f32 %v902_v10, %v840_v13  ;;  %v1035_v19 = vadd.f32 %v1034_v15, %v972_v14 }
 0x16f   :  { %v904_v20 = vadd.f32 %v903_v17, %v841_v3  ;;  %v1036_v22 = vadd.f32 %v1035_v19, %v973_v18 }
 0x171   :  { %v905_v24 = vadd.f32 %v904_v20, %v842_v16  ;;  %v1037_v38 = vadd.f32 %v1036_v22, %v974_v21 }
 0x173   :  { %v1038_v27 = vadd.f32 %v1037_v38, %v975_v23  ;;  %v906_v28 = vadd.f32 %v905_v24, %v843_v63 }
 0x175   :  { %v907_v35 = vadd.f32 %v906_v28, %v844_v25  ;;  %v1039_v33 = vadd.f32 %v1038_v27, %v976_v26 }
 0x177   :  { %v908_v36 = vadd.f32 %v907_v35, %v845_v37  ;;  %v1040_v40 = vadd.f32 %v1039_v33, %v977_v30 }
 0x179   :  { %v909_v42 = vadd.f32 %v908_v36, %v846_v29  ;;  %v1041_v43 = vadd.f32 %v1040_v40, %v978_v39 }
 0x17b   :  { %v910_v4 = vadd.f32 %v909_v42, %v847_v32  ;;  %v1042_v45 = vadd.f32 %v1041_v43, %v979_v41 }
 0x17d   :  { %v911_v46 = vrot.slane %v910_v4, 4  ;;  %v1043_v47 = vadd.f32 %v1042_v45, %v980_v44 }
 0x17f   :  { %v912_v8 = vadd.f32 %v911_v46, %v910_v4  ;;  %v1044_v48 = vrot.slane %v1043_v47, 4 }
 0x181   :  { %v913_v50 = vrot.slane %v912_v8, 2  ;;  %v1045_v1 = vadd.f32 %v1044_v48, %v1043_v47 }
 0x183   :  { %v914_v52 = vadd.f32 %v913_v50, %v912_v8  ;;  %v1046_v51 = vrot.slane %v1045_v1, 2 }
 0x185   :  { %v915_v53 = vrot.slane %v914_v52, 1  ;;  %v1047_v54 = vadd.f32 %v1046_v51, %v1045_v1 }
 0x187   :  { %v916_v5 = vadd.f32 %v915_v53, %v914_v52  ;;  %v1048_v55 = vrot.slane %v1047_v54, 1 }
 0x189   :  { %v1049_v56 = vadd.f32 %v1048_v55, %v1047_v54  ;;  %1050 = vst [vmem:[%s1961_s3] sm:$0xff] %v916_v5 }
 0x18b   :  { %1051 = vst [vmem:[%s1962_s4] sm:$0xff] %v1049_v56 }

// kernel: bottleneck_forward.7
= control target key start
LH: loop header
LB: loop body
LE: loop exit
PB: predicated region body
PF: predicated region fallthrough
CT: control target
= control target key end

     0   :  { %s2155_s0 = inlined_call_operand.vmem [shape: bf16[512,128], index: 0, kind: input, shape index: {}]   ;;  %s2156_s1 = inlined_call_operand.vmem [shape: f32[512,128], index: 1, kind: input, shape index: {}]   ;;  %s2157_s2 = inlined_call_operand.vmem [shape: bf16[128,128], index: 2, kind: input, shape index: {}]   ;;  %s2158_s3 = inlined_call_operand.vmem [shape: f32[1,128], index: 3, kind: input, shape index: {}]   ;;  %s2159_s4 = inlined_call_operand.vmem [shape: f32[1,128], index: 4, kind: input, shape index: {}]   ;;  %s2160_s5 = inlined_call_operand.vmem [shape: f32[1,128], index: 5, kind: input, shape index: {}]   ;;  %s2161_s6 = inlined_call_operand.vmem [shape: f32[1,128], index: 6, kind: input, shape index: {}]   ;;  %s2162_s7 = inlined_call_operand.hbm [shape: f32[512,128], index: 7, kind: output, shape index: {}]  }
   0x1   :  { %v1471_v0 = vld [vmem:[%s2157_s2] sm:$0xff]   ;;  %v1472_v1 = vld [vmem:[%s2157_s2 + $0x8] sm:$0xff]   ;;  %v1473_v2 = vld [vmem:[%s2157_s2 + $0x10] sm:$0xff]  }
   0x2   :  { %1372 = vmatprep.subr.bf16.mxu0 %v1471_v0  ;;  %1452 = vmatprep.subr.bf16.mxu1 %v1471_v0  ;;  %v1474_v3 = vld [vmem:[%s2157_s2 + $0x18] sm:$0xff]   ;;  %v1174_v4 = vld [vmem:[%s2155_s0] sm:$0xff]   ;;  %v1301_v9 = vld [vmem:[%s2155_s0 + $0x8] sm:$0xff]  }
   0x3   :  { %1373 = vmatpush3.bf16.msra.mxu0 %v1471_v0  ;;  %1460 = vmatpush3.bf16.msra.mxu1 %v1471_v0  ;;  %v1564_v5 = vld [vmem:[%s2158_s3] ss:$0 sm:$0xff]  ;;  %v1175_v6 = vunpack.c.l.bf16 %v1174_v4  ;;  %v1176_v7 = vunpack.c.h.bf16 %v1174_v4  ;;  %v1317_v10 = vld [vmem:[%s2155_s0 + $0x88] sm:$0xff]   ;;  %v1179_v14 = vunpack.c.l.bf16 %v1301_v9  ;;  %v1180_v15 = vunpack.c.h.bf16 %v1301_v9  ;;  %v1302_v16 = vld [vmem:[%s2155_s0 + $0x10] sm:$0xff]  }
   0x4   :  { %1374 = vmatprep.subr.bf16.mxu0 %v1472_v1  ;;  %1453 = vmatprep.subr.bf16.mxu1 %v1472_v1  ;;  %v1316_v8 = vld [vmem:[%s2155_s0 + $0x80] sm:$0xff]   ;;  %v1243_v19 = vunpack.c.l.bf16 %v1317_v10  ;;  %v1244_v20 = vunpack.c.h.bf16 %v1317_v10  ;;  %v1183_v25 = vunpack.c.l.bf16 %v1302_v16  ;;  %v1318_v38 = vld [vmem:[%s2155_s0 + $0x90] sm:$0xff]   ;;  %v1476_v39 = vld [vmem:[%s2157_s2 + $0x28] sm:$0xff]   ;;  %v1184_v48 = vunpack.c.h.bf16 %v1302_v16 }
   0x5   :  { %v1578_v11 = vld [vmem:[%s2159_s4] ss:$0 sm:$0xff]  ;;  %v1239_v12 = vunpack.c.l.bf16 %v1316_v8  ;;  %v1240_v13 = vunpack.c.h.bf16 %v1316_v8  ;;  %v163_v17 = vmul.f32 %v1175_v6, %v1564_v5  ;;  %v164_v18 = vmul.f32 %v1176_v7, %v1564_v5  ;;  %v1303_v44 = vld [vmem:[%s2155_s0 + $0x18] sm:$0xff]  }
   0x6   :  { %v1475_v21 = vld [vmem:[%s2157_s2 + $0x20] sm:$0xff]   ;;  %v165_v24 = vmul.f32 %v1179_v14, %v1564_v5  ;;  %v166_v28 = vmul.f32 %v1180_v15, %v1564_v5  ;;  %v197_v29 = vmul.f32 %v1243_v19, %v1564_v5  ;;  %v198_v33 = vmul.f32 %v1244_v20, %v1564_v5  ;;  %v1319_v53 = vld [vmem:[%s2155_s0 + $0x98] sm:$0xff]  }
   0x7   :  { %1375 = vmatpush3.bf16.msra.mxu0 %v1472_v1  ;;  %1461 = vmatpush3.bf16.msra.mxu1 %v1472_v1  ;;  %v195_v22 = vmul.f32 %v1239_v12, %v1564_v5  ;;  %v196_v23 = vmul.f32 %v1240_v13, %v1564_v5  ;;  %v234_v26 = vadd.f32 %v1578_v11, %v163_v17  ;;  %v1247_v52 = vunpack.c.l.bf16 %v1318_v38 }
   0x8   :  { %1376 = vmatprep.subr.bf16.mxu0 %v1473_v2  ;;  %1454 = vmatprep.subr.bf16.mxu1 %v1473_v2  ;;  %v235_v27 = vadd.f32 %v1578_v11, %v164_v18  ;;  %v236_v32 = vadd.f32 %v1578_v11, %v165_v24  ;;  %v237_v36 = vadd.f32 %v1578_v11, %v166_v28  ;;  %v1248_v56 = vunpack.c.h.bf16 %v1318_v38 }
   0x9   :  { %v266_v30 = vadd.f32 %v1578_v11, %v195_v22  ;;  %v267_v31 = vadd.f32 %v1578_v11, %v196_v23  ;;  %v298_v34 = vmax.f32 %v234_v26, 0.0  ;;  %v268_v37 = vadd.f32 %v1578_v11, %v197_v29 }
   0xa   :  { %v299_v35 = vmax.f32 %v235_v27, 0.0  ;;  %v300_v42 = vmax.f32 %v236_v32, 0.0  ;;  %v269_v43 = vadd.f32 %v1578_v11, %v198_v33  ;;  %v301_v46 = vmax.f32 %v237_v36, 0.0 }
   0xb   :  { %1377 = vmatpush3.bf16.msra.mxu0 %v1473_v2  ;;  %1462 = vmatpush3.bf16.msra.mxu1 %v1473_v2  ;;  %v330_v40 = vmax.f32 %v266_v30, 0.0  ;;  %v331_v41 = vmax.f32 %v267_v31, 0.0  ;;  %v332_v47 = vmax.f32 %v268_v37, 0.0  ;;  %v167_v51 = vmul.f32 %v1183_v25, %v1564_v5 }
   0xc   :  { %1378 = vmatprep.subr.bf16.mxu0 %v1474_v3  ;;  %1455 = vmatprep.subr.bf16.mxu1 %v1474_v3  ;;  %v362_v45 = vpack.c.bf16 %v299_v35, %v298_v34  ;;  %v333_v50 = vmax.f32 %v269_v43, 0.0  ;;  %v1615_v54 = vpack.c.bf16 %v301_v46, %v300_v42  ;;  %v168_v55 = vmul.f32 %v1184_v48, %v1564_v5 }
   0xd   :  { %v378_v49 = vpack.c.bf16 %v331_v41, %v330_v40  ;;  %v1187_v57 = vunpack.c.l.bf16 %v1303_v44 }
   0xf   :  { %1379 = vmatpush3.bf16.msra.mxu0 %v1474_v3  ;;  %1463 = vmatpush3.bf16.msra.mxu1 %v1474_v3 }
  0x10   :  { %1380 = vmatprep.subr.bf16.mxu0 %v1475_v21  ;;  %1456 = vmatprep.subr.bf16.mxu1 %v1475_v21 }
  0x13   :  { %1381 = vmatpush3.bf16.msra.mxu0 %v1475_v21  ;;  %1464 = vmatpush3.bf16.msra.mxu1 %v1475_v21 }
  0x14   :  { %12 = vsyncpa [#allocation3], 0  ;;  %1382 = vmatprep.subr.bf16.mxu0 %v1476_v39  ;;  %1457 = vmatprep.subr.bf16.mxu1 %v1476_v39  ;;  %v1477_v58 = vld [vmem:[%s2157_s2 + $0x30] sm:$0xff]   ;;  %v1621_v59 = vpack.c.bf16 %v333_v50, %v332_v47  ;;  %v238_v60 = vadd.f32 %v1578_v11, %v167_v51  ;;  %v199_v61 = vmul.f32 %v1247_v52, %v1564_v5  ;;  %v1188_v62 = vunpack.c.h.bf16 %v1303_v44  ;;  %v1304_v3 = vld [vmem:[%s2155_s0 + $0x20] sm:$0xff]   ;;  %s1503_s20 = smov [#allocation2]  }
  0x15   :  { %1388 = vmatprep.mubr.bf16.mxu0 %v362_v45  ;;  %1420 = vmatprep.mubr.bf16.mxu1 %v378_v49  ;;  %v239_v63 = vadd.f32 %v1578_v11, %v168_v55  ;;  %v200_v0 = vmul.f32 %v1248_v56, %v1564_v5  ;;  %v169_v1 = vmul.f32 %v1187_v57, %v1564_v5  ;;  %v1251_v2 = vunpack.c.l.bf16 %v1319_v53  ;;  %v1478_v14 = vld [vmem:[%s2157_s2 + $0x38] sm:$0xff]   ;;  %v1320_v19 = vld [vmem:[%s2155_s0 + $0xa0] sm:$0xff]   ;;  %v1305_v28 = vld [vmem:[%s2155_s0 + $0x28] sm:$0xff]   ;;  %s1150_s3 = sshll.u32 %s1503_s20, 4  ;;  %s1151_s3 = int_to_ptr.vmem [resolvable:$true] %s1150_s3 }
  0x16   :  { %v302_v4 = vmax.f32 %v238_v60, 0.0  ;;  %v270_v6 = vadd.f32 %v1578_v11, %v199_v61  ;;  %v170_v7 = vmul.f32 %v1188_v62, %v1564_v5  ;;  %v1252_v8 = vunpack.c.h.bf16 %v1319_v53  ;;  %v1321_v33 = vld [vmem:[%s2155_s0 + $0xa8] sm:$0xff]   ;;  %v1306_v42 = vld [vmem:[%s2155_s0 + $0x30] sm:$0xff]   ;;  %p1484_p1 = scmp.lt.s32.totalorder %s1151_s3, %s1151_s3 }
  0x17   :  { %1383 = vmatpush3.bf16.msra.mxu0 %v1476_v39  ;;  %1465 = vmatpush3.bf16.msra.mxu1 %v1476_v39  ;;  %v303_v9 = vmax.f32 %v239_v63, 0.0  ;;  %v271_v10 = vadd.f32 %v1578_v11, %v200_v0  ;;  %v240_v12 = vadd.f32 %v1578_v11, %v169_v1  ;;  %v201_v13 = vmul.f32 %v1251_v2, %v1564_v5  ;;  %v1322_v61 = vld [vmem:[%s2155_s0 + $0xb0] sm:$0xff]   ;;  %v1307_v2 = vld [vmem:[%s2155_s0 + $0x38] sm:$0xff]  }
  0x18   :  { %1384 = vmatprep.subr.bf16.mxu0 %v1477_v58  ;;  %1458 = vmatprep.subr.bf16.mxu1 %v1477_v58  ;;  %v334_v15 = vmax.f32 %v270_v6, 0.0  ;;  %v241_v16 = vadd.f32 %v1578_v11, %v170_v7  ;;  %v202_v17 = vmul.f32 %v1252_v8, %v1564_v5  ;;  %v1191_v18 = vunpack.c.l.bf16 %v1304_v3 }
  0x19   :  { %v364_v20 = vpack.c.bf16 %v303_v9, %v302_v4  ;;  %v335_v21 = vmax.f32 %v271_v10, 0.0  ;;  %v304_v22 = vmax.f32 %v240_v12, 0.0  ;;  %v272_v23 = vadd.f32 %v1578_v11, %v201_v13 }
  0x1a   :  { %v305_v24 = vmax.f32 %v241_v16, 0.0  ;;  %v273_v25 = vadd.f32 %v1578_v11, %v202_v17  ;;  %v1192_v26 = vunpack.c.h.bf16 %v1304_v3  ;;  %v171_v27 = vmul.f32 %v1191_v18, %v1564_v5 }
  0x1b   :  { %1385 = vmatpush3.bf16.msra.mxu0 %v1477_v58  ;;  %1466 = vmatpush3.bf16.msra.mxu1 %v1477_v58  ;;  %v380_v29 = vpack.c.bf16 %v335_v21, %v334_v15  ;;  %v336_v30 = vmax.f32 %v272_v23, 0.0  ;;  %v1255_v31 = vunpack.c.l.bf16 %v1320_v19  ;;  %v1256_v32 = vunpack.c.h.bf16 %v1320_v19  ;;  %v1323_v15 = vld [vmem:[%s2155_s0 + $0xb8] sm:$0xff]  }
  0x1c   :  { %1386 = vmatprep.subr.bf16.mxu0 %v1478_v14  ;;  %1459 = vmatprep.subr.bf16.mxu1 %v1478_v14  ;;  %v1653_v34 = vpack.c.bf16 %v305_v24, %v304_v22  ;;  %v337_v35 = vmax.f32 %v273_v25, 0.0  ;;  %v172_v36 = vmul.f32 %v1192_v26, %v1564_v5  ;;  %v242_v37 = vadd.f32 %v1578_v11, %v171_v27 }
  0x1d   :  { %v203_v38 = vmul.f32 %v1255_v31, %v1564_v5  ;;  %v204_v39 = vmul.f32 %v1256_v32, %v1564_v5  ;;  %v1195_v40 = vunpack.c.l.bf16 %v1305_v28  ;;  %v1196_v41 = vunpack.c.h.bf16 %v1305_v28 }
  0x1e   :  { %v381_v43 = vpack.c.bf16 %v337_v35, %v336_v30  ;;  %v243_v44 = vadd.f32 %v1578_v11, %v172_v36  ;;  %v306_v45 = vmax.f32 %v242_v37, 0.0  ;;  %v1259_v46 = vunpack.c.l.bf16 %v1321_v33 }
  0x1f   :  { %1387 = vmatpush3.bf16.msra.mxu0 %v1478_v14  ;;  %1467 = vmatpush3.bf16.msra.mxu1 %v1478_v14  ;;  %v274_v47 = vadd.f32 %v1578_v11, %v203_v38  ;;  %v275_v48 = vadd.f32 %v1578_v11, %v204_v39  ;;  %v173_v49 = vmul.f32 %v1195_v40, %v1564_v5  ;;  %v1260_v50 = vunpack.c.h.bf16 %v1321_v33  ;;  %v1324_v33 = vld [vmem:[%s2155_s0 + $0xc0] sm:$0xff]  }
  0x20   :  { %v307_v51 = vmax.f32 %v243_v44, 0.0  ;;  %v174_v52 = vmul.f32 %v1196_v41, %v1564_v5  ;;  %v205_v53 = vmul.f32 %v1259_v46, %v1564_v5  ;;  %v1199_v55 = vunpack.c.l.bf16 %v1306_v42 }
  0x21   :  { %v338_v56 = vmax.f32 %v274_v47, 0.0  ;;  %v339_v57 = vmax.f32 %v275_v48, 0.0  ;;  %v244_v58 = vadd.f32 %v1578_v11, %v173_v49  ;;  %v206_v60 = vmul.f32 %v1260_v50, %v1564_v5 }
  0x22   :  { %1389 = vmatmul.mubr.bf16.vlgmr.msra.gmra.mrb[0].mxu0 %v1615_v54  ;;  %1421 = vmatmul.mubr.bf16.vlgmr.msra.gmra.mrb[0].mxu1 %v1621_v59  ;;  %v366_v62 = vpack.c.bf16 %v307_v51, %v306_v45  ;;  %v245_v63 = vadd.f32 %v1578_v11, %v174_v52  ;;  %v276_v0 = vadd.f32 %v1578_v11, %v205_v53  ;;  %v1200_v1 = vunpack.c.h.bf16 %v1306_v42  ;;  %v1325_v51 = vld [vmem:[%s2155_s0 + $0xc8] sm:$0xff]  }
  0x23   :  { %1392 = vmatprep.mubr.bf16.mxu0 %v364_v20  ;;  %1424 = vmatprep.mubr.bf16.mxu1 %v380_v29  ;;  %v382_v3 = vpack.c.bf16 %v339_v57, %v338_v56  ;;  %v308_v4 = vmax.f32 %v244_v58, 0.0  ;;  %v277_v6 = vadd.f32 %v1578_v11, %v206_v60  ;;  %v175_v54 = vmul.f32 %v1199_v55, %v1564_v5  ;;  %v1308_v20 = vld [vmem:[%s2155_s0 + $0x40] sm:$0xff]  }
  0x24   :  { %v309_v7 = vmax.f32 %v245_v63, 0.0  ;;  %v340_v59 = vmax.f32 %v276_v0, 0.0  ;;  %v176_v8 = vmul.f32 %v1200_v1, %v1564_v5  ;;  %v1263_v9 = vunpack.c.l.bf16 %v1322_v61 }
  0x25   :  { %v341_v10 = vmax.f32 %v277_v6, 0.0  ;;  %v246_v12 = vadd.f32 %v1578_v11, %v175_v54  ;;  %v1264_v13 = vunpack.c.h.bf16 %v1322_v61  ;;  %v1203_v14 = vunpack.c.l.bf16 %v1307_v2 }
  0x26   :  { %v367_v16 = vpack.c.bf16 %v309_v7, %v308_v4  ;;  %v247_v17 = vadd.f32 %v1578_v11, %v176_v8  ;;  %v207_v18 = vmul.f32 %v1263_v9, %v1564_v5  ;;  %v1204_v19 = vunpack.c.h.bf16 %v1307_v2  ;;  %v1310_v2 = vld [vmem:[%s2155_s0 + $0x50] sm:$0xff]  }
  0x27   :  { %v383_v21 = vpack.c.bf16 %v341_v10, %v340_v59  ;;  %v310_v22 = vmax.f32 %v246_v12, 0.0  ;;  %v208_v23 = vmul.f32 %v1264_v13, %v1564_v5  ;;  %v177_v24 = vmul.f32 %v1203_v14, %v1564_v5  ;;  %v1326_v10 = vld [vmem:[%s2155_s0 + $0xd0] sm:$0xff]  }
  0x28   :  { %v311_v25 = vmax.f32 %v247_v17, 0.0  ;;  %v278_v26 = vadd.f32 %v1578_v11, %v207_v18  ;;  %v178_v27 = vmul.f32 %v1204_v19, %v1564_v5  ;;  %v1267_v28 = vunpack.c.l.bf16 %v1323_v15 }
  0x29   :  { %v279_v29 = vadd.f32 %v1578_v11, %v208_v23  ;;  %v248_v30 = vadd.f32 %v1578_v11, %v177_v24  ;;  %v1268_v31 = vunpack.c.h.bf16 %v1323_v15  ;;  %v1207_v32 = vunpack.c.l.bf16 %v1308_v20 }
  0x2a   :  { %1393 = vmatmul.mubr.bf16.gmra.mrb[4].mxu0 %v1653_v34  ;;  %1425 = vmatmul.mubr.bf16.gmra.mrb[4].mxu1 %v381_v43  ;;  %v368_v35 = vpack.c.bf16 %v311_v25, %v310_v22  ;;  %v342_v36 = vmax.f32 %v278_v26, 0.0  ;;  %v249_v37 = vadd.f32 %v1578_v11, %v178_v27  ;;  %v209_v38 = vmul.f32 %v1267_v28, %v1564_v5  ;;  %v1309_v43 = vld [vmem:[%s2155_s0 + $0x48] sm:$0xff]  }
  0x2b   :  { %1396 = vmatprep.mubr.bf16.mxu0 %v366_v62  ;;  %1428 = vmatprep.mubr.bf16.mxu1 %v382_v3  ;;  %v343_v39 = vmax.f32 %v279_v29, 0.0  ;;  %v312_v40 = vmax.f32 %v248_v30, 0.0  ;;  %v210_v41 = vmul.f32 %v1268_v31, %v1564_v5  ;;  %v1208_v42 = vunpack.c.h.bf16 %v1308_v20  ;;  %v1311_v20 = vld [vmem:[%s2155_s0 + $0x58] sm:$0xff]  }
  0x2c   :  { %v313_v44 = vmax.f32 %v249_v37, 0.0  ;;  %v280_v45 = vadd.f32 %v1578_v11, %v209_v38  ;;  %v179_v46 = vmul.f32 %v1207_v32, %v1564_v5  ;;  %v1271_v34 = vunpack.c.l.bf16 %v1324_v33 }
  0x2d   :  { %v384_v47 = vpack.c.bf16 %v343_v39, %v342_v36  ;;  %v281_v48 = vadd.f32 %v1578_v11, %v210_v41  ;;  %v180_v49 = vmul.f32 %v1208_v42, %v1564_v5  ;;  %v1272_v50 = vunpack.c.h.bf16 %v1324_v33  ;;  %v1327_v33 = vld [vmem:[%s2155_s0 + $0xd8] sm:$0xff]  }
  0x2e   :  { %v369_v52 = vpack.c.bf16 %v313_v44, %v312_v40  ;;  %v344_v53 = vmax.f32 %v280_v45, 0.0  ;;  %v250_v55 = vadd.f32 %v1578_v11, %v179_v46  ;;  %v211_v56 = vmul.f32 %v1271_v34, %v1564_v5  ;;  %v1312_v44 = vld [vmem:[%s2155_s0 + $0x60] sm:$0xff]  }
  0x2f   :  { %v345_v57 = vmax.f32 %v281_v48, 0.0  ;;  %v251_v58 = vadd.f32 %v1578_v11, %v180_v49  ;;  %v212_v60 = vmul.f32 %v1272_v50, %v1564_v5  ;;  %v1211_v61 = vunpack.c.l.bf16 %v1309_v43 }
  0x30   :  { %v314_v62 = vmax.f32 %v250_v55, 0.0  ;;  %v282_v63 = vadd.f32 %v1578_v11, %v211_v56  ;;  %v1212_v0 = vunpack.c.h.bf16 %v1309_v43  ;;  %v1275_v1 = vunpack.c.l.bf16 %v1325_v51 }
  0x31   :  { %v385_v3 = vpack.c.bf16 %v345_v57, %v344_v53  ;;  %v315_v4 = vmax.f32 %v251_v58, 0.0  ;;  %v283_v6 = vadd.f32 %v1578_v11, %v212_v60  ;;  %v181_v54 = vmul.f32 %v1211_v61, %v1564_v5 }
  0x32   :  { %1397 = vmatmul.mubr.bf16.gmra.mrb[8].mxu0 %v367_v16  ;;  %1429 = vmatmul.mubr.bf16.gmra.mrb[8].mxu1 %v383_v21  ;;  %v346_v7 = vmax.f32 %v282_v63, 0.0  ;;  %v182_v59 = vmul.f32 %v1212_v0, %v1564_v5  ;;  %v1276_v8 = vunpack.c.h.bf16 %v1325_v51  ;;  %v213_v9 = vmul.f32 %v1275_v1, %v1564_v5  ;;  %v1328_v51 = vld [vmem:[%s2155_s0 + $0xe0] sm:$0xff]  }
  0x33   :  { %1400 = vmatprep.mubr.bf16.mxu0 %v368_v35  ;;  %1432 = vmatprep.mubr.bf16.mxu1 %v384_v47  ;;  %v370_v12 = vpack.c.bf16 %v315_v4, %v314_v62  ;;  %v347_v13 = vmax.f32 %v283_v6, 0.0  ;;  %v252_v14 = vadd.f32 %v1578_v11, %v181_v54  ;;  %v1215_v15 = vunpack.c.l.bf16 %v1310_v2 }
  0x34   :  { %v253_v16 = vadd.f32 %v1578_v11, %v182_v59  ;;  %v214_v17 = vmul.f32 %v1276_v8, %v1564_v5  ;;  %v284_v18 = vadd.f32 %v1578_v11, %v213_v9  ;;  %v1216_v19 = vunpack.c.h.bf16 %v1310_v2  ;;  %v1313_v2 = vld [vmem:[%s2155_s0 + $0x68] sm:$0xff]  }
  0x35   :  { %v386_v21 = vpack.c.bf16 %v347_v13, %v346_v7  ;;  %v316_v22 = vmax.f32 %v252_v14, 0.0  ;;  %v183_v23 = vmul.f32 %v1215_v15, %v1564_v5  ;;  %v1279_v24 = vunpack.c.l.bf16 %v1326_v10  ;;  %v1329_v7 = vld [vmem:[%s2155_s0 + $0xe8] sm:$0xff]  }
  0x36   :  { %v317_v25 = vmax.f32 %v253_v16, 0.0  ;;  %v285_v26 = vadd.f32 %v1578_v11, %v214_v17  ;;  %v348_v27 = vmax.f32 %v284_v18, 0.0  ;;  %v184_v28 = vmul.f32 %v1216_v19, %v1564_v5  ;;  %v1314_v19 = vld [vmem:[%s2155_s0 + $0x70] sm:$0xff]  }
  0x37   :  { %v254_v29 = vadd.f32 %v1578_v11, %v183_v23  ;;  %v1280_v30 = vunpack.c.h.bf16 %v1326_v10  ;;  %v215_v31 = vmul.f32 %v1279_v24, %v1564_v5  ;;  %v1219_v32 = vunpack.c.l.bf16 %v1311_v20 }
  0x38   :  { %v371_v35 = vpack.c.bf16 %v317_v25, %v316_v22  ;;  %v349_v36 = vmax.f32 %v285_v26, 0.0  ;;  %v255_v37 = vadd.f32 %v1578_v11, %v184_v28  ;;  %v1220_v38 = vunpack.c.h.bf16 %v1311_v20  ;;  %v1330_v28 = vld [vmem:[%s2155_s0 + $0xf0] sm:$0xff]  }
  0x39   :  { %v318_v39 = vmax.f32 %v254_v29, 0.0  ;;  %v216_v40 = vmul.f32 %v1280_v30, %v1564_v5  ;;  %v286_v41 = vadd.f32 %v1578_v11, %v215_v31  ;;  %v185_v42 = vmul.f32 %v1219_v32, %v1564_v5 }
  0x3a   :  { %1401 = vmatmul.mubr.bf16.gmra.mrb[12].mxu0 %v369_v52  ;;  %1433 = vmatmul.mubr.bf16.gmra.mrb[12].mxu1 %v385_v3  ;;  %v387_v45 = vpack.c.bf16 %v349_v36, %v348_v27  ;;  %v319_v46 = vmax.f32 %v255_v37, 0.0  ;;  %v186_v34 = vmul.f32 %v1220_v38, %v1564_v5  ;;  %v1283_v43 = vunpack.c.l.bf16 %v1327_v33  ;;  %v1315_v38 = vld [vmem:[%s2155_s0 + $0x78] sm:$0xff]  }
  0x3b   :  { %1404 = vmatprep.mubr.bf16.mxu0 %v370_v12  ;;  %1436 = vmatprep.mubr.bf16.mxu1 %v386_v21  ;;  %v287_v47 = vadd.f32 %v1578_v11, %v216_v40  ;;  %v350_v48 = vmax.f32 %v286_v41, 0.0  ;;  %v256_v49 = vadd.f32 %v1578_v11, %v185_v42  ;;  %v1284_v50 = vunpack.c.h.bf16 %v1327_v33 }
  0x3c   :  { %v372_v53 = vpack.c.bf16 %v319_v46, %v318_v39  ;;  %v257_v52 = vadd.f32 %v1578_v11, %v186_v34  ;;  %v217_v55 = vmul.f32 %v1283_v43, %v1564_v5  ;;  %v1223_v56 = vunpack.c.l.bf16 %v1312_v44 }
  0x3d   :  { %v351_v57 = vmax.f32 %v287_v47, 0.0  ;;  %v320_v58 = vmax.f32 %v256_v49, 0.0  ;;  %v218_v60 = vmul.f32 %v1284_v50, %v1564_v5  ;;  %v1224_v61 = vunpack.c.h.bf16 %v1312_v44  ;;  %v1331_v50 = vld [vmem:[%s2155_s0 + $0xf8] sm:$0xff]  }
  0x3e   :  { %v321_v62 = vmax.f32 %v257_v52, 0.0  ;;  %v288_v63 = vadd.f32 %v1578_v11, %v217_v55  ;;  %v187_v0 = vmul.f32 %v1223_v56, %v1564_v5  ;;  %v1287_v1 = vunpack.c.l.bf16 %v1328_v51 }
  0x3f   :  { %v388_v3 = vpack.c.bf16 %v351_v57, %v350_v48  ;;  %v289_v4 = vadd.f32 %v1578_v11, %v218_v60  ;;  %v188_v6 = vmul.f32 %v1224_v61, %v1564_v5  ;;  %v1288_v54 = vunpack.c.h.bf16 %v1328_v51 }
  0x40   :  { %v352_v59 = vmax.f32 %v288_v63, 0.0  ;;  %v258_v8 = vadd.f32 %v1578_v11, %v187_v0  ;;  %v219_v9 = vmul.f32 %v1287_v1, %v1564_v5  ;;  %v1227_v14 = vunpack.c.l.bf16 %v1313_v2 }
  0x41   :  { %v353_v10 = vmax.f32 %v289_v4, 0.0  ;;  %v259_v12 = vadd.f32 %v1578_v11, %v188_v6  ;;  %v220_v13 = vmul.f32 %v1288_v54, %v1564_v5  ;;  %v373_v15 = vpack.c.bf16 %v321_v62, %v320_v58 }
  0x42   :  { %1405 = vmatmul.mubr.bf16.gmra.mrb[16].mxu0 %v371_v35  ;;  %1437 = vmatmul.mubr.bf16.gmra.mrb[16].mxu1 %v387_v45  ;;  %v290_v16 = vadd.f32 %v1578_v11, %v219_v9  ;;  %v1228_v17 = vunpack.c.h.bf16 %v1313_v2  ;;  %v1291_v18 = vunpack.c.l.bf16 %v1329_v7  ;;  %v322_v20 = vmax.f32 %v258_v8, 0.0 }
  0x43   :  { %1408 = vmatprep.mubr.bf16.mxu0 %v372_v53  ;;  %1440 = vmatprep.mubr.bf16.mxu1 %v388_v3  ;;  %v323_v21 = vmax.f32 %v259_v12, 0.0  ;;  %v291_v22 = vadd.f32 %v1578_v11, %v220_v13  ;;  %v189_v23 = vmul.f32 %v1227_v14, %v1564_v5  ;;  %v1292_v26 = vunpack.c.h.bf16 %v1329_v7 }
  0x44   :  { %v354_v24 = vmax.f32 %v290_v16, 0.0  ;;  %v190_v25 = vmul.f32 %v1228_v17, %v1564_v5  ;;  %v221_v27 = vmul.f32 %v1291_v18, %v1564_v5  ;;  %v389_v29 = vpack.c.bf16 %v353_v10, %v352_v59 }
  0x45   :  { %v355_v30 = vmax.f32 %v291_v22, 0.0  ;;  %v260_v31 = vadd.f32 %v1578_v11, %v189_v23  ;;  %v1231_v32 = vunpack.c.l.bf16 %v1314_v19  ;;  %v222_v35 = vmul.f32 %v1292_v26, %v1564_v5  ;;  %v891_v26 = vld [vmem:[%s2156_s1 + $0x10] sm:$0xff] }
  0x46   :  { %v261_v33 = vadd.f32 %v1578_v11, %v190_v25  ;;  %v292_v36 = vadd.f32 %v1578_v11, %v221_v27  ;;  %v1232_v37 = vunpack.c.h.bf16 %v1314_v19  ;;  %v374_v39 = vpack.c.bf16 %v323_v21, %v322_v20  ;;  %v923_v27 = vld [vmem:[%s2156_s1 + $0x110] sm:$0xff] }
  0x47   :  { %v390_v40 = vpack.c.bf16 %v355_v30, %v354_v24  ;;  %v191_v41 = vmul.f32 %v1231_v32, %v1564_v5  ;;  %v1295_v42 = vunpack.c.l.bf16 %v1330_v28  ;;  %v324_v44 = vmax.f32 %v260_v31, 0.0 }
  0x48   :  { %v325_v45 = vmax.f32 %v261_v33, 0.0  ;;  %v293_v46 = vadd.f32 %v1578_v11, %v222_v35  ;;  %v192_v34 = vmul.f32 %v1232_v37, %v1564_v5  ;;  %v1296_v47 = vunpack.c.h.bf16 %v1330_v28  ;;  %v889_v35 = vld [vmem:[%s2156_s1] sm:$0xff] }
  0x49   :  { %v262_v43 = vadd.f32 %v1578_v11, %v191_v41  ;;  %v223_v48 = vmul.f32 %v1295_v42, %v1564_v5  ;;  %v1235_v49 = vunpack.c.l.bf16 %v1315_v38  ;;  %v356_v51 = vmax.f32 %v292_v36, 0.0  ;;  %v921_v36 = vld [vmem:[%s2156_s1 + $0x100] sm:$0xff] }
  0x4a   :  { %1409 = vmatmul.mubr.bf16.gmra.mrb[20].mxu0 %v373_v15  ;;  %1441 = vmatmul.mubr.bf16.gmra.mrb[20].mxu1 %v389_v29  ;;  %v357_v53 = vmax.f32 %v293_v46, 0.0  ;;  %v263_v52 = vadd.f32 %v1578_v11, %v192_v34  ;;  %v1236_v55 = vunpack.c.h.bf16 %v1315_v38  ;;  %v224_v57 = vmul.f32 %v1296_v47, %v1564_v5 }
  0x4b   :  { %1412 = vmatprep.mubr.bf16.mxu0 %v374_v39  ;;  %1444 = vmatprep.mubr.bf16.mxu1 %v390_v40  ;;  %v326_v56 = vmax.f32 %v262_v43, 0.0  ;;  %v294_v58 = vadd.f32 %v1578_v11, %v223_v48  ;;  %v193_v60 = vmul.f32 %v1235_v49, %v1564_v5  ;;  %v1299_v63 = vunpack.c.l.bf16 %v1331_v50 }
  0x4c   :  { %v327_v61 = vmax.f32 %v263_v52, 0.0  ;;  %v194_v62 = vmul.f32 %v1236_v55, %v1564_v5  ;;  %v375_v0 = vpack.c.bf16 %v325_v45, %v324_v44  ;;  %v295_v1 = vadd.f32 %v1578_v11, %v224_v57  ;;  %v892_v44 = vld [vmem:[%s2156_s1 + $0x18] sm:$0xff] }
  0x4d   :  { %v358_v2 = vmax.f32 %v294_v58, 0.0  ;;  %v1300_v3 = vunpack.c.h.bf16 %v1331_v50  ;;  %v391_v4 = vpack.c.bf16 %v357_v53, %v356_v51  ;;  %v264_v6 = vadd.f32 %v1578_v11, %v193_v60  ;;  %v924_v45 = vld [vmem:[%s2156_s1 + $0x118] sm:$0xff]  ;;  %v890_v50 = vld [vmem:[%s2156_s1 + $0x8] sm:$0xff] }
  0x4e   :  { %v265_v54 = vadd.f32 %v1578_v11, %v194_v62  ;;  %v225_v7 = vmul.f32 %v1299_v63, %v1564_v5  ;;  %v376_v59 = vpack.c.bf16 %v327_v61, %v326_v56  ;;  %v359_v8 = vmax.f32 %v295_v1, 0.0  ;;  %v922_v51 = vld [vmem:[%s2156_s1 + $0x108] sm:$0xff] }
  0x4f   :  { %v226_v9 = vmul.f32 %v1300_v3, %v1564_v5  ;;  %v328_v14 = vmax.f32 %v264_v6, 0.0  ;;  %v1816_v5 = vld [vmem:[%s2160_s5] ss:$0 sm:$0xff] }
  0x50   :  { %v296_v10 = vadd.f32 %v1578_v11, %v225_v7  ;;  %v392_v12 = vpack.c.bf16 %v359_v8, %v358_v2  ;;  %v329_v15 = vmax.f32 %v265_v54, 0.0 }
  0x51   :  { %v297_v13 = vadd.f32 %v1578_v11, %v226_v9  ;;  %v1821_v11 = vld [vmem:[%s2161_s6] ss:$0 sm:$0xff] }
  0x52   :  { %1413 = vmatmul.mubr.bf16.gmra.mrb[24].mxu0 %v375_v0  ;;  %1445 = vmatmul.mubr.bf16.gmra.mrb[24].mxu1 %v391_v4  ;;  %v360_v16 = vmax.f32 %v296_v10, 0.0  ;;  %v377_v18 = vpack.c.bf16 %v329_v15, %v328_v14 }
  0x53   :  { %1416 = vmatprep.mubr.bf16.mxu0 %v376_v59  ;;  %1448 = vmatprep.mubr.bf16.mxu1 %v392_v12  ;;  %v361_v17 = vmax.f32 %v297_v13, 0.0  ;;  %v895_v12 = vld [vmem:[%s2156_s1 + $0x30] sm:$0xff] }
  0x54   :  { %v927_v13 = vld [vmem:[%s2156_s1 + $0x130] sm:$0xff] }
  0x55   :  { %v393_v19 = vpack.c.bf16 %v361_v17, %v360_v16 }
  0x5a   :  { %1417 = vmatmul.mubr.bf16.gmra.mrb[28].mxu0 %v377_v18  ;;  %1449 = vmatmul.mubr.bf16.gmra.mrb[28].mxu1 %v393_v19 }
  0xf5   :  { %v1390_v20 = vpop.f32.mrb[0].mxu0  ;;  %v1422_v21 = vpop.f32.mrb[0].mxu1 }
  0xf6   :  { %v756_v22 = vmul.f32 %v1390_v20, %v1816_v5  ;;  %v788_v23 = vmul.f32 %v1422_v21, %v1816_v5  ;;  %v492_v24 = vpop.f32.mrb[1].mxu0  ;;  %v620_v25 = vpop.f32.mrb[1].mxu1  ;;  %v893_v20 = vld [vmem:[%s2156_s1 + $0x20] sm:$0xff] }
  0xf7   :  { %v754_v28 = vmul.f32 %v1816_v5, %v492_v24  ;;  %v786_v29 = vmul.f32 %v1816_v5, %v620_v25  ;;  %v1391_v30 = vpop.f32.mrb[2].mxu0  ;;  %v1423_v31 = vpop.f32.mrb[2].mxu1  ;;  %v925_v21 = vld [vmem:[%s2156_s1 + $0x120] sm:$0xff] }
  0xf8   :  { %v827_v32 = vadd.f32 %v1821_v11, %v756_v22  ;;  %v859_v33 = vadd.f32 %v1821_v11, %v788_v23  ;;  %v757_v37 = vmul.f32 %v1391_v30, %v1816_v5  ;;  %v789_v38 = vmul.f32 %v1423_v31, %v1816_v5  ;;  %v495_v39 = vpop.f32.mrb[3].mxu0  ;;  %v623_v40 = vpop.f32.mrb[3].mxu1 }
  0xf9   :  { %v825_v41 = vadd.f32 %v1821_v11, %v754_v28  ;;  %v857_v42 = vadd.f32 %v1821_v11, %v786_v29  ;;  %v755_v46 = vmul.f32 %v1816_v5, %v495_v39  ;;  %v787_v34 = vmul.f32 %v1816_v5, %v623_v40  ;;  %v896_v28 = vld [vmem:[%s2156_s1 + $0x38] sm:$0xff] }
  0xfa   :  { %v955_v43 = vadd.f32 %v891_v26, %v827_v32  ;;  %v987_v47 = vadd.f32 %v923_v27, %v859_v33  ;;  %v828_v48 = vadd.f32 %v1821_v11, %v757_v37  ;;  %v860_v49 = vadd.f32 %v1821_v11, %v789_v38  ;;  %v928_v29 = vld [vmem:[%s2156_s1 + $0x138] sm:$0xff]  ;;  %v894_v37 = vld [vmem:[%s2156_s1 + $0x28] sm:$0xff] }
  0xfb   :  { %v953_v53 = vadd.f32 %v889_v35, %v825_v41  ;;  %v985_v52 = vadd.f32 %v921_v36, %v857_v42  ;;  %v826_v55 = vadd.f32 %v1821_v11, %v755_v46  ;;  %v858_v56 = vadd.f32 %v1821_v11, %v787_v34  ;;  %v926_v38 = vld [vmem:[%s2156_s1 + $0x128] sm:$0xff] }
  0xfc   :  { %v1019_v57 = vmax.f32 %v955_v43, 0.0  ;;  %v1051_v58 = vmax.f32 %v987_v47, 0.0  ;;  %v956_v60 = vadd.f32 %v892_v44, %v828_v48  ;;  %v988_v61 = vadd.f32 %v924_v45, %v860_v49 }
  0xfd   :  { %v1017_v62 = vmax.f32 %v953_v53, 0.0  ;;  %v1049_v63 = vmax.f32 %v985_v52, 0.0  ;;  %v954_v0 = vadd.f32 %v890_v50, %v826_v55  ;;  %v986_v1 = vadd.f32 %v922_v51, %v858_v56  ;;  %v1394_v2 = vpop.f32.mrb[4].mxu0  ;;  %v1426_v3 = vpop.f32.mrb[4].mxu1 }
  0xfe   :  { %1083 = vst [vmem:[#allocation2 + $0x10] sm:$0xff] %v1019_v57  ;;  %1115 = vst [vmem:[#allocation2 + $0x110] sm:$0xff] %v1051_v58  ;;  %v1020_v4 = vmax.f32 %v956_v60, 0.0  ;;  %v1052_v6 = vmax.f32 %v988_v61, 0.0  ;;  %v760_v54 = vmul.f32 %v1394_v2, %v1816_v5  ;;  %v792_v7 = vmul.f32 %v1426_v3, %v1816_v5  ;;  %v508_v59 = vpop.f32.mrb[5].mxu0  ;;  %v636_v8 = vpop.f32.mrb[5].mxu1 }
  0xff   :  { %1081 = vst [vmem:[#allocation2] sm:$0xff] %v1017_v62  ;;  %1113 = vst [vmem:[#allocation2 + $0x100] sm:$0xff] %v1049_v63  ;;  %v1018_v9 = vmax.f32 %v954_v0, 0.0  ;;  %v1050_v10 = vmax.f32 %v986_v1, 0.0  ;;  %v758_v14 = vmul.f32 %v1816_v5, %v508_v59  ;;  %v790_v15 = vmul.f32 %v1816_v5, %v636_v8  ;;  %v1395_v16 = vpop.f32.mrb[6].mxu0  ;;  %v1427_v17 = vpop.f32.mrb[6].mxu1 }
 0x100   :  { %1084 = vst [vmem:[#allocation2 + $0x18] sm:$0xff] %v1020_v4  ;;  %1116 = vst [vmem:[#allocation2 + $0x118] sm:$0xff] %v1052_v6  ;;  %v831_v18 = vadd.f32 %v1821_v11, %v760_v54  ;;  %v863_v19 = vadd.f32 %v1821_v11, %v792_v7  ;;  %v761_v22 = vmul.f32 %v1395_v16, %v1816_v5  ;;  %v511_v24 = vpop.f32.mrb[7].mxu0  ;;  %v639_v25 = vpop.f32.mrb[7].mxu1  ;;  %v899_v62 = vld [vmem:[%s2156_s1 + $0x50] sm:$0xff]  ;;  %v897_v54 = vld [vmem:[%s2156_s1 + $0x40] sm:$0xff] }
 0x101   :  { %v793_v23 = vmul.f32 %v1427_v17, %v1816_v5  ;;  %1082 = vst [vmem:[#allocation2 + $0x8] sm:$0xff] %v1018_v9  ;;  %1114 = vst [vmem:[#allocation2 + $0x108] sm:$0xff] %v1050_v10  ;;  %v829_v26 = vadd.f32 %v1821_v11, %v758_v14  ;;  %v861_v27 = vadd.f32 %v1821_v11, %v790_v15  ;;  %v931_v63 = vld [vmem:[%s2156_s1 + $0x150] sm:$0xff]  ;;  %v929_v7 = vld [vmem:[%s2156_s1 + $0x140] sm:$0xff] }
 0x102   :  { %v759_v30 = vmul.f32 %v1816_v5, %v511_v24  ;;  %v791_v31 = vmul.f32 %v1816_v5, %v639_v25  ;;  %v959_v32 = vadd.f32 %v895_v12, %v831_v18  ;;  %v991_v33 = vadd.f32 %v927_v13, %v863_v19  ;;  %v900_v14 = vld [vmem:[%s2156_s1 + $0x58] sm:$0xff] }
 0x103   :  { %v832_v35 = vadd.f32 %v1821_v11, %v761_v22  ;;  %v864_v36 = vadd.f32 %v1821_v11, %v793_v23  ;;  %v957_v39 = vadd.f32 %v893_v20, %v829_v26  ;;  %v989_v40 = vadd.f32 %v925_v21, %v861_v27  ;;  %v932_v15 = vld [vmem:[%s2156_s1 + $0x158] sm:$0xff]  ;;  %v898_v22 = vld [vmem:[%s2156_s1 + $0x48] sm:$0xff] }
 0x104   :  { %v830_v41 = vadd.f32 %v1821_v11, %v759_v30  ;;  %v862_v42 = vadd.f32 %v1821_v11, %v791_v31  ;;  %v1023_v44 = vmax.f32 %v959_v32, 0.0  ;;  %v1055_v45 = vmax.f32 %v991_v33, 0.0  ;;  %v930_v23 = vld [vmem:[%s2156_s1 + $0x148] sm:$0xff] }
 0x105   :  { %v960_v46 = vadd.f32 %v896_v28, %v832_v35  ;;  %v992_v34 = vadd.f32 %v928_v29, %v864_v36  ;;  %v1021_v43 = vmax.f32 %v957_v39, 0.0  ;;  %v1053_v47 = vmax.f32 %v989_v40, 0.0  ;;  %v1398_v50 = vpop.f32.mrb[8].mxu0  ;;  %v1430_v51 = vpop.f32.mrb[8].mxu1 }
 0x106   :  { %v958_v48 = vadd.f32 %v894_v37, %v830_v41  ;;  %v990_v49 = vadd.f32 %v926_v38, %v862_v42  ;;  %1087 = vst [vmem:[#allocation2 + $0x30] sm:$0xff] %v1023_v44  ;;  %1119 = vst [vmem:[#allocation2 + $0x130] sm:$0xff] %v1055_v45  ;;  %v764_v55 = vmul.f32 %v1398_v50, %v1816_v5  ;;  %v524_v57 = vpop.f32.mrb[9].mxu0  ;;  %v652_v58 = vpop.f32.mrb[9].mxu1 }
 0x107   :  { %v1024_v53 = vmax.f32 %v960_v46, 0.0  ;;  %v1056_v52 = vmax.f32 %v992_v34, 0.0  ;;  %v796_v56 = vmul.f32 %v1430_v51, %v1816_v5  ;;  %1085 = vst [vmem:[#allocation2 + $0x20] sm:$0xff] %v1021_v43  ;;  %1117 = vst [vmem:[#allocation2 + $0x120] sm:$0xff] %v1053_v47  ;;  %v762_v0 = vmul.f32 %v1816_v5, %v524_v57  ;;  %v1399_v2 = vpop.f32.mrb[10].mxu0  ;;  %v1431_v3 = vpop.f32.mrb[10].mxu1 }
 0x108   :  { %v1022_v60 = vmax.f32 %v958_v48, 0.0  ;;  %v1054_v61 = vmax.f32 %v990_v49, 0.0  ;;  %v794_v1 = vmul.f32 %v1816_v5, %v652_v58  ;;  %v835_v4 = vadd.f32 %v1821_v11, %v764_v55  ;;  %v527_v9 = vpop.f32.mrb[11].mxu0  ;;  %v655_v10 = vpop.f32.mrb[11].mxu1  ;;  %v903_v43 = vld [vmem:[%s2156_s1 + $0x70] sm:$0xff]  ;;  %v901_v55 = vld [vmem:[%s2156_s1 + $0x60] sm:$0xff] }
 0x109   :  { %1088 = vst [vmem:[#allocation2 + $0x38] sm:$0xff] %v1024_v53  ;;  %1120 = vst [vmem:[#allocation2 + $0x138] sm:$0xff] %v1056_v52  ;;  %v867_v6 = vadd.f32 %v1821_v11, %v796_v56  ;;  %v765_v59 = vmul.f32 %v1399_v2, %v1816_v5  ;;  %v797_v8 = vmul.f32 %v1431_v3, %v1816_v5  ;;  %v935_v47 = vld [vmem:[%s2156_s1 + $0x170] sm:$0xff]  ;;  %v933_v56 = vld [vmem:[%s2156_s1 + $0x160] sm:$0xff] }
 0x10a   :  { %1086 = vst [vmem:[#allocation2 + $0x28] sm:$0xff] %v1022_v60  ;;  %1118 = vst [vmem:[#allocation2 + $0x128] sm:$0xff] %v1054_v61  ;;  %v833_v12 = vadd.f32 %v1821_v11, %v762_v0  ;;  %v865_v13 = vadd.f32 %v1821_v11, %v794_v1  ;;  %v763_v16 = vmul.f32 %v1816_v5, %v527_v9  ;;  %v904_v0 = vld [vmem:[%s2156_s1 + $0x78] sm:$0xff] }
 0x10b   :  { %v795_v17 = vmul.f32 %v1816_v5, %v655_v10  ;;  %v963_v18 = vadd.f32 %v899_v62, %v835_v4  ;;  %v995_v19 = vadd.f32 %v931_v63, %v867_v6  ;;  %v836_v20 = vadd.f32 %v1821_v11, %v765_v59  ;;  %v936_v1 = vld [vmem:[%s2156_s1 + $0x178] sm:$0xff]  ;;  %v902_v59 = vld [vmem:[%s2156_s1 + $0x68] sm:$0xff] }
 0x10c   :  { %v868_v21 = vadd.f32 %v1821_v11, %v797_v8  ;;  %v961_v24 = vadd.f32 %v897_v54, %v833_v12  ;;  %v993_v25 = vadd.f32 %v929_v7, %v865_v13  ;;  %v834_v26 = vadd.f32 %v1821_v11, %v763_v16  ;;  %v934_v8 = vld [vmem:[%s2156_s1 + $0x168] sm:$0xff] }
 0x10d   :  { %v866_v27 = vadd.f32 %v1821_v11, %v795_v17  ;;  %v1027_v28 = vmax.f32 %v963_v18, 0.0  ;;  %v1059_v29 = vmax.f32 %v995_v19, 0.0  ;;  %v964_v30 = vadd.f32 %v900_v14, %v836_v20  ;;  %v1402_v37 = vpop.f32.mrb[12].mxu0  ;;  %v1434_v38 = vpop.f32.mrb[12].mxu1 }
 0x10e   :  { %v996_v31 = vadd.f32 %v932_v15, %v868_v21  ;;  %v1025_v32 = vmax.f32 %v961_v24, 0.0  ;;  %v1057_v33 = vmax.f32 %v993_v25, 0.0  ;;  %v962_v35 = vadd.f32 %v898_v22, %v834_v26  ;;  %v540_v44 = vpop.f32.mrb[13].mxu0  ;;  %v668_v45 = vpop.f32.mrb[13].mxu1 }
 0x10f   :  { %v994_v36 = vadd.f32 %v930_v23, %v866_v27  ;;  %1091 = vst [vmem:[#allocation2 + $0x50] sm:$0xff] %v1027_v28  ;;  %1123 = vst [vmem:[#allocation2 + $0x150] sm:$0xff] %v1059_v29  ;;  %v1028_v39 = vmax.f32 %v964_v30, 0.0  ;;  %v768_v41 = vmul.f32 %v1402_v37, %v1816_v5  ;;  %v800_v42 = vmul.f32 %v1434_v38, %v1816_v5  ;;  %v1403_v50 = vpop.f32.mrb[14].mxu0  ;;  %v1435_v51 = vpop.f32.mrb[14].mxu1 }
 0x110   :  { %v1060_v40 = vmax.f32 %v996_v31, 0.0  ;;  %1089 = vst [vmem:[#allocation2 + $0x40] sm:$0xff] %v1025_v32  ;;  %1121 = vst [vmem:[#allocation2 + $0x140] sm:$0xff] %v1057_v33  ;;  %v1026_v46 = vmax.f32 %v962_v35, 0.0  ;;  %v766_v48 = vmul.f32 %v1816_v5, %v540_v44  ;;  %v798_v49 = vmul.f32 %v1816_v5, %v668_v45  ;;  %v543_v60 = vpop.f32.mrb[15].mxu0  ;;  %v671_v61 = vpop.f32.mrb[15].mxu1 }
 0x111   :  { %v1058_v34 = vmax.f32 %v994_v36, 0.0  ;;  %1092 = vst [vmem:[#allocation2 + $0x58] sm:$0xff] %v1028_v39  ;;  %v839_v53 = vadd.f32 %v1821_v11, %v768_v41  ;;  %v871_v52 = vadd.f32 %v1821_v11, %v800_v42  ;;  %v769_v57 = vmul.f32 %v1403_v50, %v1816_v5  ;;  %v907_v32 = vld [vmem:[%s2156_s1 + $0x90] sm:$0xff]  ;;  %v905_v41 = vld [vmem:[%s2156_s1 + $0x80] sm:$0xff] }
 0x112   :  { %1124 = vst [vmem:[#allocation2 + $0x158] sm:$0xff] %v1060_v40  ;;  %v801_v58 = vmul.f32 %v1435_v51, %v1816_v5  ;;  %1090 = vst [vmem:[#allocation2 + $0x48] sm:$0xff] %v1026_v46  ;;  %v837_v62 = vadd.f32 %v1821_v11, %v766_v48  ;;  %v869_v63 = vadd.f32 %v1821_v11, %v798_v49  ;;  %v939_v33 = vld [vmem:[%s2156_s1 + $0x190] sm:$0xff]  ;;  %v937_v42 = vld [vmem:[%s2156_s1 + $0x180] sm:$0xff] }
 0x113   :  { %1122 = vst [vmem:[#allocation2 + $0x148] sm:$0xff] %v1058_v34  ;;  %v767_v2 = vmul.f32 %v1816_v5, %v543_v60  ;;  %v799_v3 = vmul.f32 %v1816_v5, %v671_v61  ;;  %v967_v4 = vadd.f32 %v903_v43, %v839_v53  ;;  %v999_v6 = vadd.f32 %v935_v47, %v871_v52  ;;  %v908_v48 = vld [vmem:[%s2156_s1 + $0x98] sm:$0xff] }
 0x114   :  { %v840_v54 = vadd.f32 %v1821_v11, %v769_v57  ;;  %v872_v7 = vadd.f32 %v1821_v11, %v801_v58  ;;  %v965_v9 = vadd.f32 %v901_v55, %v837_v62  ;;  %v997_v10 = vadd.f32 %v933_v56, %v869_v63  ;;  %v940_v49 = vld [vmem:[%s2156_s1 + $0x198] sm:$0xff]  ;;  %v906_v57 = vld [vmem:[%s2156_s1 + $0x88] sm:$0xff] }
 0x115   :  { %v838_v12 = vadd.f32 %v1821_v11, %v767_v2  ;;  %v870_v13 = vadd.f32 %v1821_v11, %v799_v3  ;;  %v1031_v14 = vmax.f32 %v967_v4, 0.0  ;;  %v1063_v15 = vmax.f32 %v999_v6, 0.0  ;;  %v1406_v22 = vpop.f32.mrb[16].mxu0  ;;  %v1438_v23 = vpop.f32.mrb[16].mxu1  ;;  %v938_v58 = vld [vmem:[%s2156_s1 + $0x188] sm:$0xff] }
 0x116   :  { %v968_v16 = vadd.f32 %v904_v0, %v840_v54  ;;  %v1000_v17 = vadd.f32 %v936_v1, %v872_v7  ;;  %v1029_v18 = vmax.f32 %v965_v9, 0.0  ;;  %v1061_v19 = vmax.f32 %v997_v10, 0.0  ;;  %v556_v28 = vpop.f32.mrb[17].mxu0  ;;  %v684_v29 = vpop.f32.mrb[17].mxu1 }
 0x117   :  { %v966_v20 = vadd.f32 %v902_v59, %v838_v12  ;;  %v998_v21 = vadd.f32 %v934_v8, %v870_v13  ;;  %1095 = vst [vmem:[#allocation2 + $0x70] sm:$0xff] %v1031_v14  ;;  %1127 = vst [vmem:[#allocation2 + $0x170] sm:$0xff] %v1063_v15  ;;  %v772_v26 = vmul.f32 %v1406_v22, %v1816_v5  ;;  %v1407_v37 = vpop.f32.mrb[18].mxu0  ;;  %v1439_v38 = vpop.f32.mrb[18].mxu1 }
 0x118   :  { %v1032_v24 = vmax.f32 %v968_v16, 0.0  ;;  %v1064_v25 = vmax.f32 %v1000_v17, 0.0  ;;  %v804_v27 = vmul.f32 %v1438_v23, %v1816_v5  ;;  %1093 = vst [vmem:[#allocation2 + $0x60] sm:$0xff] %v1029_v18  ;;  %1125 = vst [vmem:[#allocation2 + $0x160] sm:$0xff] %v1061_v19  ;;  %v770_v35 = vmul.f32 %v1816_v5, %v556_v28  ;;  %v559_v46 = vpop.f32.mrb[19].mxu0  ;;  %v687_v34 = vpop.f32.mrb[19].mxu1 }
 0x119   :  { %v1030_v30 = vmax.f32 %v966_v20, 0.0  ;;  %v1062_v31 = vmax.f32 %v998_v21, 0.0  ;;  %v802_v36 = vmul.f32 %v1816_v5, %v684_v29  ;;  %v843_v39 = vadd.f32 %v1821_v11, %v772_v26  ;;  %v911_v18 = vld [vmem:[%s2156_s1 + $0xb0] sm:$0xff]  ;;  %v909_v26 = vld [vmem:[%s2156_s1 + $0xa0] sm:$0xff] }
 0x11a   :  { %1096 = vst [vmem:[#allocation2 + $0x78] sm:$0xff] %v1032_v24  ;;  %1128 = vst [vmem:[#allocation2 + $0x178] sm:$0xff] %v1064_v25  ;;  %v875_v40 = vadd.f32 %v1821_v11, %v804_v27  ;;  %v773_v44 = vmul.f32 %v1407_v37, %v1816_v5  ;;  %v805_v45 = vmul.f32 %v1439_v38, %v1816_v5  ;;  %v943_v19 = vld [vmem:[%s2156_s1 + $0x1b0] sm:$0xff]  ;;  %v941_v27 = vld [vmem:[%s2156_s1 + $0x1a0] sm:$0xff] }
 0x11b   :  { %1094 = vst [vmem:[#allocation2 + $0x68] sm:$0xff] %v1030_v30  ;;  %1126 = vst [vmem:[#allocation2 + $0x168] sm:$0xff] %v1062_v31  ;;  %v841_v43 = vadd.f32 %v1821_v11, %v770_v35  ;;  %v873_v47 = vadd.f32 %v1821_v11, %v802_v36  ;;  %v771_v50 = vmul.f32 %v1816_v5, %v559_v46  ;;  %v912_v35 = vld [vmem:[%s2156_s1 + $0xb8] sm:$0xff] }
 0x11c   :  { %v803_v51 = vmul.f32 %v1816_v5, %v687_v34  ;;  %v971_v53 = vadd.f32 %v907_v32, %v843_v39  ;;  %v1003_v52 = vadd.f32 %v939_v33, %v875_v40  ;;  %v844_v55 = vadd.f32 %v1821_v11, %v773_v44  ;;  %v944_v36 = vld [vmem:[%s2156_s1 + $0x1b8] sm:$0xff]  ;;  %v910_v44 = vld [vmem:[%s2156_s1 + $0xa8] sm:$0xff] }
 0x11d   :  { %v876_v56 = vadd.f32 %v1821_v11, %v805_v45  ;;  %v969_v60 = vadd.f32 %v905_v41, %v841_v43  ;;  %v1001_v61 = vadd.f32 %v937_v42, %v873_v47  ;;  %v842_v62 = vadd.f32 %v1821_v11, %v771_v50  ;;  %v1410_v59 = vpop.f32.mrb[20].mxu0  ;;  %v1442_v8 = vpop.f32.mrb[20].mxu1  ;;  %v942_v45 = vld [vmem:[%s2156_s1 + $0x1a8] sm:$0xff] }
 0x11e   :  { %v874_v63 = vadd.f32 %v1821_v11, %v803_v51  ;;  %v1035_v0 = vmax.f32 %v971_v53, 0.0  ;;  %v1067_v1 = vmax.f32 %v1003_v52, 0.0  ;;  %v972_v2 = vadd.f32 %v908_v48, %v844_v55  ;;  %v572_v14 = vpop.f32.mrb[21].mxu0  ;;  %v700_v15 = vpop.f32.mrb[21].mxu1 }
 0x11f   :  { %v1004_v3 = vadd.f32 %v940_v49, %v876_v56  ;;  %v1033_v4 = vmax.f32 %v969_v60, 0.0  ;;  %v1065_v6 = vmax.f32 %v1001_v61, 0.0  ;;  %v970_v54 = vadd.f32 %v906_v57, %v842_v62  ;;  %v1411_v22 = vpop.f32.mrb[22].mxu0  ;;  %v1443_v23 = vpop.f32.mrb[22].mxu1 }
 0x120   :  { %v1002_v7 = vadd.f32 %v938_v58, %v874_v63  ;;  %1099 = vst [vmem:[#allocation2 + $0x90] sm:$0xff] %v1035_v0  ;;  %1131 = vst [vmem:[#allocation2 + $0x190] sm:$0xff] %v1067_v1  ;;  %v1036_v9 = vmax.f32 %v972_v2, 0.0  ;;  %v776_v12 = vmul.f32 %v1410_v59, %v1816_v5  ;;  %v808_v13 = vmul.f32 %v1442_v8, %v1816_v5  ;;  %v575_v30 = vpop.f32.mrb[23].mxu0  ;;  %v703_v31 = vpop.f32.mrb[23].mxu1 }
 0x121   :  { %v1068_v10 = vmax.f32 %v1004_v3, 0.0  ;;  %1097 = vst [vmem:[#allocation2 + $0x80] sm:$0xff] %v1033_v4  ;;  %1129 = vst [vmem:[#allocation2 + $0x180] sm:$0xff] %v1065_v6  ;;  %v1034_v16 = vmax.f32 %v970_v54, 0.0  ;;  %v774_v20 = vmul.f32 %v1816_v5, %v572_v14  ;;  %v806_v21 = vmul.f32 %v1816_v5, %v700_v15  ;;  %v915_v4 = vld [vmem:[%s2156_s1 + $0xd0] sm:$0xff] }
 0x122   :  { %v1066_v17 = vmax.f32 %v1002_v7, 0.0  ;;  %1100 = vst [vmem:[#allocation2 + $0x98] sm:$0xff] %v1036_v9  ;;  %v847_v24 = vadd.f32 %v1821_v11, %v776_v12  ;;  %v879_v25 = vadd.f32 %v1821_v11, %v808_v13  ;;  %v777_v28 = vmul.f32 %v1411_v22, %v1816_v5  ;;  %v947_v6 = vld [vmem:[%s2156_s1 + $0x1d0] sm:$0xff]  ;;  %v913_v12 = vld [vmem:[%s2156_s1 + $0xc0] sm:$0xff] }
 0x123   :  { %1132 = vst [vmem:[#allocation2 + $0x198] sm:$0xff] %v1068_v10  ;;  %v809_v29 = vmul.f32 %v1443_v23, %v1816_v5  ;;  %1098 = vst [vmem:[#allocation2 + $0x88] sm:$0xff] %v1034_v16  ;;  %v845_v32 = vadd.f32 %v1821_v11, %v774_v20  ;;  %v877_v33 = vadd.f32 %v1821_v11, %v806_v21  ;;  %v945_v13 = vld [vmem:[%s2156_s1 + $0x1c0] sm:$0xff]  ;;  %v916_v20 = vld [vmem:[%s2156_s1 + $0xd8] sm:$0xff] }
 0x124   :  { %1130 = vst [vmem:[#allocation2 + $0x188] sm:$0xff] %v1066_v17  ;;  %v775_v37 = vmul.f32 %v1816_v5, %v575_v30  ;;  %v807_v38 = vmul.f32 %v1816_v5, %v703_v31  ;;  %v975_v39 = vadd.f32 %v911_v18, %v847_v24  ;;  %v1007_v40 = vadd.f32 %v943_v19, %v879_v25  ;;  %v948_v21 = vld [vmem:[%s2156_s1 + $0x1d8] sm:$0xff] }
 0x125   :  { %v848_v41 = vadd.f32 %v1821_v11, %v777_v28  ;;  %v880_v42 = vadd.f32 %v1821_v11, %v809_v29  ;;  %v973_v46 = vadd.f32 %v909_v26, %v845_v32  ;;  %v1005_v34 = vadd.f32 %v941_v27, %v877_v33  ;;  %v1414_v57 = vpop.f32.mrb[24].mxu0  ;;  %v1446_v58 = vpop.f32.mrb[24].mxu1  ;;  %v914_v28 = vld [vmem:[%s2156_s1 + $0xc8] sm:$0xff] }
 0x126   :  { %v846_v43 = vadd.f32 %v1821_v11, %v775_v37  ;;  %v878_v47 = vadd.f32 %v1821_v11, %v807_v38  ;;  %v1039_v48 = vmax.f32 %v975_v39, 0.0  ;;  %v1071_v49 = vmax.f32 %v1007_v40, 0.0  ;;  %v588_v0 = vpop.f32.mrb[25].mxu0  ;;  %v716_v1 = vpop.f32.mrb[25].mxu1  ;;  %v946_v29 = vld [vmem:[%s2156_s1 + $0x1c8] sm:$0xff] }
 0x127   :  { %v976_v50 = vadd.f32 %v912_v35, %v848_v41  ;;  %v1008_v51 = vadd.f32 %v944_v36, %v880_v42  ;;  %v1037_v53 = vmax.f32 %v973_v46, 0.0  ;;  %v1069_v52 = vmax.f32 %v1005_v34, 0.0  ;;  %v1415_v59 = vpop.f32.mrb[26].mxu0  ;;  %v1447_v8 = vpop.f32.mrb[26].mxu1 }
 0x128   :  { %v974_v55 = vadd.f32 %v910_v44, %v846_v43  ;;  %v1006_v56 = vadd.f32 %v942_v45, %v878_v47  ;;  %1103 = vst [vmem:[#allocation2 + $0xb0] sm:$0xff] %v1039_v48  ;;  %1135 = vst [vmem:[#allocation2 + $0x1b0] sm:$0xff] %v1071_v49  ;;  %v780_v62 = vmul.f32 %v1414_v57, %v1816_v5  ;;  %v591_v16 = vpop.f32.mrb[27].mxu0  ;;  %v719_v17 = vpop.f32.mrb[27].mxu1 }
 0x129   :  { %v1040_v60 = vmax.f32 %v976_v50, 0.0  ;;  %v1072_v61 = vmax.f32 %v1008_v51, 0.0  ;;  %v812_v63 = vmul.f32 %v1446_v58, %v1816_v5  ;;  %1101 = vst [vmem:[#allocation2 + $0xa0] sm:$0xff] %v1037_v53  ;;  %1133 = vst [vmem:[#allocation2 + $0x1a0] sm:$0xff] %v1069_v52  ;;  %v778_v54 = vmul.f32 %v1816_v5, %v588_v0  ;;  %v919_v53 = vld [vmem:[%s2156_s1 + $0xf0] sm:$0xff] }
 0x12a   :  { %v1038_v2 = vmax.f32 %v974_v55, 0.0  ;;  %v1070_v3 = vmax.f32 %v1006_v56, 0.0  ;;  %v810_v7 = vmul.f32 %v1816_v5, %v716_v1  ;;  %v851_v9 = vadd.f32 %v1821_v11, %v780_v62  ;;  %v951_v52 = vld [vmem:[%s2156_s1 + $0x1f0] sm:$0xff]  ;;  %v917_v62 = vld [vmem:[%s2156_s1 + $0xe0] sm:$0xff] }
 0x12b   :  { %1104 = vst [vmem:[#allocation2 + $0xb8] sm:$0xff] %v1040_v60  ;;  %1136 = vst [vmem:[#allocation2 + $0x1b8] sm:$0xff] %v1072_v61  ;;  %v883_v10 = vadd.f32 %v1821_v11, %v812_v63  ;;  %v781_v14 = vmul.f32 %v1415_v59, %v1816_v5  ;;  %v813_v15 = vmul.f32 %v1447_v8, %v1816_v5  ;;  %v949_v63 = vld [vmem:[%s2156_s1 + $0x1e0] sm:$0xff] }
 0x12c   :  { %1102 = vst [vmem:[#allocation2 + $0xa8] sm:$0xff] %v1038_v2  ;;  %1134 = vst [vmem:[#allocation2 + $0x1a8] sm:$0xff] %v1070_v3  ;;  %v849_v18 = vadd.f32 %v1821_v11, %v778_v54  ;;  %v881_v19 = vadd.f32 %v1821_v11, %v810_v7  ;;  %v779_v22 = vmul.f32 %v1816_v5, %v591_v16  ;;  %v920_v54 = vld [vmem:[%s2156_s1 + $0xf8] sm:$0xff] }
 0x12d   :  { %v811_v23 = vmul.f32 %v1816_v5, %v719_v17  ;;  %v979_v24 = vadd.f32 %v915_v4, %v851_v9  ;;  %v1011_v25 = vadd.f32 %v947_v6, %v883_v10  ;;  %v852_v26 = vadd.f32 %v1821_v11, %v781_v14  ;;  %v1418_v44 = vpop.f32.mrb[28].mxu0  ;;  %v1450_v45 = vpop.f32.mrb[28].mxu1  ;;  %v952_v7 = vld [vmem:[%s2156_s1 + $0x1f8] sm:$0xff]  ;;  %v918_v14 = vld [vmem:[%s2156_s1 + $0xe8] sm:$0xff] }
 0x12e   :  { %v884_v27 = vadd.f32 %v1821_v11, %v813_v15  ;;  %v977_v30 = vadd.f32 %v913_v12, %v849_v18  ;;  %v1009_v31 = vadd.f32 %v945_v13, %v881_v19  ;;  %v850_v32 = vadd.f32 %v1821_v11, %v779_v22  ;;  %v604_v48 = vpop.f32.mrb[29].mxu0  ;;  %v732_v49 = vpop.f32.mrb[29].mxu1  ;;  %v950_v15 = vld [vmem:[%s2156_s1 + $0x1e8] sm:$0xff]  ;;  %s1479_s1 = scalar_lea.vmem %s1151_s3, 8192 }
 0x12f   :  { %v882_v33 = vadd.f32 %v1821_v11, %v811_v23  ;;  %v1043_v35 = vmax.f32 %v979_v24, 0.0  ;;  %v1075_v36 = vmax.f32 %v1011_v25, 0.0  ;;  %v980_v37 = vadd.f32 %v916_v20, %v852_v26  ;;  %v1419_v57 = vpop.f32.mrb[30].mxu0  ;;  %v1451_v58 = vpop.f32.mrb[30].mxu1  ;;  %p1480_p0 = scmp.ne.s32.totalorder %s1151_s3, %s1479_s1  ;;  %p1485_p2 = scmp.lt.s32.totalorder %s1479_s1, %s1479_s1 }
 0x130   :  { %v1012_v38 = vadd.f32 %v948_v21, %v884_v27  ;;  %v1041_v39 = vmax.f32 %v977_v30, 0.0  ;;  %v1073_v40 = vmax.f32 %v1009_v31, 0.0  ;;  %v978_v41 = vadd.f32 %v914_v28, %v850_v32  ;;  %v607_v2 = vpop.f32.mrb[31].mxu0  ;;  %v735_v3 = vpop.f32.mrb[31].mxu1 }
 0x131   :  { %v1010_v42 = vadd.f32 %v946_v29, %v882_v33  ;;  %1107 = vst [vmem:[#allocation2 + $0xd0] sm:$0xff] %v1043_v35  ;;  %1139 = vst [vmem:[#allocation2 + $0x1d0] sm:$0xff] %v1075_v36  ;;  %v1044_v46 = vmax.f32 %v980_v37, 0.0  ;;  %v784_v43 = vmul.f32 %v1418_v44, %v1816_v5  ;;  %v816_v47 = vmul.f32 %v1450_v45, %v1816_v5  ;;  %p1486_p3 = por %p1485_p2, %p1484_p1 }
 0x132   :  { %v1076_v34 = vmax.f32 %v1012_v38, 0.0  ;;  %1105 = vst [vmem:[#allocation2 + $0xc0] sm:$0xff] %v1041_v39  ;;  %1137 = vst [vmem:[#allocation2 + $0x1c0] sm:$0xff] %v1073_v40  ;;  %v1042_v50 = vmax.f32 %v978_v41, 0.0  ;;  %v782_v55 = vmul.f32 %v1816_v5, %v604_v48  ;;  %v814_v56 = vmul.f32 %v1816_v5, %v732_v49 }
 0x133   :  { %v1074_v51 = vmax.f32 %v1010_v42, 0.0  ;;  %1108 = vst [vmem:[#allocation2 + $0xd8] sm:$0xff] %v1044_v46  ;;  %v855_v60 = vadd.f32 %v1821_v11, %v784_v43  ;;  %v887_v61 = vadd.f32 %v1821_v11, %v816_v47  ;;  %v785_v0 = vmul.f32 %v1419_v57, %v1816_v5  ;;  %p1487_p4 = pnand %p1486_p3, %p1480_p0 }
 0x134   :  { %1140 = vst [vmem:[#allocation2 + $0x1d8] sm:$0xff] %v1076_v34  ;;  %v817_v1 = vmul.f32 %v1451_v58, %v1816_v5  ;;  %1106 = vst [vmem:[#allocation2 + $0xc8] sm:$0xff] %v1042_v50  ;;  %v853_v4 = vadd.f32 %v1821_v11, %v782_v55  ;;  %v885_v6 = vadd.f32 %v1821_v11, %v814_v56 }
 0x135   :  { %1138 = vst [vmem:[#allocation2 + $0x1c8] sm:$0xff] %v1074_v51  ;;  %v783_v59 = vmul.f32 %v1816_v5, %v607_v2  ;;  %v815_v8 = vmul.f32 %v1816_v5, %v735_v3  ;;  %v983_v9 = vadd.f32 %v919_v53, %v855_v60  ;;  %v1015_v10 = vadd.f32 %v951_v52, %v887_v61 }
 0x136   :  { %v856_v12 = vadd.f32 %v1821_v11, %v785_v0  ;;  %v888_v13 = vadd.f32 %v1821_v11, %v817_v1  ;;  %v981_v16 = vadd.f32 %v917_v62, %v853_v4  ;;  %v1013_v17 = vadd.f32 %v949_v63, %v885_v6 }
 0x137   :  { %v854_v18 = vadd.f32 %v1821_v11, %v783_v59  ;;  %v886_v5 = vadd.f32 %v1821_v11, %v815_v8  ;;  %v1047_v19 = vmax.f32 %v983_v9, 0.0  ;;  %v1079_v20 = vmax.f32 %v1015_v10, 0.0 }
 0x138   :  { %v984_v21 = vadd.f32 %v920_v54, %v856_v12  ;;  %v1016_v22 = vadd.f32 %v952_v7, %v888_v13  ;;  %v1045_v23 = vmax.f32 %v981_v16, 0.0  ;;  %v1077_v24 = vmax.f32 %v1013_v17, 0.0 }
 0x139   :  { %v982_v25 = vadd.f32 %v918_v14, %v854_v18  ;;  %v1014_v26 = vadd.f32 %v950_v15, %v886_v5  ;;  %1111 = vst [vmem:[#allocation2 + $0xf0] sm:$0xff] %v1047_v19  ;;  %1143 = vst [vmem:[#allocation2 + $0x1f0] sm:$0xff] %v1079_v20 }
 0x13a   :  { %v1048_v27 = vmax.f32 %v984_v21, 0.0  ;;  %v1080_v28 = vmax.f32 %v1016_v22, 0.0  ;;  %1109 = vst [vmem:[#allocation2 + $0xe0] sm:$0xff] %v1045_v23  ;;  %1141 = vst [vmem:[#allocation2 + $0x1e0] sm:$0xff] %v1077_v24 }
 0x13b   :  { %v1046_v29 = vmax.f32 %v982_v25, 0.0  ;;  %v1078_v30 = vmax.f32 %v1014_v26, 0.0 }
 0x13c   :  { %1112 = vst [vmem:[#allocation2 + $0xf8] sm:$0xff] %v1048_v27  ;;  %1144 = vst [vmem:[#allocation2 + $0x1f8] sm:$0xff] %v1080_v28 }
 0x13d   :  { %1110 = vst [vmem:[#allocation2 + $0xe8] sm:$0xff] %v1046_v29  ;;  %1142 = vst [vmem:[#allocation2 + $0x1e8] sm:$0xff] %v1078_v30 }
 0x13e   :  { %1490 = shalt.err (!%p1487_p4)
}
 0x13f   :  { %s1491_s22 = scalar_lea.hbm %s2162_s7, 8192 }
 0x140   :  { %p1492_p5 = scmp.ne.s32.totalorder %s2162_s7, %s1491_s22  ;;  %p1495_p6 = scmp.lt.u32.totalorder %s1491_s22, %s2162_s7 }
 0x142   :  { %p1497_p7 = pnand %p1495_p6, %p1492_p5 }
 0x144   :  { %1500 = shalt.err (!%p1497_p7)
}
 0x145   :  { %s1504_s27 = smov 128   ;;  %s1505_s28 = smov 8  }
 0x146   :  { %1156 = dma.vmem_to_hbm [thread:$0]  %s1151_s3, 8192, %s2162_s7, [#allocation3], %s1504_s27, %s1504_s27, %s1505_s28  }
 0x147   :  { %1501 = dma.done.wait [#allocation3], 8192  }
 0x148   :  { %1502 = vsyncadd [#allocation3], 4294959104 }
 0x149   :  { %1160 = vsyncpa [#allocation3], 1 }

// kernel: bottleneck_forward.5
= control target key start
LH: loop header
LB: loop body
LE: loop exit
PB: predicated region body
PF: predicated region fallthrough
CT: control target
= control target key end

     0   :  { %s4129_s21 = smov 0   ;;  %s5191_s0 = inlined_call_operand.vmem [shape: bf16[2,16,16,128], index: 0, kind: input, shape index: {}]   ;;  %s5192_s1 = inlined_call_operand.vmem [shape: bf16[1152,128], index: 1, kind: input, shape index: {}]   ;;  %s5193_s2 = inlined_call_operand.vmem [shape: f32[1,128], index: 2, kind: input, shape index: {}]   ;;  %s5194_s3 = inlined_call_operand.vmem [shape: f32[1,128], index: 3, kind: input, shape index: {}]   ;;  %s5195_s4 = inlined_call_operand.vmem [shape: bf16[2,16,16,128], index: 4, kind: output, shape index: {0}]   ;;  %s5196_s5 = inlined_call_operand.vmem [shape: f32[2,8,128], index: 5, kind: output, shape index: {1}]   ;;  %s5197_s6 = inlined_call_operand.vmem [shape: f32[2,8,128], index: 6, kind: output, shape index: {2}]  }
   0x1 LB: > { %s2948_s22 = sadd.s32 4294967295, %s4091_s21   ;;  %p2952_p0 = scmp.ge.s32.totalorder %s4091_s21, 1  ;;  %s4091_s21 = sphi %s4129_s21, %s17_s21  }
   0x2   : > { %p217_p1 = scmp.lt.s32.totalorder %s4091_s21, 3 }
   0x4   : > { %p218_p2 = pnand %p2952_p0, %p217_p1 }
   0x6   : > { %221 = sbr.rel (%p218_p2) target bundleno = 573 (0x23d), region = 36 }
   0xd   : > { %v4012_v0 = vld [vmem:[%s5192_s1 + $0x100] sm:$0xff]   ;;  %v4093_v3 = vmov 0.0   ;;  %v4015_v4 = vld [vmem:[%s5192_s1 + $0x108] sm:$0xff]   ;;  %v4018_v7 = vld [vmem:[%s5192_s1 + $0x110] sm:$0xff]   ;;  %p255_p3 = scmp.lt.s32.totalorder %s2948_s22, 1 }
   0xe   : > { %v4143_v1 = vld [vmem:[%s5192_s1 + $0x140] sm:$0xff]   ;;  %3275 = vmatprep.subr.bf16.mxu0 %v4012_v0  ;;  %482 = vst [vmem:[#allocation2 + $0xe9] sm:$0x1] %v4093_v3  ;;  %448 = vst [vmem:[#allocation2] sm:$0xff] %v4093_v3  ;;  %v4198_v5 = vld [vmem:[%s5192_s1 + $0x148] sm:$0xff]  }
   0xf   : > { %v4014_v2 = vld [vmem:[%s5192_s1 + $0xc0] sm:$0xff]   ;;  %449 = vst [vmem:[#allocation2 + $0x8] sm:$0xff] %v4093_v3  ;;  %450 = vst [vmem:[#allocation2 + $0x10] sm:$0x3] %v4093_v3  ;;  %3827 = vmatprep.subr.bf16.mxu1 %v4143_v1  ;;  %v4017_v6 = vld [vmem:[%s5192_s1 + $0xc8] sm:$0xff]   ;;  %s5201_s22 = smov (!%p255_p3, %s2948_s22), 1 }
  0x10   : > { %452 = vst [vmem:[#allocation2 + $0x198] sm:$0xff] %v4093_v3  ;;  %453 = vst [vmem:[#allocation2 + $0x1a0] sm:$0xff] %v4093_v3  ;;  %3276 = vmatpush3.bf16.msra.mxu0 %v4014_v2  ;;  %3835 = vmatpush3.bf16.msra.mxu1 %v4143_v1  ;;  %v4210_v8 = vld [vmem:[%s5192_s1 + $0x150] sm:$0xff]   ;;  %v4021_v10 = vld [vmem:[%s5192_s1 + $0x118] sm:$0xff]   ;;  %s3067_s11 = sshll.u32 %s5201_s22, 7 }
  0x11   : > { %454 = vst [vmem:[#allocation2 + $0x1a8] sm:$0x3] %v4093_v3  ;;  %456 = vst [vmem:[#allocation2 + $0x18] sm:$0x1] %v4093_v3  ;;  %3277 = vmatprep.subr.bf16.mxu0 %v4015_v4  ;;  %3828 = vmatprep.subr.bf16.mxu1 %v4198_v5  ;;  %v4020_v9 = vld [vmem:[%s5192_s1 + $0xd0] sm:$0xff]   ;;  %v4223_v11 = vld [vmem:[%s5192_s1 + $0x158] sm:$0xff]   ;;  %s4276_s20 = scalar_lea.vmem %s5191_s0, %s3067_s11  ;;  %s5110_s29 = scalar_lea.vmem %s5195_s4, %s3067_s11 }
  0x12   : > { %457 = vst [vmem:[#allocation2 + $0x30] sm:$0x1] %v4093_v3  ;;  %458 = vst [vmem:[#allocation2 + $0x48] sm:$0x1] %v4093_v3  ;;  %v4023_v12 = vld [vmem:[%s5192_s1 + $0xd8] sm:$0xff]   ;;  %v4024_v13 = vld [vmem:[%s5192_s1 + $0x120] sm:$0xff]  }
  0x13   : > { %459 = vst [vmem:[#allocation2 + $0x60] sm:$0x1] %v4093_v3  ;;  %460 = vst [vmem:[#allocation2 + $0x78] sm:$0x1] %v4093_v3  ;;  %v4238_v14 = vld [vmem:[%s5192_s1 + $0x160] sm:$0xff]   ;;  %v4027_v16 = vld [vmem:[%s5192_s1 + $0x128] sm:$0xff]  }
  0x14   : > { %461 = vst [vmem:[#allocation2 + $0x90] sm:$0x1] %v4093_v3  ;;  %462 = vst [vmem:[#allocation2 + $0xa8] sm:$0x1] %v4093_v3  ;;  %3278 = vmatpush3.bf16.msra.mxu0 %v4017_v6  ;;  %3836 = vmatpush3.bf16.msra.mxu1 %v4198_v5  ;;  %v4026_v15 = vld [vmem:[%s5192_s1 + $0xe0] sm:$0xff]   ;;  %v4255_v17 = vld [vmem:[%s5192_s1 + $0x168] sm:$0xff]  }
  0x15   : > { %463 = vst [vmem:[#allocation2 + $0xc0] sm:$0x1] %v4093_v3  ;;  %464 = vst [vmem:[#allocation2 + $0xd8] sm:$0x1] %v4093_v3  ;;  %3279 = vmatprep.subr.bf16.mxu0 %v4018_v7  ;;  %3829 = vmatprep.subr.bf16.mxu1 %v4210_v8  ;;  %v4029_v18 = vld [vmem:[%s5192_s1 + $0xe8] sm:$0xff]   ;;  %v4030_v19 = vld [vmem:[%s5192_s1 + $0x130] sm:$0xff]  }
  0x16   : > { %465 = vst [vmem:[#allocation2 + $0xf0] sm:$0x1] %v4093_v3  ;;  %466 = vst [vmem:[#allocation2 + $0x108] sm:$0x1] %v4093_v3  ;;  %v4269_v20 = vld [vmem:[%s5192_s1 + $0x170] sm:$0xff]   ;;  %v4033_v22 = vld [vmem:[%s5192_s1 + $0x138] sm:$0xff]  }
  0x17   : > { %467 = vst [vmem:[#allocation2 + $0x120] sm:$0x1] %v4093_v3  ;;  %468 = vst [vmem:[#allocation2 + $0x138] sm:$0x1] %v4093_v3  ;;  %v4032_v21 = vld [vmem:[%s5192_s1 + $0xf0] sm:$0xff]   ;;  %v4288_v23 = vld [vmem:[%s5192_s1 + $0x178] sm:$0xff]  }
  0x18   : > { %469 = vst [vmem:[#allocation2 + $0x150] sm:$0x1] %v4093_v3  ;;  %470 = vst [vmem:[#allocation2 + $0x168] sm:$0x1] %v4093_v3  ;;  %3280 = vmatpush3.bf16.msra.mxu0 %v4020_v9  ;;  %3837 = vmatpush3.bf16.msra.mxu1 %v4210_v8  ;;  %v3102_v24 = vld [vmem:[%s4276_s20] sm:$0xff]   ;;  %v3253_v29 = vld [vmem:[%s4276_s20 + $0x48] sm:$0xff]  }
  0x19   : > { %471 = vst [vmem:[#allocation2 + $0x180] sm:$0x1] %v4093_v3  ;;  %474 = vst [vmem:[#allocation2 + $0x29] sm:$0x1] %v4093_v3  ;;  %3281 = vmatprep.subr.bf16.mxu0 %v4021_v10  ;;  %3830 = vmatprep.subr.bf16.mxu1 %v4223_v11  ;;  %v4294_v25 = vld [vmem:[%s5193_s2] ss:$0 sm:$0xff]  ;;  %v3103_v26 = vunpack.c.l.bf16 %v3102_v24  ;;  %v3104_v27 = vunpack.c.h.bf16 %v3102_v24  ;;  %v3139_v33 = vunpack.c.l.bf16 %v3253_v29  ;;  %v3140_v34 = vunpack.c.h.bf16 %v3253_v29 }
  0x1a   : > { %475 = vst [vmem:[#allocation2 + $0x41] sm:$0x1] %v4093_v3  ;;  %476 = vst [vmem:[#allocation2 + $0x59] sm:$0x1] %v4093_v3  ;;  %v3252_v28 = vld [vmem:[%s4276_s20 + $0x40] sm:$0xff]   ;;  %v4035_v37 = vld [vmem:[%s5192_s1 + $0xf8] sm:$0xff]  }
  0x1b   : > { %477 = vst [vmem:[#allocation2 + $0x71] sm:$0x1] %v4093_v3  ;;  %478 = vst [vmem:[#allocation2 + $0x89] sm:$0x1] %v4093_v3  ;;  %v4302_v30 = vld [vmem:[%s5194_s3] ss:$0 sm:$0xff]  ;;  %v3135_v31 = vunpack.c.l.bf16 %v3252_v28  ;;  %v3136_v32 = vunpack.c.h.bf16 %v3252_v28  ;;  %v345_v35 = vmul.f32 %v3103_v26, %v4294_v25  ;;  %v346_v36 = vmul.f32 %v3104_v27, %v4294_v25 }
  0x1c   : > { %479 = vst [vmem:[#allocation2 + $0xa1] sm:$0x1] %v4093_v3  ;;  %480 = vst [vmem:[#allocation2 + $0xb9] sm:$0x1] %v4093_v3  ;;  %3282 = vmatpush3.bf16.msra.mxu0 %v4023_v12  ;;  %3838 = vmatpush3.bf16.msra.mxu1 %v4223_v11  ;;  %v363_v40 = vmul.f32 %v3139_v33, %v4294_v25  ;;  %v364_v43 = vmul.f32 %v3140_v34, %v4294_v25  ;;  %v4036_v44 = vld [vmem:[%s5192_s1 + $0x40] sm:$0xff]   ;;  %v3245_v45 = vld [vmem:[%s4276_s20 + $0x8] sm:$0xff]  }
  0x1d   : > { %481 = vst [vmem:[#allocation2 + $0xd1] sm:$0x1] %v4093_v3  ;;  %483 = vst [vmem:[#allocation2 + $0x101] sm:$0x1] %v4093_v3  ;;  %3283 = vmatprep.subr.bf16.mxu0 %v4024_v13  ;;  %3831 = vmatprep.subr.bf16.mxu1 %v4238_v14  ;;  %v361_v38 = vmul.f32 %v3135_v31, %v4294_v25  ;;  %v362_v39 = vmul.f32 %v3136_v32, %v4294_v25  ;;  %v3107_v49 = vunpack.c.l.bf16 %v3245_v45  ;;  %v3254_v50 = vld [vmem:[%s4276_s20 + $0x50] sm:$0xff]   ;;  %v3255_v55 = vld [vmem:[%s4276_s20 + $0x58] sm:$0xff]  }
  0x1e   : > { %484 = vst [vmem:[#allocation2 + $0x119] sm:$0x1] %v4093_v3  ;;  %485 = vst [vmem:[#allocation2 + $0x131] sm:$0x1] %v4093_v3  ;;  %v384_v41 = vadd.f32 %v4302_v30, %v345_v35  ;;  %v385_v42 = vadd.f32 %v4302_v30, %v346_v36  ;;  %v402_v48 = vadd.f32 %v4302_v30, %v363_v40  ;;  %v3108_v54 = vunpack.c.h.bf16 %v3245_v45  ;;  %v3246_v10 = vld [vmem:[%s4276_s20 + $0x10] sm:$0xff]   ;;  %v3256_v12 = vld [vmem:[%s4276_s20 + $0x60] sm:$0xff]  }
  0x1f   : > { %486 = vst [vmem:[#allocation2 + $0x149] sm:$0x1] %v4093_v3  ;;  %487 = vst [vmem:[#allocation2 + $0x161] sm:$0x1] %v4093_v3  ;;  %v400_v46 = vadd.f32 %v4302_v30, %v361_v38  ;;  %v401_v47 = vadd.f32 %v4302_v30, %v362_v39  ;;  %v403_v53 = vadd.f32 %v4302_v30, %v364_v43  ;;  %v3143_v63 = vunpack.c.l.bf16 %v3254_v50  ;;  %v4037_v40 = vld [vmem:[%s5192_s1] sm:$0xff]   ;;  %s2957_s11 = sshll.u32 %s5201_s22, 3 }
  0x20   : > { %488 = vst [vmem:[#allocation2 + $0x179] sm:$0x1] %v4093_v3  ;;  %489 = vst [vmem:[#allocation2 + $0x191] sm:$0x1] %v4093_v3  ;;  %3284 = vmatpush3.bf16.msra.mxu0 %v4026_v15  ;;  %3839 = vmatpush3.bf16.msra.mxu1 %v4238_v14  ;;  %v416_v51 = vmax.f32 %v384_v41, 0.0  ;;  %v417_v52 = vmax.f32 %v385_v42, 0.0  ;;  %v347_v59 = vmul.f32 %v3107_v49, %v4294_v25  ;;  %v3144_v2 = vunpack.c.h.bf16 %v3254_v50  ;;  %s268_s8 = scalar_lea.vmem %s5196_s5, %s2957_s11  ;;  %s272_s10 = scalar_lea.vmem %s5197_s6, %s2957_s11 }
  0x21   : > { %455 = vst [vmem:[#allocation2] sm:$0x1] %v4093_v3  ;;  %472 = vst [vmem:[#allocation2 + $0x198] sm:$0x1] %v4093_v3  ;;  %3285 = vmatprep.subr.bf16.mxu0 %v4027_v16  ;;  %3832 = vmatprep.subr.bf16.mxu1 %v4255_v17  ;;  %v432_v56 = vmax.f32 %v400_v46, 0.0  ;;  %v433_v57 = vmax.f32 %v401_v47, 0.0  ;;  %v348_v62 = vmul.f32 %v3108_v54, %v4294_v25  ;;  %v3147_v4 = vunpack.c.l.bf16 %v3255_v55 }
  0x22   : > { %473 = vst [vmem:[#allocation2 + $0x11] sm:$0x1] %v4093_v3  ;;  %490 = vst [vmem:[#allocation2 + $0x1a9] sm:$0x1] %v4093_v3  ;;  %v434_v58 = vmax.f32 %v402_v48, 0.0  ;;  %v4329_v60 = vpack.c.bf16 %v417_v52, %v416_v51  ;;  %v435_v61 = vmax.f32 %v403_v53, 0.0  ;;  %v386_v0 = vadd.f32 %v4302_v30, %v347_v59 }
  0x23   : > { %492 = vst [vmem:[#allocation2 + $0x19] sm:$0xff] %v416_v51  ;;  %493 = vst [vmem:[#allocation2 + $0x21] sm:$0xff] %v417_v52  ;;  %v3148_v6 = vunpack.c.h.bf16 %v3255_v55  ;;  %v387_v7 = vadd.f32 %v4302_v30, %v348_v62  ;;  %v365_v9 = vmul.f32 %v3143_v63, %v4294_v25  ;;  %v4339_v13 = vpack.c.bf16 %v433_v57, %v432_v56  ;;  %v4038_v48 = vld [vmem:[%s5192_s1 + $0x48] sm:$0xff]   ;;  %v3247_v52 = vld [vmem:[%s4276_s20 + $0x18] sm:$0xff]  }
  0x24   : > { %3286 = vmatpush3.bf16.msra.mxu0 %v4029_v18  ;;  %3840 = vmatpush3.bf16.msra.mxu1 %v4255_v17  ;;  %508 = vst [vmem:[#allocation2 + $0xd9] sm:$0xff] %v432_v56  ;;  %509 = vst [vmem:[#allocation2 + $0xe1] sm:$0xff] %v433_v57  ;;  %v4341_v15 = vpack.c.bf16 %v435_v61, %v434_v58  ;;  %v418_v16 = vmax.f32 %v386_v0, 0.0  ;;  %v366_v18 = vmul.f32 %v3144_v2, %v4294_v25  ;;  %v3258_v59 = vld [vmem:[%s4276_s20 + $0x70] sm:$0xff]  }
  0x25   : > { %3287 = vmatprep.subr.bf16.mxu0 %v4030_v19  ;;  %3833 = vmatprep.subr.bf16.mxu1 %v4269_v20  ;;  %510 = vst [vmem:[#allocation2 + $0xf1] sm:$0xff] %v434_v58  ;;  %511 = vst [vmem:[#allocation2 + $0xf9] sm:$0xff] %v435_v61  ;;  %v367_v19 = vmul.f32 %v3147_v4, %v4294_v25  ;;  %v4347_v24 = vadd.f32 %v4302_v30, %v365_v9  ;;  %v3111_v26 = vunpack.c.l.bf16 %v3246_v10 }
  0x26   : > { %1084 = vmatprep.mubr.bf16.mxu0 %v4329_v60  ;;  %v3112_v27 = vunpack.c.h.bf16 %v3246_v10  ;;  %494 = vst [vmem:[#allocation2 + $0x31] sm:$0xff] %v418_v16  ;;  %v4350_v28 = vadd.f32 %v4302_v30, %v366_v18  ;;  %v3151_v32 = vunpack.c.l.bf16 %v3256_v12  ;;  %v3259_v18 = vld [vmem:[%s4276_s20 + $0x78] sm:$0xff]  }
  0x27   : > { %v4353_v29 = vadd.f32 %v4302_v30, %v367_v19  ;;  %v436_v34 = vmax.f32 %v4347_v24, 0.0  ;;  %v349_v35 = vmul.f32 %v3111_v26, %v4294_v25  ;;  %v4039_v19 = vld [vmem:[%s5192_s1 + $0x8] sm:$0xff]  }
  0x28   : > { %3288 = vmatpush3.bf16.msra.mxu0 %v4032_v21  ;;  %3841 = vmatpush3.bf16.msra.mxu1 %v4269_v20  ;;  %v368_v21 = vmul.f32 %v3148_v6, %v4294_v25  ;;  %v350_v36 = vmul.f32 %v3112_v27, %v4294_v25  ;;  %v437_v41 = vmax.f32 %v4350_v28, 0.0  ;;  %v369_v51 = vmul.f32 %v3151_v32, %v4294_v25  ;;  %v4049_v28 = vld [vmem:[%s5192_s1 + $0x30] sm:$0xff]  }
  0x29   : > { %3289 = vmatprep.subr.bf16.mxu0 %v4033_v22  ;;  %3834 = vmatprep.subr.bf16.mxu1 %v4288_v23  ;;  %v419_v22 = vmax.f32 %v387_v7, 0.0  ;;  %v438_v42 = vmax.f32 %v4353_v29, 0.0  ;;  %512 = vst [vmem:[#allocation2 + $0x109] sm:$0xff] %v436_v34  ;;  %v388_v49 = vadd.f32 %v4302_v30, %v349_v35  ;;  %v3115_v7 = vunpack.c.l.bf16 %v3247_v52  ;;  %v4050_v29 = vld [vmem:[%s5192_s1 + $0x78] sm:$0xff]  }
  0x2a   : > { %v4356_v31 = vadd.f32 %v4302_v30, %v368_v21  ;;  %v716_v38 = vld [vmem:[#allocation2 + $0x18] sm:$0xff]  ;;  %v717_v39 = vld [vmem:[#allocation2 + $0x20] sm:$0xff]  ;;  %v389_v50 = vadd.f32 %v4302_v30, %v350_v36  ;;  %513 = vst [vmem:[#allocation2 + $0x111] sm:$0xff] %v437_v41  ;;  %v4391_v0 = vadd.f32 %v4302_v30, %v369_v51  ;;  %v4040_v36 = vld [vmem:[%s5192_s1 + $0x50] sm:$0xff]  }
  0x2b   : > { %495 = vst [vmem:[#allocation2 + $0x39] sm:$0xff] %v419_v22  ;;  %v4358_v33 = vpack.c.bf16 %v419_v22, %v418_v16  ;;  %v828_v45 = vld [vmem:[#allocation2 + $0xda] sm:$0xff]  ;;  %v829_v46 = vld [vmem:[#allocation2 + $0xe2] sm:$0xff]  ;;  %v4370_v47 = vpack.c.bf16 %v717_v39, %v716_v38  ;;  %514 = vst [vmem:[#allocation2 + $0x121] sm:$0xff] %v438_v42  ;;  %v420_v62 = vmax.f32 %v388_v49, 0.0  ;;  %v3116_v16 = vunpack.c.h.bf16 %v3247_v52 }
  0x2c   : > { %3290 = vmatpush3.bf16.msra.mxu0 %v4035_v37  ;;  %3842 = vmatpush3.bf16.msra.mxu1 %v4288_v23  ;;  %v3257_v37 = vld [vmem:[%s4276_s20 + $0x68] sm:$0xff]   ;;  %v439_v43 = vmax.f32 %v4356_v31, 0.0  ;;  %v852_v53 = vpack.c.bf16 %v829_v46, %v828_v45  ;;  %v830_v54 = vld [vmem:[#allocation2 + $0xf2] sm:$0xff]  ;;  %v831_v55 = vld [vmem:[#allocation2 + $0xfa] sm:$0xff]  ;;  %v421_v63 = vmax.f32 %v389_v50, 0.0  ;;  %v351_v32 = vmul.f32 %v3115_v7, %v4294_v25 }
  0x2d   : > { %3683 = vmatprep.subr.bf16.mxu0 %v4143_v1  ;;  %3411 = vmatprep.subr.bf16.mxu1 %v4036_v44  ;;  %v3152_v44 = vunpack.c.h.bf16 %v3256_v12  ;;  %v3155_v57 = vunpack.c.l.bf16 %v3257_v37  ;;  %v3156_v58 = vunpack.c.h.bf16 %v3257_v37  ;;  %v853_v61 = vpack.c.bf16 %v831_v55, %v830_v54  ;;  %v718_v9 = vld [vmem:[#allocation2 + $0x30] sm:$0xff]  ;;  %496 = vst [vmem:[#allocation2 + $0x49] sm:$0xff] %v420_v62 }
  0x2e   : > { %515 = vst [vmem:[#allocation2 + $0x129] sm:$0xff] %v439_v43  ;;  %3715 = vmatprep.mubr.bf16.mxu1 %v852_v53  ;;  %497 = vst [vmem:[#allocation2 + $0x51] sm:$0xff] %v421_v63  ;;  %v4400_v10 = vpack.c.bf16 %v421_v63, %v420_v62  ;;  %v440_v12 = vmax.f32 %v4391_v0, 0.0  ;;  %v352_v37 = vmul.f32 %v3116_v16, %v4294_v25  ;;  %v3160_v38 = vunpack.c.h.bf16 %v3258_v59  ;;  %v4042_v63 = vld [vmem:[%s5192_s1 + $0x58] sm:$0xff]  }
  0x2f   : > { %v370_v56 = vmul.f32 %v3152_v44, %v4294_v25  ;;  %1085 = vmatmul.mubr.bf16.vlgmr.msra.gmra.mrb[0].mxu0 %v4370_v47  ;;  %v371_v4 = vmul.f32 %v3155_v57, %v4294_v25  ;;  %v372_v6 = vmul.f32 %v3156_v58, %v4294_v25  ;;  %3716 = vmatmul.mubr.bf16.vlgmr.msra.gmra.mrb[0].mxu1 %v853_v61  ;;  %v3163_v46 = vunpack.c.l.bf16 %v3259_v18  ;;  %v4041_v57 = vld [vmem:[%s5192_s1 + $0x10] sm:$0xff]   ;;  %v4051_v0 = vld [vmem:[%s5192_s1 + $0x38] sm:$0xff]  }
  0x30   : > { %3684 = vmatpush3.bf16.msra.mxu0 %v4143_v1  ;;  %1092 = vmatprep.mubr.bf16.mxu0 %v4358_v33  ;;  %v3159_v1 = vunpack.c.l.bf16 %v3258_v59  ;;  %516 = vst [vmem:[#allocation2 + $0x139] sm:$0xff] %v440_v12  ;;  %v390_v45 = vadd.f32 %v4302_v30, %v351_v32  ;;  %v391_v52 = vadd.f32 %v4302_v30, %v352_v37  ;;  %v3164_v55 = vunpack.c.h.bf16 %v3259_v18 }
  0x31   : > { %v4395_v2 = vadd.f32 %v4302_v30, %v370_v56  ;;  %3412 = vmatpush3.bf16.msra.mxu1 %v4037_v40  ;;  %3685 = vmatprep.subr.bf16.mxu0 %v4198_v5  ;;  %v4410_v26 = vadd.f32 %v4302_v30, %v371_v4  ;;  %v4413_v27 = vadd.f32 %v4302_v30, %v372_v6  ;;  %v832_v49 = vld [vmem:[#allocation2 + $0x10a] sm:$0xff]  ;;  %v833_v50 = vld [vmem:[#allocation2 + $0x112] sm:$0xff] }
  0x32   : > { %v719_v21 = vld [vmem:[#allocation2 + $0x38] sm:$0xff]  ;;  %3413 = vmatprep.subr.bf16.mxu1 %v4038_v48  ;;  %v373_v39 = vmul.f32 %v3159_v1, %v4294_v25  ;;  %v3248_v48 = vld [vmem:[%s4276_s20 + $0x20] sm:$0xff]   ;;  %v374_v53 = vmul.f32 %v3160_v38, %v4294_v25  ;;  %v422_v58 = vmax.f32 %v390_v45, 0.0  ;;  %v375_v59 = vmul.f32 %v3163_v46, %v4294_v25 }
  0x33   : > { %v441_v22 = vmax.f32 %v4395_v2, 0.0  ;;  %v4416_v35 = vpack.c.bf16 %v719_v21, %v718_v9  ;;  %v442_v40 = vmax.f32 %v4410_v26, 0.0  ;;  %v443_v44 = vmax.f32 %v4413_v27, 0.0  ;;  %v3249_v9 = vld [vmem:[%s4276_s20 + $0x28] sm:$0xff]   ;;  %v4044_v45 = vld [vmem:[%s5192_s1 + $0x60] sm:$0xff]  }
  0x34   : > { %3686 = vmatpush3.bf16.msra.mxu0 %v4198_v5  ;;  %v4435_v54 = vadd.f32 %v4302_v30, %v373_v39  ;;  %v854_v5 = vpack.c.bf16 %v833_v50, %v832_v49  ;;  %v3119_v61 = vunpack.c.l.bf16 %v3248_v48  ;;  %v423_v4 = vmax.f32 %v391_v52, 0.0  ;;  %v720_v16 = vld [vmem:[#allocation2 + $0x48] sm:$0xff]  ;;  %498 = vst [vmem:[#allocation2 + $0x61] sm:$0xff] %v422_v58  ;;  %v4043_v39 = vld [vmem:[%s5192_s1 + $0x18] sm:$0xff]   ;;  %v524_v2 = vld [vmem:[#allocation2] sm:$0xff] }
  0x35   : > { %517 = vst [vmem:[#allocation2 + $0x141] sm:$0xff] %v441_v22  ;;  %v834_v51 = vld [vmem:[#allocation2 + $0x122] sm:$0xff]  ;;  %3687 = vmatprep.subr.bf16.mxu0 %v4210_v8  ;;  %3414 = vmatpush3.bf16.msra.mxu1 %v4039_v19  ;;  %v835_v56 = vld [vmem:[#allocation2 + $0x12a] sm:$0xff]  ;;  %518 = vst [vmem:[#allocation2 + $0x151] sm:$0xff] %v442_v40  ;;  %v4451_v6 = vadd.f32 %v4302_v30, %v374_v53  ;;  %v376_v18 = vmul.f32 %v3164_v55, %v4294_v25  ;;  %v3120_v21 = vunpack.c.h.bf16 %v3248_v48 }
  0x36   : > { %519 = vst [vmem:[#allocation2 + $0x159] sm:$0xff] %v443_v44  ;;  %v855_v62 = vpack.c.bf16 %v835_v56, %v834_v51  ;;  %3415 = vmatprep.subr.bf16.mxu1 %v4040_v36  ;;  %v444_v7 = vmax.f32 %v4435_v54, 0.0  ;;  %3719 = vmatprep.mubr.bf16.mxu1 %v854_v5  ;;  %v721_v1 = vld [vmem:[#allocation2 + $0x50] sm:$0xff]  ;;  %v4458_v19 = vadd.f32 %v4302_v30, %v375_v59  ;;  %499 = vst [vmem:[#allocation2 + $0x69] sm:$0xff] %v423_v4 }
  0x37   : > { %1093 = vmatmul.mubr.bf16.gmra.mrb[4].mxu0 %v4416_v35  ;;  %v353_v32 = vmul.f32 %v3119_v61, %v4294_v25  ;;  %v3250_v36 = vld [vmem:[%s4276_s20 + $0x30] sm:$0xff]   ;;  %v4462_v37 = vpack.c.bf16 %v721_v1, %v720_v16  ;;  %v445_v38 = vmax.f32 %v4451_v6, 0.0  ;;  %v4475_v46 = vadd.f32 %v4302_v30, %v376_v18 }
  0x38   : > { %1100 = vmatprep.mubr.bf16.mxu0 %v4400_v10  ;;  %3720 = vmatmul.mubr.bf16.gmra.mrb[4].mxu1 %v855_v62  ;;  %520 = vst [vmem:[#allocation2 + $0x169] sm:$0xff] %v444_v7  ;;  %v446_v48 = vmax.f32 %v4458_v19, 0.0  ;;  %v354_v49 = vmul.f32 %v3120_v21, %v4294_v25  ;;  %v4484_v53 = vpack.c.bf16 %v423_v4, %v422_v58  ;;  %v3123_v55 = vunpack.c.l.bf16 %v3249_v9  ;;  %v4045_v21 = vld [vmem:[%s5192_s1 + $0x20] sm:$0xff]   ;;  %v4054_v6 = vld [vmem:[%s5192_s1 + $0x90] sm:$0xff]  }
  0x39   : > { %3688 = vmatpush3.bf16.msra.mxu0 %v4210_v8  ;;  %3416 = vmatpush3.bf16.msra.mxu1 %v4041_v57  ;;  %v4480_v50 = vadd.f32 %v4302_v30, %v353_v32  ;;  %v3251_v8 = vld [vmem:[%s4276_s20 + $0x38] sm:$0xff]   ;;  %521 = vst [vmem:[#allocation2 + $0x171] sm:$0xff] %v445_v38  ;;  %v3124_v5 = vunpack.c.h.bf16 %v3249_v9  ;;  %v3127_v56 = vunpack.c.l.bf16 %v3250_v36  ;;  %v447_v59 = vmax.f32 %v4475_v46, 0.0  ;;  %v4056_v46 = vld [vmem:[%s5192_s1 + $0xa0] sm:$0xff]  }
  0x3a   : > { %3689 = vmatprep.subr.bf16.mxu0 %v4223_v11  ;;  %3417 = vmatprep.subr.bf16.mxu1 %v4042_v63  ;;  %522 = vst [vmem:[#allocation2 + $0x181] sm:$0xff] %v446_v48  ;;  %v393_v61 = vadd.f32 %v4302_v30, %v354_v49  ;;  %v355_v58 = vmul.f32 %v3123_v55, %v4294_v25  ;;  %v3128_v1 = vunpack.c.h.bf16 %v3250_v36  ;;  %v3131_v49 = vunpack.c.l.bf16 %v3251_v8 }
  0x3b   : > { %v424_v62 = vmax.f32 %v4480_v50, 0.0  ;;  %v356_v4 = vmul.f32 %v3124_v5, %v4294_v25  ;;  %v357_v9 = vmul.f32 %v3127_v56, %v4294_v25  ;;  %523 = vst [vmem:[#allocation2 + $0x189] sm:$0xff] %v447_v59  ;;  %v3132_v50 = vunpack.c.h.bf16 %v3251_v8  ;;  %v4047_v56 = vld [vmem:[%s5192_s1 + $0x28] sm:$0xff]  }
  0x3c   : > { %v836_v51 = vld [vmem:[#allocation2 + $0x13a] sm:$0xff]  ;;  %v837_v52 = vld [vmem:[#allocation2 + $0x142] sm:$0xff]  ;;  %v425_v32 = vmax.f32 %v393_v61, 0.0  ;;  %v4507_v36 = vadd.f32 %v4302_v30, %v355_v58  ;;  %v4583_v31 = vpack.c.bf16 %v443_v44, %v442_v40  ;;  %v556_v27 = vpack.c.bf16 %v4093_v3, %v524_v2 }
  0x3d   : > { %v856_v57 = vpack.c.bf16 %v837_v52, %v836_v51  ;;  %v838_v63 = vld [vmem:[#allocation2 + $0x152] sm:$0xff]  ;;  %v839_v16 = vld [vmem:[#allocation2 + $0x15a] sm:$0xff]  ;;  %3690 = vmatpush3.bf16.msra.mxu0 %v4223_v11  ;;  %3418 = vmatpush3.bf16.msra.mxu1 %v4043_v39  ;;  %500 = vst [vmem:[#allocation2 + $0x79] sm:$0xff] %v424_v62  ;;  %v4046_v11 = vld [vmem:[%s5192_s1 + $0x68] sm:$0xff]   ;;  %v4510_v39 = vadd.f32 %v4302_v30, %v356_v4 }
  0x3e   : > { %v857_v18 = vpack.c.bf16 %v839_v16, %v838_v63  ;;  %3419 = vmatprep.subr.bf16.mxu1 %v4044_v45  ;;  %v358_v51 = vmul.f32 %v3128_v1, %v4294_v25  ;;  %v722_v52 = vld [vmem:[#allocation2 + $0x60] sm:$0xff]  ;;  %v723_v55 = vld [vmem:[#allocation2 + $0x68] sm:$0xff]  ;;  %501 = vst [vmem:[#allocation2 + $0x81] sm:$0xff] %v425_v32  ;;  %v4515_v8 = vadd.f32 %v4302_v30, %v357_v9 }
  0x3f   : > { %3723 = vmatprep.mubr.bf16.mxu1 %v856_v57  ;;  %1101 = vmatmul.mubr.bf16.gmra.mrb[8].mxu0 %v4462_v37  ;;  %v359_v45 = vmul.f32 %v3131_v49, %v4294_v25  ;;  %v360_v5 = vmul.f32 %v3132_v50, %v4294_v25  ;;  %v426_v57 = vmax.f32 %v4507_v36, 0.0  ;;  %v427_v61 = vmax.f32 %v4510_v39, 0.0  ;;  %v572_v49 = vld [vmem:[#allocation2 + $0x1] sm:$0xff]  ;;  %v573_v50 = vld [vmem:[#allocation2 + $0x9] sm:$0xff] }
  0x40   : > { %1108 = vmatprep.mubr.bf16.mxu0 %v4484_v53  ;;  %3724 = vmatmul.mubr.bf16.gmra.mrb[8].mxu1 %v857_v18  ;;  %v4525_v63 = vadd.f32 %v4302_v30, %v358_v51  ;;  %v840_v16 = vld [vmem:[#allocation2 + $0x16a] sm:$0xff]  ;;  %v841_v58 = vld [vmem:[#allocation2 + $0x172] sm:$0xff]  ;;  %v428_v4 = vmax.f32 %v4515_v8, 0.0  ;;  %v4536_v18 = vpack.c.bf16 %v723_v55, %v722_v52  ;;  %v4553_v39 = vpack.c.bf16 %v437_v41, %v436_v34  ;;  %v4059_v40 = vld [vmem:[%s5192_s1 + $0x1c0] sm:$0xff]  }
  0x41   : > { %3691 = vmatprep.subr.bf16.mxu0 %v4238_v14  ;;  %3420 = vmatpush3.bf16.msra.mxu1 %v4045_v21  ;;  %v4530_v25 = vadd.f32 %v4302_v30, %v359_v45  ;;  %v4533_v1 = vadd.f32 %v4302_v30, %v360_v5  ;;  %v858_v9 = vpack.c.bf16 %v841_v58, %v840_v16  ;;  %v4048_v21 = vld [vmem:[%s5192_s1 + $0x70] sm:$0xff]   ;;  %v4053_v44 = vld [vmem:[%s5192_s1 + $0x88] sm:$0xff]   ;;  %v732_v45 = vld [vmem:[#allocation2 + $0xd8] sm:$0xff] }
  0x42   : > { %3692 = vmatpush3.bf16.msra.mxu0 %v4238_v14  ;;  %3421 = vmatprep.subr.bf16.mxu1 %v4046_v11  ;;  %502 = vst [vmem:[#allocation2 + $0x91] sm:$0xff] %v426_v57  ;;  %503 = vst [vmem:[#allocation2 + $0x99] sm:$0xff] %v427_v61  ;;  %v429_v36 = vmax.f32 %v4525_v63, 0.0  ;;  %v4543_v30 = vpack.c.bf16 %v425_v32, %v424_v62  ;;  %v842_v51 = vld [vmem:[#allocation2 + $0x182] sm:$0xff]  ;;  %v843_v52 = vld [vmem:[#allocation2 + $0x18a] sm:$0xff]  ;;  %v4559_v62 = vpack.c.bf16 %v439_v43, %v438_v42 }
  0x43   : > { %3693 = vmatprep.subr.bf16.mxu0 %v4255_v17  ;;  %504 = vst [vmem:[#allocation2 + $0xa9] sm:$0xff] %v428_v4  ;;  %v430_v14 = vmax.f32 %v4530_v25, 0.0  ;;  %v431_v11 = vmax.f32 %v4533_v1, 0.0  ;;  %3727 = vmatprep.mubr.bf16.mxu1 %v858_v9  ;;  %v4565_v32 = vpack.c.bf16 %v441_v22, %v440_v12  ;;  %v859_v24 = vpack.c.bf16 %v843_v52, %v842_v51  ;;  %v4052_v22 = vld [vmem:[%s5192_s1 + $0x80] sm:$0xff]   ;;  %v4058_v8 = vld [vmem:[%s5192_s1 + $0xb0] sm:$0xff]   ;;  %v740_v1 = vld [vmem:[#allocation2 + $0x138] sm:$0xff] }
  0x44   : > { %505 = vst [vmem:[#allocation2 + $0xb1] sm:$0xff] %v429_v36  ;;  %v604_v34 = vpack.c.bf16 %v573_v50, %v572_v49  ;;  %v4589_v41 = vpack.c.bf16 %v445_v38, %v444_v7  ;;  %v4597_v43 = vpack.c.bf16 %v447_v59, %v446_v48  ;;  %v4608_v26 = vpack.c.bf16 %v427_v61, %v426_v57  ;;  %v733_v5 = vld [vmem:[#allocation2 + $0xe0] sm:$0xff]  ;;  %v734_v57 = vld [vmem:[#allocation2 + $0xf0] sm:$0xff]  ;;  %v736_v61 = vld [vmem:[#allocation2 + $0x108] sm:$0xff] }
  0x45   : > { %3422 = vmatpush3.bf16.msra.mxu1 %v4047_v56  ;;  %506 = vst [vmem:[#allocation2 + $0xc1] sm:$0xff] %v430_v14  ;;  %507 = vst [vmem:[#allocation2 + $0xc9] sm:$0xff] %v431_v11  ;;  %v725_v42 = vld [vmem:[#allocation2 + $0x80] sm:$0xff]  ;;  %v4629_v7 = vpack.c.bf16 %v429_v36, %v428_v4  ;;  %v4647_v48 = vpack.c.bf16 %v431_v11, %v430_v14  ;;  %v4673_v56 = vpack.c.bf16 %v733_v5, %v732_v45  ;;  %v737_v63 = vld [vmem:[#allocation2 + $0x110] sm:$0xff] }
  0x46   : > { %3694 = vmatpush3.bf16.msra.mxu0 %v4255_v17  ;;  %3423 = vmatprep.subr.bf16.mxu1 %v4048_v21  ;;  %v724_v17 = vld [vmem:[#allocation2 + $0x78] sm:$0xff]  ;;  %v4686_v16 = vpack.c.bf16 %v737_v63, %v736_v61  ;;  %v738_v58 = vld [vmem:[#allocation2 + $0x120] sm:$0xff]  ;;  %v739_v4 = vld [vmem:[#allocation2 + $0x128] sm:$0xff] }
  0x47   : > { %1109 = vmatmul.mubr.bf16.gmra.mrb[12].mxu0 %v4536_v18  ;;  %3695 = vmatprep.subr.bf16.mxu0 %v4269_v20  ;;  %v4602_v12 = vpack.c.bf16 %v725_v42, %v724_v17  ;;  %v4692_v25 = vpack.c.bf16 %v739_v4, %v738_v58  ;;  %v741_v9 = vld [vmem:[#allocation2 + $0x140] sm:$0xff]  ;;  %v742_v49 = vld [vmem:[#allocation2 + $0x150] sm:$0xff]  ;;  %v743_v50 = vld [vmem:[#allocation2 + $0x158] sm:$0xff] }
  0x48   : > { %1116 = vmatprep.mubr.bf16.mxu0 %v4543_v30  ;;  %3728 = vmatmul.mubr.bf16.gmra.mrb[12].mxu1 %v859_v24  ;;  %v4698_v21 = vpack.c.bf16 %v741_v9, %v740_v1  ;;  %v4704_v36 = vpack.c.bf16 %v743_v50, %v742_v49  ;;  %v744_v14 = vld [vmem:[#allocation2 + $0x168] sm:$0xff]  ;;  %v745_v11 = vld [vmem:[#allocation2 + $0x170] sm:$0xff]  ;;  %v746_v52 = vld [vmem:[#allocation2 + $0x180] sm:$0xff] }
  0x49   : > { %3424 = vmatpush3.bf16.msra.mxu1 %v4049_v28  ;;  %1550 = vmatprep.mubr.bf16.mxu1 %v604_v34  ;;  %v727_v54 = vld [vmem:[#allocation2 + $0x98] sm:$0xff]  ;;  %v4710_v51 = vpack.c.bf16 %v745_v11, %v744_v14  ;;  %v813_v28 = vld [vmem:[#allocation2 + $0x22] sm:$0xff]  ;;  %v816_v42 = vld [vmem:[#allocation2 + $0x4a] sm:$0xff] }
  0x4a   : > { %3425 = vmatprep.subr.bf16.mxu1 %v4050_v29  ;;  %3696 = vmatpush3.bf16.msra.mxu0 %v4269_v20  ;;  %v726_v20 = vld [vmem:[#allocation2 + $0x90] sm:$0xff]  ;;  %v728_v19 = vld [vmem:[#allocation2 + $0xa8] sm:$0xff]  ;;  %v812_v24 = vld [vmem:[#allocation2 + $0x1a] sm:$0xff] }
  0x4b   : > { %3697 = vmatprep.subr.bf16.mxu0 %v4288_v23  ;;  %v4622_v3 = vpack.c.bf16 %v727_v54, %v726_v20  ;;  %v4718_v29 = vpack.c.bf16 %v813_v28, %v812_v24  ;;  %v815_v17 = vld [vmem:[#allocation2 + $0x3a] sm:$0xff]  ;;  %v821_v54 = vld [vmem:[#allocation2 + $0x82] sm:$0xff]  ;;  %v4072_v63 = vld [vmem:[%s5192_s1 + $0x1f0] sm:$0xff]  }
  0x4c   : > { %v731_v59 = vld [vmem:[#allocation2 + $0xc8] sm:$0xff]  ;;  %v820_v20 = vld [vmem:[#allocation2 + $0x7a] sm:$0xff]  ;;  %v1889_v58 = vld [vmem:[#allocation2 + $0x31] sm:$0xff] }
  0x4d   : > { %3426 = vmatpush3.bf16.msra.mxu1 %v4051_v0  ;;  %v4069_v5 = vld [vmem:[%s5192_s1 + $0x1a0] sm:$0xff]   ;;  %v827_v61 = vld [vmem:[#allocation2 + $0xca] sm:$0xff]  ;;  %v4074_v11 = vld [vmem:[%s5192_s1 + $0x1f8] sm:$0xff]  }
  0x4e   : > { %3731 = vmatprep.subr.bf16.mxu1 %v4052_v22  ;;  %3698 = vmatpush3.bf16.msra.mxu0 %v4288_v23  ;;  %v4055_v23 = vld [vmem:[%s5192_s1 + $0x98] sm:$0xff]   ;;  %v620_v9 = vld [vmem:[#allocation2 + $0x2] sm:$0xff]  ;;  %v621_v49 = vld [vmem:[#allocation2 + $0xa] sm:$0xff] }
  0x4f   : > { %1117 = vmatmul.mubr.bf16.gmra.mrb[16].mxu0 %v4602_v12  ;;  %3547 = vmatprep.subr.bf16.mxu0 %v4059_v40  ;;  %v819_v40 = vld [vmem:[#allocation2 + $0x6a] sm:$0xff]  ;;  %v1890_v4 = vld [vmem:[#allocation2 + $0x39] sm:$0xff] }
  0x50   : > { %1124 = vmatprep.mubr.bf16.mxu0 %v4608_v26  ;;  %1551 = vmatmul.mubr.bf16.vlgmr.msra.gmra.mrb[16].mxu1 %v556_v27  ;;  %v4062_v27 = vld [vmem:[%s5192_s1 + $0x188] sm:$0xff]   ;;  %v4073_v50 = vld [vmem:[%s5192_s1 + $0x1b0] sm:$0xff]   ;;  %v1921_v14 = vpack.c.bf16 %v1890_v4, %v1889_v58  ;;  %v1842_v24 = vld [vmem:[#allocation2 + $0x38] sm:$0xff] }
  0x51   : > { %3732 = vmatpush3.bf16.msra.mxu1 %v4052_v22  ;;  %1558 = vmatprep.mubr.bf16.mxu1 %v4329_v60  ;;  %v729_v60 = vld [vmem:[#allocation2 + $0xb0] sm:$0xff]  ;;  %v4061_v22 = vld [vmem:[%s5192_s1 + $0x1c8] sm:$0xff]  }
  0x52   : > { %3733 = vmatprep.subr.bf16.mxu1 %v4053_v44  ;;  %v4638_v38 = vpack.c.bf16 %v729_v60, %v728_v19  ;;  %v4749_v19 = vpack.c.bf16 %v821_v54, %v820_v20  ;;  %v4065_v60 = vld [vmem:[%s5192_s1 + $0x1d8] sm:$0xff]   ;;  %v1891_v28 = vld [vmem:[#allocation2 + $0x49] sm:$0xff] }
  0x53   : > { %v4081_v54 = vld [vmem:[%s5192_s1 + $0x228] sm:$0xff]  }
  0x55   : > { %3734 = vmatpush3.bf16.msra.mxu1 %v4053_v44  ;;  %v4063_v44 = vld [vmem:[%s5192_s1 + $0x1d0] sm:$0xff]  }
  0x56   : > { %3735 = vmatprep.subr.bf16.mxu1 %v4054_v6 }
  0x57   : > { %1125 = vmatmul.mubr.bf16.gmra.mrb[20].mxu0 %v4622_v3 }
  0x58   : > { %1132 = vmatprep.mubr.bf16.mxu0 %v4629_v7  ;;  %1559 = vmatmul.mubr.bf16.gmra.mrb[20].mxu1 %v4370_v47  ;;  %v4057_v47 = vld [vmem:[%s5192_s1 + $0xa8] sm:$0xff]  }
  0x59   : > { %1566 = vmatprep.mubr.bf16.mxu1 %v4358_v33  ;;  %3736 = vmatpush3.bf16.msra.mxu1 %v4054_v6  ;;  %v730_v33 = vld [vmem:[#allocation2 + $0xc0] sm:$0xff] }
  0x5a   : > { %3737 = vmatprep.subr.bf16.mxu1 %v4055_v23  ;;  %v4656_v55 = vpack.c.bf16 %v731_v59, %v730_v33  ;;  %v4068_v33 = vld [vmem:[%s5192_s1 + $0x1e0] sm:$0xff]   ;;  %v824_v59 = vld [vmem:[#allocation2 + $0xaa] sm:$0xff] }
  0x5d   : > { %3738 = vmatpush3.bf16.msra.mxu1 %v4055_v23  ;;  %v4064_v23 = vld [vmem:[%s5192_s1 + $0x190] sm:$0xff]  }
  0x5e   : > { %3739 = vmatprep.subr.bf16.mxu1 %v4056_v46 }
  0x5f   : > { %1133 = vmatmul.mubr.bf16.gmra.mrb[24].mxu0 %v4638_v38 }
  0x60   : > { %1140 = vmatprep.mubr.bf16.mxu0 %v4647_v48  ;;  %1567 = vmatmul.mubr.bf16.gmra.mrb[24].mxu1 %v4416_v35  ;;  %v4067_v35 = vld [vmem:[%s5192_s1 + $0xb8] sm:$0xff]  }
  0x61   : > { %1574 = vmatprep.mubr.bf16.mxu1 %v4400_v10  ;;  %3740 = vmatpush3.bf16.msra.mxu1 %v4056_v46  ;;  %v4671_v10 = vld [vmem:[%s5192_s1 + $0x200] sm:$0xff]   ;;  %v822_v46 = vld [vmem:[#allocation2 + $0x92] sm:$0xff] }
  0x62   : > { %3741 = vmatprep.subr.bf16.mxu1 %v4057_v47 }
  0x65   : > { %3742 = vmatpush3.bf16.msra.mxu1 %v4057_v47  ;;  %v823_v47 = vld [vmem:[#allocation2 + $0x9a] sm:$0xff] }
  0x66   : > { %3743 = vmatprep.subr.bf16.mxu1 %v4058_v8  ;;  %v4764_v45 = vpack.c.bf16 %v823_v47, %v822_v46  ;;  %v641_v46 = vld [vmem:[#allocation2 + $0xfa] sm:$0xff] }
  0x67   : > { %1141 = vmatmul.mubr.bf16.gmra.mrb[28].mxu0 %v4656_v55 }
  0x68   : > { %1148 = vmatprep.mubr.bf16.mxu0 %v4339_v13  ;;  %1575 = vmatmul.mubr.bf16.gmra.mrb[28].mxu1 %v4462_v37  ;;  %v735_v37 = vld [vmem:[#allocation2 + $0xf8] sm:$0xff] }
  0x69   : > { %1582 = vmatprep.mubr.bf16.mxu1 %v4484_v53  ;;  %3744 = vmatpush3.bf16.msra.mxu1 %v4058_v8  ;;  %v4680_v53 = vpack.c.bf16 %v735_v37, %v734_v57  ;;  %v825_v8 = vld [vmem:[#allocation2 + $0xb2] sm:$0xff]  ;;  %v4070_v57 = vld [vmem:[%s5192_s1 + $0x1e8] sm:$0xff]  }
  0x6a   : > { %3745 = vmatprep.subr.bf16.mxu1 %v4067_v35  ;;  %v826_v37 = vld [vmem:[#allocation2 + $0xc2] sm:$0xff] }
  0x6b   : > { %v4784_v1 = vpack.c.bf16 %v827_v61, %v826_v37  ;;  %v647_v37 = vld [vmem:[#allocation2 + $0x142] sm:$0xff]  ;;  %v648_v61 = vld [vmem:[#allocation2 + $0x152] sm:$0xff] }
  0x6d   : > { %3746 = vmatpush3.bf16.msra.mxu1 %v4067_v35  ;;  %v4769_v35 = vpack.c.bf16 %v825_v8, %v824_v59  ;;  %v644_v59 = vld [vmem:[#allocation2 + $0x122] sm:$0xff]  ;;  %v645_v8 = vld [vmem:[#allocation2 + $0x12a] sm:$0xff] }
  0x6e   : > { %3779 = vmatprep.subr.bf16.mxu1 %v4671_v10 }
  0x6f   : > { %1149 = vmatmul.mubr.bf16.gmra.mrb[32].mxu0 %v4673_v56 }
  0x70   : > { %1156 = vmatprep.mubr.bf16.mxu0 %v4341_v15  ;;  %1583 = vmatmul.mubr.bf16.gmra.mrb[32].mxu1 %v4536_v18 }
  0x71   : > { %1590 = vmatprep.mubr.bf16.mxu1 %v4543_v30 }
  0x77   : > { %1157 = vmatmul.mubr.bf16.gmra.mrb[36].mxu0 %v4680_v53 }
  0x78   : > { %1164 = vmatprep.mubr.bf16.mxu0 %v4553_v39  ;;  %1591 = vmatmul.mubr.bf16.gmra.mrb[36].mxu1 %v4602_v12 }
  0x79   : > { %1598 = vmatprep.mubr.bf16.mxu1 %v4608_v26 }
  0x7f   : > { %1165 = vmatmul.mubr.bf16.gmra.mrb[40].mxu0 %v4686_v16 }
  0x80   : > { %1172 = vmatprep.mubr.bf16.mxu0 %v4559_v62  ;;  %1599 = vmatmul.mubr.bf16.gmra.mrb[40].mxu1 %v4622_v3 }
  0x81   : > { %1606 = vmatprep.mubr.bf16.mxu1 %v4629_v7 }
  0x87   : > { %1173 = vmatmul.mubr.bf16.gmra.mrb[44].mxu0 %v4692_v25 }
  0x88   : > { %1180 = vmatprep.mubr.bf16.mxu0 %v4565_v32  ;;  %1607 = vmatmul.mubr.bf16.gmra.mrb[44].mxu1 %v4638_v38 }
  0x89   : > { %1614 = vmatprep.mubr.bf16.mxu1 %v4647_v48 }
  0x8f   : > { %1181 = vmatmul.mubr.bf16.gmra.mrb[48].mxu0 %v4698_v21 }
  0x90   : > { %1188 = vmatprep.mubr.bf16.mxu0 %v4583_v31  ;;  %1615 = vmatmul.mubr.bf16.gmra.mrb[48].mxu1 %v4656_v55 }
  0x91   : > { %1622 = vmatprep.mubr.bf16.mxu1 %v4339_v13  ;;  %v747_v13 = vld [vmem:[#allocation2 + $0x188] sm:$0xff] }
  0x92   : > { %v4716_v34 = vpack.c.bf16 %v747_v13, %v746_v52  ;;  %v652_v52 = vpack.c.bf16 %v621_v49, %v620_v9  ;;  %v1841_v13 = vld [vmem:[#allocation2 + $0x30] sm:$0xff] }
  0x97   : > { %1189 = vmatmul.mubr.bf16.gmra.mrb[52].mxu0 %v4704_v36 }
  0x98   : > { %1196 = vmatprep.mubr.bf16.mxu0 %v4589_v41  ;;  %1623 = vmatmul.mubr.bf16.gmra.mrb[52].mxu1 %v4673_v56 }
  0x99   : > { %1630 = vmatprep.mubr.bf16.mxu1 %v4341_v15  ;;  %v814_v15 = vld [vmem:[#allocation2 + $0x32] sm:$0xff] }
  0x9a   : > { %v4724_v0 = vpack.c.bf16 %v815_v17, %v814_v15  ;;  %v1892_v15 = vld [vmem:[#allocation2 + $0x51] sm:$0xff]  ;;  %v1873_v17 = vpack.c.bf16 %v1842_v24, %v1841_v13 }
  0x9f   : > { %1197 = vmatmul.mubr.bf16.gmra.mrb[56].mxu0 %v4710_v51 }
  0xa0   : > { %1204 = vmatprep.mubr.bf16.mxu0 %v4597_v43  ;;  %1631 = vmatmul.mubr.bf16.gmra.mrb[56].mxu1 %v4680_v53  ;;  %v817_v43 = vld [vmem:[#allocation2 + $0x52] sm:$0xff] }
  0xa1   : > { %1638 = vmatprep.mubr.bf16.mxu1 %v4553_v39  ;;  %v4060_v39 = vld [vmem:[%s5192_s1 + $0x180] sm:$0xff]   ;;  %v4729_v2 = vpack.c.bf16 %v817_v43, %v816_v42  ;;  %v1922_v42 = vpack.c.bf16 %v1892_v15, %v1891_v28  ;;  %v4077_v43 = vld [vmem:[%s5192_s1 + $0x208] sm:$0xff]  }
  0xa7   : > { %1205 = vmatmul.mubr.bf16.gmra.mrb[60].mxu0 %v4716_v34 }
  0xa8   : > { %3699 = vmatprep.mubr.bf16.mxu0 %v4718_v29  ;;  %1639 = vmatmul.mubr.bf16.gmra.mrb[60].mxu1 %v4686_v16 }
  0xa9   : > { %1646 = vmatprep.mubr.bf16.mxu1 %v4559_v62  ;;  %v818_v62 = vld [vmem:[#allocation2 + $0x62] sm:$0xff] }
  0xaa   : > { %v4744_v6 = vpack.c.bf16 %v819_v40, %v818_v62  ;;  %v1894_v62 = vld [vmem:[#allocation2 + $0x69] sm:$0xff] }
  0xaf   : > { %3700 = vmatmul.mubr.bf16.vlgmr.msra.gmra.mrb[64].mxu0 %v4724_v0 }
  0xb0   : > { %3548 = vmatpush3.bf16.msra.mxu0 %v4060_v39  ;;  %3703 = vmatprep.mubr.bf16.mxu0 %v4729_v2  ;;  %v1843_v39 = vld [vmem:[#allocation2 + $0x48] sm:$0xff] }
  0xb1   : > { %1647 = vmatmul.mubr.bf16.gmra.mrb[64].mxu1 %v4692_v25  ;;  %3549 = vmatprep.subr.bf16.mxu0 %v4061_v22  ;;  %v1844_v22 = vld [vmem:[#allocation2 + $0x50] sm:$0xff] }
  0xb2   : > { %1654 = vmatprep.mubr.bf16.mxu1 %v4565_v32  ;;  %v4066_v32 = vld [vmem:[%s5192_s1 + $0x198] sm:$0xff]   ;;  %v1874_v40 = vpack.c.bf16 %v1844_v22, %v1843_v39 }
  0xb4   : > { %3550 = vmatpush3.bf16.msra.mxu0 %v4062_v27  ;;  %v1893_v27 = vld [vmem:[#allocation2 + $0x61] sm:$0xff] }
  0xb5   : > { %3551 = vmatprep.subr.bf16.mxu0 %v4063_v44  ;;  %v4078_v44 = vld [vmem:[%s5192_s1 + $0x210] sm:$0xff]   ;;  %v1923_v20 = vpack.c.bf16 %v1894_v62, %v1893_v27 }
  0xb7   : > { %3704 = vmatmul.mubr.bf16.gmra.mrb[68].mxu0 %v4744_v6 }
  0xb8   : > { %3552 = vmatpush3.bf16.msra.mxu0 %v4064_v23  ;;  %3707 = vmatprep.mubr.bf16.mxu0 %v4749_v19  ;;  %v4082_v23 = vld [vmem:[%s5192_s1 + $0x230] sm:$0xff]  }
  0xb9   : > { %1655 = vmatmul.mubr.bf16.gmra.mrb[68].mxu1 %v4698_v21  ;;  %3553 = vmatprep.subr.bf16.mxu0 %v4065_v60  ;;  %v639_v60 = vld [vmem:[#allocation2 + $0xe2] sm:$0xff] }
  0xba   : > { %1662 = vmatprep.mubr.bf16.mxu1 %v4583_v31  ;;  %v4071_v31 = vld [vmem:[%s5192_s1 + $0x1a8] sm:$0xff]  }
  0xbc   : > { %3554 = vmatpush3.bf16.msra.mxu0 %v4066_v32  ;;  %v640_v32 = vld [vmem:[#allocation2 + $0xf2] sm:$0xff] }
  0xbd   : > { %3555 = vmatprep.subr.bf16.mxu0 %v4068_v33  ;;  %v643_v33 = vld [vmem:[#allocation2 + $0x112] sm:$0xff] }
  0xbf   : > { %3708 = vmatmul.mubr.bf16.gmra.mrb[72].mxu0 %v4764_v45 }
  0xc0   : > { %3556 = vmatpush3.bf16.msra.mxu0 %v4069_v5  ;;  %3711 = vmatprep.mubr.bf16.mxu0 %v4769_v35 }
  0xc1   : > { %1663 = vmatmul.mubr.bf16.gmra.mrb[72].mxu1 %v4704_v36  ;;  %3557 = vmatprep.subr.bf16.mxu0 %v4070_v57  ;;  %v4841_v57 = vpack.c.bf16 %v645_v8, %v644_v59 }
  0xc2   : > { %1670 = vmatprep.mubr.bf16.mxu1 %v4589_v41  ;;  %v4075_v41 = vld [vmem:[%s5192_s1 + $0x1b8] sm:$0xff]  }
  0xc4   : > { %3558 = vmatpush3.bf16.msra.mxu0 %v4071_v31  ;;  %v646_v31 = vld [vmem:[#allocation2 + $0x13a] sm:$0xff] }
  0xc5   : > { %3559 = vmatprep.subr.bf16.mxu0 %v4072_v63  ;;  %v649_v63 = vld [vmem:[#allocation2 + $0x15a] sm:$0xff]  ;;  %v4847_v4 = vpack.c.bf16 %v647_v37, %v646_v31 }
  0xc6   : > { %v4849_v9 = vpack.c.bf16 %v649_v63, %v648_v61 }
  0xc7   : > { %3712 = vmatmul.mubr.bf16.gmra.mrb[76].mxu0 %v4784_v1 }
  0xc8   : > { %3560 = vmatpush3.bf16.msra.mxu0 %v4073_v50  ;;  %2209 = vmatprep.mubr.bf16.mxu0 %v1921_v14  ;;  %v650_v50 = vld [vmem:[#allocation2 + $0x16a] sm:$0xff]  ;;  %v651_v14 = vld [vmem:[#allocation2 + $0x172] sm:$0xff] }
  0xc9   : > { %1671 = vmatmul.mubr.bf16.gmra.mrb[76].mxu1 %v4710_v51  ;;  %3561 = vmatprep.subr.bf16.mxu0 %v4074_v11  ;;  %v4856_v28 = vpack.c.bf16 %v651_v14, %v650_v50 }
  0xca   : > { %3747 = vmatprep.mubr.bf16.mxu1 %v652_v52 }
  0xcc   : > { %3562 = vmatpush3.bf16.msra.mxu0 %v4075_v41 }
  0xcf   : > { %2210 = vmatmul.mubr.bf16.vlgmr.msra.gmra.mrb[80].mxu0 %v1873_v17  ;;  %v1908_v17 = vld [vmem:[#allocation2 + $0x111] sm:$0xff] }
  0xd0   : > { %2217 = vmatprep.mubr.bf16.mxu0 %v1922_v42 }
  0xd1   : > { %3748 = vmatmul.mubr.bf16.vlgmr.msra.gmra.mrb[80].mxu1 %v4718_v29  ;;  %v4079_v29 = vld [vmem:[%s5192_s1 + $0x218] sm:$0xff]  }
  0xd2   : > { %3780 = vmatpush3.bf16.msra.mxu1 %v4671_v10  ;;  %3751 = vmatprep.mubr.bf16.mxu1 %v4724_v0  ;;  %v4080_v10 = vld [vmem:[%s5192_s1 + $0x220] sm:$0xff]  }
  0xd3   : > { %3781 = vmatprep.subr.bf16.mxu1 %v4077_v43 }
  0xd6   : > { %3782 = vmatpush3.bf16.msra.mxu1 %v4077_v43 }
  0xd7   : > { %2218 = vmatmul.mubr.bf16.gmra.mrb[84].mxu0 %v1874_v40  ;;  %3783 = vmatprep.subr.bf16.mxu1 %v4078_v44 }
  0xd8   : > { %2225 = vmatprep.mubr.bf16.mxu0 %v1923_v20 }
  0xd9   : > { %3752 = vmatmul.mubr.bf16.gmra.mrb[84].mxu1 %v4729_v2 }
  0xda   : > { %3755 = vmatprep.mubr.bf16.mxu1 %v4744_v6  ;;  %3784 = vmatpush3.bf16.msra.mxu1 %v4078_v44  ;;  %v1910_v44 = vld [vmem:[#allocation2 + $0x129] sm:$0xff] }
  0xdb   : > { %3785 = vmatprep.subr.bf16.mxu1 %v4079_v29 }
  0xde   : > { %3786 = vmatpush3.bf16.msra.mxu1 %v4079_v29 }
  0xdf   : > { %2226 = vmatmul.mubr.bf16.gmra.mrb[88].mxu0 %v4536_v18  ;;  %3787 = vmatprep.subr.bf16.mxu1 %v4080_v10  ;;  %v4083_v18 = vld [vmem:[%s5192_s1 + $0x238] sm:$0xff]  }
  0xe0   : > { %2233 = vmatprep.mubr.bf16.mxu0 %v4543_v30  ;;  %v638_v30 = vld [vmem:[#allocation2 + $0xda] sm:$0xff] }
  0xe1   : > { %3756 = vmatmul.mubr.bf16.gmra.mrb[88].mxu1 %v4749_v19  ;;  %v4831_v47 = vpack.c.bf16 %v639_v60, %v638_v30 }
  0xe2   : > { %3759 = vmatprep.mubr.bf16.mxu1 %v4764_v45  ;;  %3788 = vmatpush3.bf16.msra.mxu1 %v4080_v10 }
  0xe3   : > { %3789 = vmatprep.subr.bf16.mxu1 %v4081_v54 }
  0xe6   : > { %3790 = vmatpush3.bf16.msra.mxu1 %v4081_v54 }
  0xe7   : > { %2234 = vmatmul.mubr.bf16.gmra.mrb[92].mxu0 %v4602_v12  ;;  %3791 = vmatprep.subr.bf16.mxu1 %v4082_v23  ;;  %v4833_v12 = vpack.c.bf16 %v641_v46, %v640_v32 }
  0xe8   : > { %2241 = vmatprep.mubr.bf16.mxu0 %v4608_v26  ;;  %v642_v26 = vld [vmem:[#allocation2 + $0x10a] sm:$0xff] }
  0xe9   : > { %3760 = vmatmul.mubr.bf16.gmra.mrb[92].mxu1 %v4769_v35  ;;  %v4839_v5 = vpack.c.bf16 %v643_v33, %v642_v26 }
  0xea   : > { %3763 = vmatprep.mubr.bf16.mxu1 %v4784_v1  ;;  %3792 = vmatpush3.bf16.msra.mxu1 %v4082_v23 }
  0xeb   : > { %3793 = vmatprep.subr.bf16.mxu1 %v4083_v18 }
  0xee   : > { %3794 = vmatpush3.bf16.msra.mxu1 %v4083_v18 }
  0xef   : > { %2242 = vmatmul.mubr.bf16.gmra.mrb[96].mxu0 %v4622_v3  ;;  %v1903_v3 = vld [vmem:[#allocation2 + $0xd9] sm:$0xff] }
  0xf0   : > { %2249 = vmatprep.mubr.bf16.mxu0 %v4629_v7  ;;  %v1904_v7 = vld [vmem:[#allocation2 + $0xe1] sm:$0xff] }
  0xf1   : > { %3764 = vmatmul.mubr.bf16.gmra.mrb[0].mxu1 %v4831_v47  ;;  %v1928_v58 = vpack.c.bf16 %v1904_v7, %v1903_v3 }
  0xf2   : > { %3767 = vmatprep.mubr.bf16.mxu1 %v4833_v12 }
  0xf7   : > { %2250 = vmatmul.mubr.bf16.gmra.mrb[100].mxu0 %v4638_v38  ;;  %v1905_v38 = vld [vmem:[#allocation2 + $0xf1] sm:$0xff] }
  0xf8   : > { %2257 = vmatprep.mubr.bf16.mxu0 %v4647_v48  ;;  %v1906_v48 = vld [vmem:[#allocation2 + $0xf9] sm:$0xff] }
  0xf9   : > { %3768 = vmatmul.mubr.bf16.gmra.mrb[4].mxu1 %v4839_v5  ;;  %v1929_v13 = vpack.c.bf16 %v1906_v48, %v1905_v38  ;;  %v1916_v48 = vld [vmem:[#allocation2 + $0x171] sm:$0xff] }
  0xfa   : > { %3771 = vmatprep.mubr.bf16.mxu1 %v4841_v57 }
  0xff   : > { %2258 = vmatmul.mubr.bf16.gmra.mrb[104].mxu0 %v4656_v55  ;;  %v1907_v55 = vld [vmem:[#allocation2 + $0x109] sm:$0xff] }
 0x100   : > { %2265 = vmatprep.mubr.bf16.mxu0 %v1928_v58  ;;  %v1930_v27 = vpack.c.bf16 %v1908_v17, %v1907_v55 }
 0x101   : > { %3772 = vmatmul.mubr.bf16.gmra.mrb[8].mxu1 %v4847_v4 }
 0x102   : > { %v3291_v49 = vpop.f32.mrb[0].mxu0  ;;  %3775 = vmatprep.mubr.bf16.mxu1 %v4849_v9 }
 0x103   : > { %v3292_v11 = vpop.f32.mrb[1].mxu0 }
 0x104   : > { %v4854_v52 = vadd.f32 %v3292_v11, %v3291_v49  ;;  %v3294_v41 = vpop.f32.mrb[2].mxu0 }
 0x105   : > { %v3295_v24 = vpop.f32.mrb[3].mxu0 }
 0x106   : > { %v4858_v15 = vadd.f32 %v3295_v24, %v3294_v41 }
 0x107   : > { %2266 = vmatmul.mubr.bf16.gmra.mrb[108].mxu0 %v4673_v56  ;;  %v1909_v56 = vld [vmem:[#allocation2 + $0x121] sm:$0xff] }
 0x108   : > { %2273 = vmatprep.mubr.bf16.mxu0 %v1929_v13  ;;  %v1931_v54 = vpack.c.bf16 %v1910_v44, %v1909_v56 }
 0x109   : > { %3776 = vmatmul.mubr.bf16.gmra.mrb[12].mxu1 %v4856_v28 }
 0x10a   : > { %v3297_v42 = vpop.f32.mrb[4].mxu0  ;;  %3795 = vmatprep.mubr.bf16.mxu1 %v4724_v0 }
 0x10b   : > { %v3298_v43 = vpop.f32.mrb[5].mxu0 }
 0x10c   : > { %v4863_v39 = vadd.f32 %v3298_v43, %v3297_v42  ;;  %v3300_v22 = vpop.f32.mrb[6].mxu0 }
 0x10d   : > { %v3301_v62 = vpop.f32.mrb[7].mxu0 }
 0x10e   : > { %v4865_v40 = vadd.f32 %v3301_v62, %v3300_v22  ;;  %v1918_v22 = vld [vmem:[#allocation2 + $0x189] sm:$0xff] }
 0x10f   : > { %2274 = vmatmul.mubr.bf16.gmra.mrb[112].mxu0 %v4680_v53  ;;  %v1911_v53 = vld [vmem:[#allocation2 + $0x139] sm:$0xff] }
 0x110   : > { %2281 = vmatprep.mubr.bf16.mxu0 %v1930_v27 }
 0x111   : > { %3796 = vmatmul.mubr.bf16.vlgmr.msra.gmra.mrb[80].mxu1 %v4729_v2  ;;  %v1912_v2 = vld [vmem:[#allocation2 + $0x141] sm:$0xff] }
 0x112   : > { %v3303_v20 = vpop.f32.mrb[8].mxu0  ;;  %3799 = vmatprep.mubr.bf16.mxu1 %v4744_v6  ;;  %v1932_v46 = vpack.c.bf16 %v1912_v2, %v1911_v53 }
 0x113   : > { %v3304_v29 = vpop.f32.mrb[9].mxu0 }
 0x114   : > { %v4870_v0 = vadd.f32 %v3304_v29, %v3303_v20  ;;  %v3306_v10 = vpop.f32.mrb[10].mxu0 }
 0x115   : > { %v3307_v23 = vpop.f32.mrb[11].mxu0 }
 0x116   : > { %v4872_v18 = vadd.f32 %v3307_v23, %v3306_v10 }
 0x117   : > { %2282 = vmatmul.mubr.bf16.gmra.mrb[116].mxu0 %v4686_v16  ;;  %v1913_v16 = vld [vmem:[#allocation2 + $0x151] sm:$0xff] }
 0x118   : > { %2289 = vmatprep.mubr.bf16.mxu0 %v1931_v54 }
 0x119   : > { %3800 = vmatmul.mubr.bf16.gmra.mrb[84].mxu1 %v4749_v19  ;;  %v1914_v19 = vld [vmem:[#allocation2 + $0x159] sm:$0xff] }
 0x11a   : > { %v3309_v30 = vpop.f32.mrb[12].mxu0  ;;  %3803 = vmatprep.mubr.bf16.mxu1 %v4764_v45  ;;  %v1933_v31 = vpack.c.bf16 %v1914_v19, %v1913_v16 }
 0x11b   : > { %v3310_v60 = vpop.f32.mrb[13].mxu0 }
 0x11c   : > { %v4877_v6 = vadd.f32 %v3310_v60, %v3309_v30  ;;  %v3312_v32 = vpop.f32.mrb[14].mxu0  ;;  %v1920_v30 = vld [vmem:[#allocation2 + $0x1a1] sm:$0xff] }
 0x11d   : > { %v3313_v26 = vpop.f32.mrb[15].mxu0 }
 0x11e   : > { %v4879_v33 = vadd.f32 %v3313_v26, %v3312_v32  ;;  %v1966_v26 = vld [vmem:[#allocation2 + $0x18a] sm:$0xff] }
 0x11f   : > { %2290 = vmatmul.mubr.bf16.gmra.mrb[120].mxu0 %v4692_v25 }
 0x120   : > { %2297 = vmatprep.mubr.bf16.mxu0 %v1932_v46  ;;  %v1965_v46 = vld [vmem:[#allocation2 + $0x182] sm:$0xff] }
 0x121   : > { %3804 = vmatmul.mubr.bf16.gmra.mrb[88].mxu1 %v4769_v35 }
 0x122   : > { %v3315_v59 = vpop.f32.mrb[16].mxu0  ;;  %3807 = vmatprep.mubr.bf16.mxu1 %v4784_v1  ;;  %v1915_v1 = vld [vmem:[#allocation2 + $0x169] sm:$0xff] }
 0x123   : > { %v3316_v8 = vpop.f32.mrb[17].mxu0  ;;  %v3427_v45 = vpop.f32.mrb[16].mxu1  ;;  %v1934_v13 = vpack.c.bf16 %v1916_v48, %v1915_v1  ;;  %v1967_v1 = vld [vmem:[#allocation2 + $0x19a] sm:$0xff]  ;;  %v1968_v48 = vld [vmem:[#allocation2 + $0x1a2] sm:$0xff] }
 0x124   : > { %v4884_v3 = vadd.f32 %v3316_v8, %v3315_v59  ;;  %v3318_v7 = vpop.f32.mrb[18].mxu0  ;;  %v3428_v37 = vpop.f32.mrb[17].mxu1 }
 0x125   : > { %v3319_v61 = vpop.f32.mrb[19].mxu0  ;;  %v4886_v63 = vadd.f32 %v3428_v37, %v3427_v45  ;;  %v3430_v58 = vpop.f32.mrb[18].mxu1 }
 0x126   : > { %v4888_v25 = vadd.f32 %v3319_v61, %v3318_v7  ;;  %v3431_v38 = vpop.f32.mrb[19].mxu1 }
 0x127   : > { %2298 = vmatmul.mubr.bf16.gmra.mrb[124].mxu0 %v4698_v21  ;;  %v4891_v35 = vadd.f32 %v3431_v38, %v3430_v58  ;;  %v1871_v58 = vld [vmem:[#allocation2 + $0x198] sm:$0xff] }
 0x128   : > { %2305 = vmatprep.mubr.bf16.mxu0 %v1933_v31 }
 0x129   : > { %3808 = vmatmul.mubr.bf16.gmra.mrb[92].mxu1 %v4831_v47 }
 0x12a   : > { %v3321_v49 = vpop.f32.mrb[20].mxu0  ;;  %3811 = vmatprep.mubr.bf16.mxu1 %v4833_v12  ;;  %v1917_v12 = vld [vmem:[#allocation2 + $0x181] sm:$0xff] }
 0x12b   : > { %v3322_v50 = vpop.f32.mrb[21].mxu0  ;;  %v3433_v14 = vpop.f32.mrb[20].mxu1  ;;  %v1935_v29 = vpack.c.bf16 %v1918_v22, %v1917_v12 }
 0x12c   : > { %v4895_v11 = vadd.f32 %v3322_v50, %v3321_v49  ;;  %v3324_v41 = vpop.f32.mrb[22].mxu0  ;;  %v3434_v24 = vpop.f32.mrb[21].mxu1  ;;  %v4084_v50 = vld [vmem:[#allocation2 + $0x8] sm:$0xff] }
 0x12d   : > { %v3325_v55 = vpop.f32.mrb[23].mxu0  ;;  %v4897_v17 = vadd.f32 %v3434_v24, %v3433_v14  ;;  %v3436_v21 = vpop.f32.mrb[22].mxu1  ;;  %v1888_v14 = vpack.c.bf16 %v4084_v50, %v1871_v58 }
 0x12e   : > { %v4899_v42 = vadd.f32 %v3325_v55, %v3324_v41  ;;  %v3437_v43 = vpop.f32.mrb[23].mxu1 }
 0x12f   : > { %2306 = vmatmul.mubr.bf16.gmra.mrb[128].mxu0 %v4704_v36  ;;  %v4902_v47 = vadd.f32 %v3437_v43, %v3436_v21  ;;  %v1984_v43 = vpack.c.bf16 %v1968_v48, %v1967_v1 }
 0x130   : > { %2313 = vmatprep.mubr.bf16.mxu0 %v1934_v13 }
 0x131   : > { %3812 = vmatmul.mubr.bf16.gmra.mrb[0].mxu1 %v4839_v5 }
 0x132   : > { %v3327_v27 = vpop.f32.mrb[24].mxu0  ;;  %3815 = vmatprep.mubr.bf16.mxu1 %v4841_v57  ;;  %v1919_v57 = vld [vmem:[#allocation2 + $0x199] sm:$0xff] }
 0x133   : > { %v3328_v62 = vpop.f32.mrb[25].mxu0  ;;  %v3439_v56 = vpop.f32.mrb[24].mxu1  ;;  %v1936_v8 = vpack.c.bf16 %v1920_v30, %v1919_v57 }
 0x134   : > { %v4906_v44 = vadd.f32 %v3328_v62, %v3327_v27  ;;  %v3330_v20 = vpop.f32.mrb[26].mxu0  ;;  %v3440_v10 = vpop.f32.mrb[25].mxu1 }
 0x135   : > { %v3331_v54 = vpop.f32.mrb[27].mxu0  ;;  %v4908_v23 = vadd.f32 %v3440_v10, %v3439_v56  ;;  %v3442_v36 = vpop.f32.mrb[26].mxu1 }
 0x136   : > { %v4910_v53 = vadd.f32 %v3331_v54, %v3330_v20  ;;  %v3443_v2 = vpop.f32.mrb[27].mxu1 }
 0x137   : > { %2314 = vmatmul.mubr.bf16.gmra.mrb[132].mxu0 %v4710_v51  ;;  %v4913_v5 = vadd.f32 %v3443_v2, %v3442_v36 }
 0x138   : > { %2321 = vmatprep.mubr.bf16.mxu0 %v1935_v29 }
 0x139   : > { %3816 = vmatmul.mubr.bf16.gmra.mrb[4].mxu1 %v4847_v4  ;;  %v1983_v4 = vpack.c.bf16 %v1966_v26, %v1965_v46 }
 0x13a   : > { %v3333_v60 = vpop.f32.mrb[28].mxu0  ;;  %3819 = vmatprep.mubr.bf16.mxu1 %v4849_v9 }
 0x13b   : > { %v3334_v32 = vpop.f32.mrb[29].mxu0  ;;  %v3445_v16 = vpop.f32.mrb[28].mxu1 }
 0x13c   : > { %v4917_v19 = vadd.f32 %v3334_v32, %v3333_v60  ;;  %v3336_v59 = vpop.f32.mrb[30].mxu0  ;;  %v3446_v45 = vpop.f32.mrb[29].mxu1 }
 0x13d   : > { %v3337_v51 = vpop.f32.mrb[31].mxu0  ;;  %v4919_v7 = vadd.f32 %v3446_v45, %v3445_v16  ;;  %v3448_v31 = vpop.f32.mrb[30].mxu1 }
 0x13e   : > { %v4921_v37 = vadd.f32 %v3337_v51, %v3336_v59  ;;  %v3449_v61 = vpop.f32.mrb[31].mxu1 }
 0x13f   : > { %2322 = vmatmul.mubr.bf16.gmra.mrb[136].mxu0 %v4716_v34  ;;  %v4924_v9 = vadd.f32 %v3449_v61, %v3448_v31 }
 0x140   : > { %2329 = vmatprep.mubr.bf16.mxu0 %v1936_v8 }
 0x141   : > { %3820 = vmatmul.mubr.bf16.gmra.mrb[8].mxu1 %v4856_v28 }
 0x142   : > { %v3339_v38 = vpop.f32.mrb[32].mxu0  ;;  %3823 = vmatprep.mubr.bf16.mxu1 %v1983_v4 }
 0x143   : > { %v3340_v49 = vpop.f32.mrb[33].mxu0  ;;  %v3451_v41 = vpop.f32.mrb[32].mxu1 }
 0x144   : > { %v3341_v13 = vadd.f32 %v3340_v49, %v3339_v38  ;;  %v3342_v24 = vpop.f32.mrb[34].mxu0  ;;  %v3452_v55 = vpop.f32.mrb[33].mxu1 }
 0x145   : > { %v3343_v21 = vpop.f32.mrb[35].mxu0  ;;  %v4927_v34 = vadd.f32 %v3452_v55, %v3451_v41  ;;  %v3454_v12 = vpop.f32.mrb[34].mxu1 }
 0x146   : > { %v3344_v22 = vadd.f32 %v3343_v21, %v3342_v24  ;;  %v3455_v27 = vpop.f32.mrb[35].mxu1 }
 0x147   : > { %2330 = vmatmul.mubr.bf16.gmra.mrb[140].mxu0 %v1888_v14  ;;  %v4929_v28 = vadd.f32 %v3455_v27, %v3454_v12 }
 0x149   : > { %3824 = vmatmul.mubr.bf16.gmra.mrb[12].mxu1 %v1984_v43 }
 0x14a   : > { %v3345_v62 = vpop.f32.mrb[36].mxu0 }
 0x14b   : > { %v3346_v56 = vpop.f32.mrb[37].mxu0  ;;  %v3457_v20 = vpop.f32.mrb[36].mxu1 }
 0x14c   : > { %v3347_v29 = vadd.f32 %v3346_v56, %v3345_v62  ;;  %v3348_v10 = vpop.f32.mrb[38].mxu0  ;;  %v3458_v54 = vpop.f32.mrb[37].mxu1 }
 0x14d   : > { %v3349_v36 = vpop.f32.mrb[39].mxu0  ;;  %v4931_v2 = vadd.f32 %v3458_v54, %v3457_v20  ;;  %v3460_v57 = vpop.f32.mrb[38].mxu1 }
 0x14e   : > { %v3350_v30 = vadd.f32 %v3349_v36, %v3348_v10  ;;  %v3461_v60 = vpop.f32.mrb[39].mxu1 }
 0x14f   : > { %v4933_v32 = vadd.f32 %v3461_v60, %v3460_v57 }
 0x152   : > { %v3351_v46 = vpop.f32.mrb[40].mxu0 }
 0x153   : > { %v3352_v26 = vpop.f32.mrb[41].mxu0  ;;  %v3463_v16 = vpop.f32.mrb[40].mxu1 }
 0x154   : > { %v3353_v59 = vadd.f32 %v3352_v26, %v3351_v46  ;;  %v3354_v8 = vpop.f32.mrb[42].mxu0  ;;  %v3464_v45 = vpop.f32.mrb[41].mxu1 }
 0x155   : > { %v3355_v51 = vpop.f32.mrb[43].mxu0  ;;  %v4935_v31 = vadd.f32 %v3464_v45, %v3463_v16  ;;  %v3466_v4 = vpop.f32.mrb[42].mxu1 }
 0x156   : > { %v3356_v61 = vadd.f32 %v3355_v51, %v3354_v8  ;;  %v3467_v58 = vpop.f32.mrb[43].mxu1 }
 0x157   : > { %v4937_v38 = vadd.f32 %v3467_v58, %v3466_v4 }
 0x15a   : > { %v3357_v1 = vpop.f32.mrb[44].mxu0 }
 0x15b   : > { %v3358_v48 = vpop.f32.mrb[45].mxu0  ;;  %v3469_v49 = vpop.f32.mrb[44].mxu1 }
 0x15c   : > { %v3359_v50 = vadd.f32 %v3358_v48, %v3357_v1  ;;  %v3360_v14 = vpop.f32.mrb[46].mxu0  ;;  %v3470_v41 = vpop.f32.mrb[45].mxu1 }
 0x15d   : > { %v3361_v24 = vpop.f32.mrb[47].mxu0  ;;  %v4939_v55 = vadd.f32 %v3470_v41, %v3469_v49  ;;  %v3472_v21 = vpop.f32.mrb[46].mxu1 }
 0x15e   : > { %v3362_v43 = vadd.f32 %v3361_v24, %v3360_v14  ;;  %v3473_v12 = vpop.f32.mrb[47].mxu1 }
 0x15f   : > { %v4941_v27 = vadd.f32 %v3473_v12, %v3472_v21 }
 0x162   : > { %v3363_v62 = vpop.f32.mrb[48].mxu0 }
 0x163   : > { %v3364_v56 = vpop.f32.mrb[49].mxu0  ;;  %v3475_v20 = vpop.f32.mrb[48].mxu1 }
 0x164   : > { %v4943_v10 = vadd.f32 %v3364_v56, %v3363_v62  ;;  %v3366_v54 = vpop.f32.mrb[50].mxu0  ;;  %v3476_v36 = vpop.f32.mrb[49].mxu1 }
 0x165   : > { %v3367_v57 = vpop.f32.mrb[51].mxu0  ;;  %v3477_v60 = vadd.f32 %v3476_v36, %v3475_v20  ;;  %v3478_v46 = vpop.f32.mrb[50].mxu1 }
 0x166   : > { %v4945_v26 = vadd.f32 %v3367_v57, %v3366_v54  ;;  %v3479_v16 = vpop.f32.mrb[51].mxu1 }
 0x167   : > { %v4947_v8 = vadd.f32 %v3477_v60, %v3341_v13  ;;  %v3480_v45 = vadd.f32 %v3479_v16, %v3478_v46 }
 0x169   : > { %v4949_v51 = vadd.f32 %v3480_v45, %v3344_v22 }
 0x16a   : > { %v3369_v4 = vpop.f32.mrb[52].mxu0 }
 0x16b   : > { %v3370_v58 = vpop.f32.mrb[53].mxu0  ;;  %v3481_v1 = vpop.f32.mrb[52].mxu1 }
 0x16c   : > { %v4951_v48 = vadd.f32 %v3370_v58, %v3369_v4  ;;  %v3372_v49 = vpop.f32.mrb[54].mxu0  ;;  %v3482_v14 = vpop.f32.mrb[53].mxu1 }
 0x16d   : > { %v3373_v41 = vpop.f32.mrb[55].mxu0  ;;  %v3483_v24 = vadd.f32 %v3482_v14, %v3481_v1  ;;  %v3484_v21 = vpop.f32.mrb[54].mxu1 }
 0x16e   : > { %v4953_v12 = vadd.f32 %v3373_v41, %v3372_v49  ;;  %v3485_v62 = vpop.f32.mrb[55].mxu1 }
 0x16f   : > { %v4955_v56 = vadd.f32 %v3483_v24, %v3347_v29  ;;  %v3486_v13 = vadd.f32 %v3485_v62, %v3484_v21 }
 0x171   : > { %v4957_v20 = vadd.f32 %v3486_v13, %v3350_v30 }
 0x172   : > { %v3375_v22 = vpop.f32.mrb[56].mxu0 }
 0x173   : > { %5198 = vst [vmem:[#allocation3_spill] sm:$0xff] %v4957_v20  ;;  %v3376_v54 = vpop.f32.mrb[57].mxu0  ;;  %v3487_v36 = vpop.f32.mrb[56].mxu1 }
 0x174   : > { %v4959_v57 = vadd.f32 %v3376_v54, %v3375_v22  ;;  %v3378_v60 = vpop.f32.mrb[58].mxu0  ;;  %v3488_v46 = vpop.f32.mrb[57].mxu1 }
 0x175   : > { %v3379_v16 = vpop.f32.mrb[59].mxu0  ;;  %v3489_v45 = vadd.f32 %v3488_v46, %v3487_v36  ;;  %v3490_v4 = vpop.f32.mrb[58].mxu1 }
 0x176   : > { %v4961_v58 = vadd.f32 %v3379_v16, %v3378_v60  ;;  %v3491_v1 = vpop.f32.mrb[59].mxu1 }
 0x177   : > { %v4963_v49 = vadd.f32 %v3489_v45, %v3353_v59  ;;  %v3492_v29 = vadd.f32 %v3491_v1, %v3490_v4 }
 0x179   : > { %v4965_v14 = vadd.f32 %v3492_v29, %v3356_v61 }
 0x17a   : > { %v3381_v30 = vpop.f32.mrb[60].mxu0 }
 0x17b   : > { %v3382_v41 = vpop.f32.mrb[61].mxu0  ;;  %v3493_v24 = vpop.f32.mrb[60].mxu1 }
 0x17c   : > { %v4967_v21 = vadd.f32 %v3382_v41, %v3381_v30  ;;  %v3384_v62 = vpop.f32.mrb[62].mxu0  ;;  %v3494_v13 = vpop.f32.mrb[61].mxu1 }
 0x17d   : > { %v3385_v22 = vpop.f32.mrb[63].mxu0  ;;  %v3495_v54 = vadd.f32 %v3494_v13, %v3493_v24  ;;  %v3496_v20 = vpop.f32.mrb[62].mxu1 }
 0x17e   : > { %v4969_v36 = vadd.f32 %v3385_v22, %v3384_v62  ;;  %v3497_v60 = vpop.f32.mrb[63].mxu1 }
 0x17f   : > { %v4971_v46 = vadd.f32 %v3495_v54, %v3359_v50  ;;  %v3498_v59 = vadd.f32 %v3497_v60, %v3496_v20 }
 0x181   : > { %v4973_v16 = vadd.f32 %v3498_v59, %v3362_v43 }
 0x182   : > { %v3701_v61 = vpop.f32.mrb[64].mxu0 }
 0x183   : > { %v1256_v45 = vadd.f32 %v3701_v61, %v4863_v39  ;;  %v1247_v4 = vpop.f32.mrb[65].mxu0 }
 0x184   : > { %v3499_v1 = vpop.f32.mrb[64].mxu1  ;;  %v1248_v29 = vadd.f32 %v4854_v52, %v1247_v4  ;;  %v3702_v30 = vpop.f32.mrb[66].mxu0 }
 0x185   : > { %v4978_v41 = vadd.f32 %v4897_v17, %v1256_v45  ;;  %v3500_v24 = vpop.f32.mrb[65].mxu1  ;;  %v1259_v62 = vadd.f32 %v3702_v30, %v4865_v40  ;;  %v1250_v13 = vpop.f32.mrb[67].mxu0 }
 0x186   : > { %v4982_v50 = vadd.f32 %v4886_v63, %v1248_v29  ;;  %v3501_v43 = vadd.f32 %v3500_v24, %v3499_v1  ;;  %v3502_v20 = vpop.f32.mrb[66].mxu1  ;;  %v1251_v22 = vadd.f32 %v4858_v15, %v1250_v13 }
 0x187   : > { %v4986_v39 = vadd.f32 %v4902_v47, %v1259_v62  ;;  %v3503_v54 = vpop.f32.mrb[67].mxu1 }
 0x188   : > { %v4989_v52 = vadd.f32 %v3501_v43, %v4943_v10  ;;  %v4992_v17 = vadd.f32 %v4891_v35, %v1251_v22  ;;  %v3504_v60 = vadd.f32 %v3503_v54, %v3502_v20 }
 0x18a   : > { %v4995_v40 = vadd.f32 %v3504_v60, %v4945_v26  ;;  %v3705_v63 = vpop.f32.mrb[68].mxu0 }
 0x18b   : > { %v1272_v59 = vadd.f32 %v3705_v63, %v4877_v6  ;;  %v1263_v61 = vpop.f32.mrb[69].mxu0 }
 0x18c   : > { %v3505_v45 = vpop.f32.mrb[68].mxu1  ;;  %v1264_v15 = vadd.f32 %v4870_v0, %v1263_v61  ;;  %v3706_v47 = vpop.f32.mrb[70].mxu0 }
 0x18d   : > { %v5000_v4 = vadd.f32 %v4919_v7, %v1272_v59  ;;  %v3506_v10 = vpop.f32.mrb[69].mxu1  ;;  %v1275_v1 = vadd.f32 %v3706_v47, %v4879_v33  ;;  %v1266_v35 = vpop.f32.mrb[71].mxu0 }
 0x18e   : > { %v5004_v29 = vadd.f32 %v4908_v23, %v1264_v15  ;;  %v3507_v26 = vadd.f32 %v3506_v10, %v3505_v45  ;;  %v3508_v30 = vpop.f32.mrb[70].mxu1  ;;  %v1267_v24 = vadd.f32 %v4872_v18, %v1266_v35 }
 0x18f   : > { %v5008_v6 = vadd.f32 %v4924_v9, %v1275_v1  ;;  %v3509_v62 = vpop.f32.mrb[71].mxu1 }
 0x190   : > { %v5011_v0 = vadd.f32 %v3507_v26, %v4951_v48  ;;  %v5014_v7 = vadd.f32 %v4913_v5, %v1267_v24  ;;  %v3510_v13 = vadd.f32 %v3509_v62, %v3508_v30 }
 0x192   : > { %v5017_v33 = vadd.f32 %v3510_v13, %v4953_v12  ;;  %v3709_v23 = vpop.f32.mrb[72].mxu0 }
 0x193   : > { %v1288_v43 = vadd.f32 %v3709_v23, %v4895_v11  ;;  %v1279_v20 = vpop.f32.mrb[73].mxu0 }
 0x194   : > { %v3511_v22 = vpop.f32.mrb[72].mxu1  ;;  %v1280_v18 = vadd.f32 %v4884_v3, %v1279_v20  ;;  %v3710_v9 = vpop.f32.mrb[74].mxu0 }
 0x195   : > { %v5022_v54 = vadd.f32 %v4931_v2, %v1288_v43  ;;  %v3512_v48 = vpop.f32.mrb[73].mxu1  ;;  %v1291_v60 = vadd.f32 %v3710_v9, %v4899_v42  ;;  %v1282_v5 = vpop.f32.mrb[75].mxu0 }
 0x196   : > { %v5026_v63 = vadd.f32 %v4927_v34, %v1280_v18  ;;  %v3513_v12 = vadd.f32 %v3512_v48, %v3511_v22  ;;  %v3514_v59 = vpop.f32.mrb[74].mxu1  ;;  %v1283_v61 = vadd.f32 %v4888_v25, %v1282_v5 }
 0x197   : > { %v5030_v11 = vadd.f32 %v4933_v32, %v1291_v60  ;;  %v3515_v45 = vpop.f32.mrb[75].mxu1 }
 0x198   : > { %v5033_v3 = vadd.f32 %v3513_v12, %v4959_v57  ;;  %v1588_v2 = vadd.f32 %v4929_v28, %v1283_v61  ;;  %v3516_v15 = vadd.f32 %v3515_v45, %v3514_v59 }
 0x19a   : > { %v5037_v42 = vadd.f32 %v3516_v15, %v4961_v58  ;;  %v3713_v47 = vpop.f32.mrb[76].mxu0 }
 0x19b   : > { %v1304_v34 = vadd.f32 %v3713_v47, %v4917_v19  ;;  %v1295_v10 = vpop.f32.mrb[77].mxu0 }
 0x19c   : > { %v3517_v1 = vpop.f32.mrb[76].mxu1  ;;  %v1296_v25 = vadd.f32 %v4906_v44, %v1295_v10  ;;  %v3714_v35 = vpop.f32.mrb[78].mxu0 }
 0x19d   : > { %v5042_v32 = vadd.f32 %v4939_v55, %v1304_v34  ;;  %v3518_v26 = vpop.f32.mrb[77].mxu1  ;;  %v1307_v57 = vadd.f32 %v3714_v35, %v4921_v37  ;;  %v1298_v30 = vpop.f32.mrb[79].mxu0 }
 0x19e   : > { %v5046_v28 = vadd.f32 %v4935_v31, %v1296_v25  ;;  %v3519_v58 = vadd.f32 %v3518_v26, %v3517_v1  ;;  %v3520_v24 = vpop.f32.mrb[78].mxu1  ;;  %v1299_v62 = vadd.f32 %v4910_v53, %v1298_v30 }
 0x19f   : > { %v5050_v19 = vadd.f32 %v4941_v27, %v1307_v57  ;;  %v3521_v13 = vpop.f32.mrb[79].mxu1 }
 0x1a0   : > { %v5053_v44 = vadd.f32 %v3519_v58, %v4967_v21  ;;  %v1604_v55 = vadd.f32 %v4937_v38, %v1299_v62  ;;  %v3522_v23 = vadd.f32 %v3521_v13, %v3520_v24 }
 0x1a2   : > { %v5057_v37 = vadd.f32 %v3522_v23, %v4969_v36  ;;  %v3563_v43 = vpop.f32.mrb[80].mxu0 }
 0x1a3   : > { %v3564_v31 = vpop.f32.mrb[81].mxu0 }
 0x1a4   : > { %v3565_v20 = vadd.f32 %v3564_v31, %v3563_v43  ;;  %v3566_v22 = vpop.f32.mrb[82].mxu0 }
 0x1a5   : > { %v3567_v18 = vpop.f32.mrb[83].mxu0 }
 0x1a6   : > { %v3568_v9 = vadd.f32 %v3567_v18, %v3566_v22  ;;  %v5060_v53 = vadd.f32 %v3565_v20, %v4982_v50 }
 0x1a8   : > { %v5063_v27 = vadd.f32 %v3568_v9, %v4992_v17 }
 0x1aa   : > { %v3569_v21 = vpop.f32.mrb[84].mxu0 }
 0x1ab   : > { %v3570_v48 = vpop.f32.mrb[85].mxu0 }
 0x1ac   : > { %v3571_v60 = vadd.f32 %v3570_v48, %v3569_v21  ;;  %v3572_v38 = vpop.f32.mrb[86].mxu0 }
 0x1ad   : > { %v3573_v5 = vpop.f32.mrb[87].mxu0 }
 0x1ae   : > { %v3574_v12 = vadd.f32 %v3573_v5, %v3572_v38  ;;  %v3845_v36 = vadd.f32 %v3571_v60, %v4978_v41 }
 0x1b0   : > { %v3853_v59 = vadd.f32 %v3574_v12, %v4986_v39 }
 0x1b2   : > { %v3575_v61 = vpop.f32.mrb[88].mxu0 }
 0x1b3   : > { %v3576_v45 = vpop.f32.mrb[89].mxu0 }
 0x1b4   : > { %v3577_v15 = vadd.f32 %v3576_v45, %v3575_v61  ;;  %v3578_v47 = vpop.f32.mrb[90].mxu0 }
 0x1b5   : > { %v3579_v34 = vpop.f32.mrb[91].mxu0 }
 0x1b6   : > { %v3580_v50 = vadd.f32 %v3579_v34, %v3578_v47  ;;  %v5068_v10 = vadd.f32 %v3577_v15, %v5004_v29 }
 0x1b8   : > { %v5071_v17 = vadd.f32 %v3580_v50, %v5014_v7 }
 0x1ba   : > { %v3581_v1 = vpop.f32.mrb[92].mxu0 }
 0x1bb   : > { %v3582_v25 = vpop.f32.mrb[93].mxu0 }
 0x1bc   : > { %v3583_v35 = vadd.f32 %v3582_v25, %v3581_v1  ;;  %v3584_v26 = vpop.f32.mrb[94].mxu0 }
 0x1bd   : > { %v3585_v57 = vpop.f32.mrb[95].mxu0 }
 0x1be   : > { %v3586_v41 = vadd.f32 %v3585_v57, %v3584_v26  ;;  %v5074_v39 = vadd.f32 %v3583_v35, %v5000_v4 }
 0x1c0   : > { %v5077_v30 = vadd.f32 %v3586_v41, %v5008_v6 }
 0x1c2   : > { %v3587_v58 = vpop.f32.mrb[96].mxu0 }
 0x1c3   : > { %v3588_v24 = vpop.f32.mrb[97].mxu0 }
 0x1c4   : > { %v3589_v62 = vadd.f32 %v3588_v24, %v3587_v58  ;;  %v3590_v29 = vpop.f32.mrb[98].mxu0 }
 0x1c5   : > { %v3591_v13 = vpop.f32.mrb[99].mxu0 }
 0x1c6   : > { %v3592_v23 = vadd.f32 %v3591_v13, %v3590_v29  ;;  %v5080_v7 = vadd.f32 %v3589_v62, %v5026_v63 }
 0x1c8   : > { %v5082_v43 = vadd.f32 %v3592_v23, %v1588_v2 }
 0x1ca   : > { %v3593_v31 = vpop.f32.mrb[100].mxu0 }
 0x1cb   : > { %v3594_v20 = vpop.f32.mrb[101].mxu0 }
 0x1cc   : > { %v3595_v22 = vadd.f32 %v3594_v20, %v3593_v31  ;;  %v3596_v18 = vpop.f32.mrb[102].mxu0 }
 0x1cd   : > { %v3597_v4 = vpop.f32.mrb[103].mxu0 }
 0x1ce   : > { %v3598_v9 = vadd.f32 %v3597_v4, %v3596_v18  ;;  %v5085_v6 = vadd.f32 %v3595_v22, %v5022_v54 }
 0x1d0   : > { %v5088_v21 = vadd.f32 %v3598_v9, %v5030_v11 }
 0x1d2   : > { %v3599_v48 = vpop.f32.mrb[104].mxu0 }
 0x1d3   : > { %v3600_v60 = vpop.f32.mrb[105].mxu0 }
 0x1d4   : > { %v3601_v38 = vadd.f32 %v3600_v60, %v3599_v48  ;;  %v3602_v5 = vpop.f32.mrb[106].mxu0 }
 0x1d5   : > { %v3603_v63 = vpop.f32.mrb[107].mxu0 }
 0x1d6   : > { %v3604_v12 = vadd.f32 %v3603_v63, %v3602_v5  ;;  %v5091_v2 = vadd.f32 %v3601_v38, %v5046_v28 }
 0x1d8   : > { %v5093_v61 = vadd.f32 %v3604_v12, %v1604_v55 }
 0x1da   : > { %v3605_v45 = vpop.f32.mrb[108].mxu0 }
 0x1db   : > { %v3606_v15 = vpop.f32.mrb[109].mxu0 }
 0x1dc   : > { %v3607_v47 = vadd.f32 %v3606_v15, %v3605_v45  ;;  %v3608_v34 = vpop.f32.mrb[110].mxu0 }
 0x1dd   : > { %v3609_v54 = vpop.f32.mrb[111].mxu0 }
 0x1de   : > { %v3610_v50 = vadd.f32 %v3609_v54, %v3608_v34  ;;  %v5096_v11 = vadd.f32 %v3607_v47, %v5042_v32 }
 0x1e0   : > { %v5099_v1 = vadd.f32 %v3610_v50, %v5050_v19 }
 0x1e2   : > { %v3611_v25 = vpop.f32.mrb[112].mxu0 }
 0x1e3   : > { %v3612_v35 = vpop.f32.mrb[113].mxu0 }
 0x1e4   : > { %v3797_v26 = vpop.f32.mrb[80].mxu1  ;;  %v3613_v28 = vadd.f32 %v3612_v35, %v3611_v25  ;;  %v3614_v57 = vpop.f32.mrb[114].mxu0 }
 0x1e5   : > { %v3846_v55 = vadd.f32 %v3845_v36, %v3797_v26  ;;  %v2372_v41 = vpop.f32.mrb[81].mxu1  ;;  %v3615_v58 = vpop.f32.mrb[115].mxu0 }
 0x1e6   : > { %v3850_v24 = vadd.f32 %v5060_v53, %v2372_v41  ;;  %v3798_v62 = vpop.f32.mrb[82].mxu1  ;;  %v3616_v29 = vadd.f32 %v3615_v58, %v3614_v57  ;;  %v5103_v13 = vadd.f32 %v4947_v8, %v3613_v28  ;;  %v5199_v57 = vld [vmem:[#allocation3_spill] sm:$0xff] }
 0x1e7   : > { %v3854_v32 = vadd.f32 %v3853_v59, %v3798_v62  ;;  %v2375_v23 = vpop.f32.mrb[83].mxu1 }
 0x1e8   : > { %v3858_v19 = vadd.f32 %v5063_v27, %v2375_v23  ;;  %v5114_v36 = vadd.f32 %v4949_v51, %v3616_v29 }
 0x1e9   : > { %v2532_v53 = vpack.c.bf16 %v3854_v32, %v3846_v55 }
 0x1ea   : > { %v2531_v31 = vpack.c.bf16 %v3858_v19, %v3850_v24  ;;  %v3617_v20 = vpop.f32.mrb[116].mxu0 }
 0x1eb   : > { %3260 = vst [vmem:[%s5110_s29 + $0x8] sm:$0xff] %v2532_v53   ;;  %v3618_v8 = vpop.f32.mrb[117].mxu0  ;;  %v2693_v59 = vunpack.c.l.bf16 %v2532_v53  ;;  %v2694_v60 = vunpack.c.h.bf16 %v2532_v53 }
 0x1ec   : > { %3169 = vst [vmem:[%s5110_s29] sm:$0xff] %v2531_v31   ;;  %v2691_v22 = vunpack.c.l.bf16 %v2531_v31  ;;  %v2692_v18 = vunpack.c.h.bf16 %v2531_v31  ;;  %v3801_v4 = vpop.f32.mrb[84].mxu1  ;;  %v3619_v9 = vadd.f32 %v3618_v8, %v3617_v20  ;;  %v3620_v48 = vpop.f32.mrb[118].mxu0 }
 0x1ed   : > { %v3862_v38 = vadd.f32 %v5074_v39, %v3801_v4  ;;  %v2388_v5 = vpop.f32.mrb[85].mxu1  ;;  %v3621_v27 = vpop.f32.mrb[119].mxu0  ;;  %v2762_v25 = vmul.f32 %v2693_v59, %v2693_v59 }
 0x1ee   : > { %v2723_v63 = vadd.f32 %v2692_v18, %v2691_v22  ;;  %v2760_v51 = vmul.f32 %v2691_v22, %v2691_v22  ;;  %v2761_v12 = vmul.f32 %v2692_v18, %v2692_v18  ;;  %v3866_v45 = vadd.f32 %v5068_v10, %v2388_v5  ;;  %v3802_v15 = vpop.f32.mrb[86].mxu1 }
 0x1ef   : > { %v3870_v47 = vadd.f32 %v5077_v30, %v3802_v15  ;;  %v3622_v34 = vadd.f32 %v3621_v27, %v3620_v48  ;;  %v2391_v54 = vpop.f32.mrb[87].mxu1  ;;  %v5122_v50 = vadd.f32 %v4955_v56, %v3619_v9  ;;  %v2763_v10 = vmul.f32 %v2694_v60, %v2694_v60 }
 0x1f0   : > { %v2724_v35 = vadd.f32 %v2723_v63, %v2693_v59  ;;  %v2792_v39 = vadd.f32 %v2761_v12, %v2760_v51  ;;  %v3874_v26 = vadd.f32 %v5071_v17, %v2391_v54 }
 0x1f1   : > { %v2534_v28 = vpack.c.bf16 %v3870_v47, %v3862_v38  ;;  %v5126_v55 = vadd.f32 %v5199_v57, %v3622_v34 }
 0x1f2   : > { %v2793_v41 = vadd.f32 %v2792_v39, %v2762_v25  ;;  %v2533_v58 = vpack.c.bf16 %v3874_v26, %v3866_v45  ;;  %v2725_v24 = vadd.f32 %v2724_v35, %v2694_v60  ;;  %v3623_v30 = vpop.f32.mrb[120].mxu0 }
 0x1f3   : > { %3262 = vst [vmem:[%s5110_s29 + $0x18] sm:$0xff] %v2534_v28   ;;  %v3624_v62 = vpop.f32.mrb[121].mxu0  ;;  %v2697_v8 = vunpack.c.l.bf16 %v2534_v28  ;;  %v2698_v9 = vunpack.c.h.bf16 %v2534_v28 }
 0x1f4   : > { %3261 = vst [vmem:[%s5110_s29 + $0x10] sm:$0xff] %v2533_v58   ;;  %v2695_v29 = vunpack.c.l.bf16 %v2533_v58  ;;  %v2696_v56 = vunpack.c.h.bf16 %v2533_v58  ;;  %v2794_v32 = vadd.f32 %v2793_v41, %v2763_v10  ;;  %v3805_v23 = vpop.f32.mrb[88].mxu1  ;;  %v3625_v19 = vadd.f32 %v3624_v62, %v3623_v30  ;;  %v3626_v53 = vpop.f32.mrb[122].mxu0 }
 0x1f5   : > { %v3878_v17 = vadd.f32 %v5085_v6, %v3805_v23  ;;  %v2404_v31 = vpop.f32.mrb[89].mxu1  ;;  %v3627_v20 = vpop.f32.mrb[123].mxu0  ;;  %v2767_v54 = vmul.f32 %v2698_v9, %v2698_v9 }
 0x1f6   : > { %v2726_v59 = vadd.f32 %v2725_v24, %v2695_v29  ;;  %v2764_v22 = vmul.f32 %v2695_v29, %v2695_v29  ;;  %v3882_v18 = vadd.f32 %v5080_v7, %v2404_v31  ;;  %v3806_v4 = vpop.f32.mrb[90].mxu1  ;;  %v3628_v60 = vadd.f32 %v3627_v20, %v3626_v53 }
 0x1f7   : > { %v3886_v48 = vadd.f32 %v5088_v21, %v3806_v4  ;;  %v2407_v38 = vpop.f32.mrb[91].mxu1  ;;  %v5134_v5 = vadd.f32 %v4963_v49, %v3625_v19  ;;  %v2765_v6 = vmul.f32 %v2696_v56, %v2696_v56  ;;  %v2766_v7 = vmul.f32 %v2697_v8, %v2697_v8 }
 0x1f8   : > { %v2727_v27 = vadd.f32 %v2726_v59, %v2696_v56  ;;  %v2795_v63 = vadd.f32 %v2794_v32, %v2764_v22  ;;  %v3890_v51 = vadd.f32 %v5082_v43, %v2407_v38  ;;  %v5138_v45 = vadd.f32 %v4965_v14, %v3628_v60 }
 0x1f9   : > { %v2536_v12 = vpack.c.bf16 %v3886_v48, %v3878_v17 }
 0x1fa   : > { %v2728_v15 = vadd.f32 %v2727_v27, %v2697_v8  ;;  %v2796_v47 = vadd.f32 %v2795_v63, %v2765_v6  ;;  %v2535_v21 = vpack.c.bf16 %v3890_v51, %v3882_v18  ;;  %v3629_v34 = vpop.f32.mrb[124].mxu0 }
 0x1fb   : > { %3264 = vst [vmem:[%s5110_s29 + $0x28] sm:$0xff] %v2536_v12   ;;  %v3630_v25 = vpop.f32.mrb[125].mxu0  ;;  %v2701_v43 = vunpack.c.l.bf16 %v2536_v12  ;;  %v2702_v24 = vunpack.c.h.bf16 %v2536_v12 }
 0x1fc   : > { %v2797_v49 = vadd.f32 %v2796_v47, %v2766_v7  ;;  %3263 = vst [vmem:[%s5110_s29 + $0x20] sm:$0xff] %v2535_v21   ;;  %v2699_v35 = vunpack.c.l.bf16 %v2535_v21  ;;  %v2700_v39 = vunpack.c.h.bf16 %v2535_v21  ;;  %v2729_v26 = vadd.f32 %v2728_v15, %v2698_v9  ;;  %v3809_v28 = vpop.f32.mrb[92].mxu1  ;;  %v3632_v57 = vpop.f32.mrb[126].mxu0 }
 0x1fd   : > { %v3894_v10 = vadd.f32 %v5096_v11, %v3809_v28  ;;  %v3631_v14 = vadd.f32 %v3630_v25, %v3629_v34  ;;  %v2420_v41 = vpop.f32.mrb[93].mxu1  ;;  %v3633_v58 = vpop.f32.mrb[127].mxu0  ;;  %v2770_v18 = vmul.f32 %v2701_v43, %v2701_v43  ;;  %v2771_v48 = vmul.f32 %v2702_v24, %v2702_v24 }
 0x1fe   : > { %v2730_v30 = vadd.f32 %v2729_v26, %v2699_v35  ;;  %v2768_v62 = vmul.f32 %v2699_v35, %v2699_v35  ;;  %v2798_v29 = vadd.f32 %v2797_v49, %v2767_v54  ;;  %v3810_v56 = vpop.f32.mrb[94].mxu1  ;;  %v3898_v32 = vadd.f32 %v5091_v2, %v2420_v41 }
 0x1ff   : > { %v3902_v23 = vadd.f32 %v5099_v1, %v3810_v56  ;;  %v3634_v19 = vadd.f32 %v3633_v58, %v3632_v57  ;;  %v2423_v53 = vpop.f32.mrb[95].mxu1  ;;  %v3920_v17 = vadd.f32 %v4971_v46, %v3631_v14  ;;  %v2769_v11 = vmul.f32 %v2700_v39, %v2700_v39 }
 0x200   : > { %v2731_v31 = vadd.f32 %v2730_v30, %v2700_v39  ;;  %v2799_v20 = vadd.f32 %v2798_v29, %v2768_v62  ;;  %v3906_v8 = vadd.f32 %v5093_v61, %v2423_v53 }
 0x201   : > { %v2538_v59 = vpack.c.bf16 %v3902_v23, %v3894_v10  ;;  %v5148_v22 = vadd.f32 %v4973_v16, %v3634_v19 }
 0x202   : > { %v2732_v4 = vadd.f32 %v2731_v31, %v2701_v43  ;;  %v2800_v2 = vadd.f32 %v2799_v20, %v2769_v11  ;;  %v2537_v9 = vpack.c.bf16 %v3906_v8, %v3898_v32  ;;  %v3635_v1 = vpop.f32.mrb[128].mxu0 }
 0x203   : > { %3266 = vst [vmem:[%s5110_s29 + $0x38] sm:$0xff] %v2538_v59   ;;  %v3636_v60 = vpop.f32.mrb[129].mxu0  ;;  %v2705_v61 = vunpack.c.l.bf16 %v2538_v59  ;;  %v2706_v47 = vunpack.c.h.bf16 %v2538_v59 }
 0x204   : > { %v2801_v38 = vadd.f32 %v2800_v2, %v2770_v18  ;;  %3265 = vst [vmem:[%s5110_s29 + $0x30] sm:$0xff] %v2537_v9   ;;  %v2703_v46 = vunpack.c.l.bf16 %v2537_v9  ;;  %v2704_v27 = vunpack.c.h.bf16 %v2537_v9  ;;  %v2733_v6 = vadd.f32 %v2732_v4, %v2702_v24  ;;  %v3813_v63 = vpop.f32.mrb[0].mxu1  ;;  %v3638_v51 = vpop.f32.mrb[130].mxu0 }
 0x205   : > { %v3909_v12 = vadd.f32 %v5122_v50, %v3813_v63  ;;  %v3637_v16 = vadd.f32 %v3636_v60, %v3635_v1  ;;  %v2436_v7 = vpop.f32.mrb[1].mxu1  ;;  %v3639_v15 = vpop.f32.mrb[131].mxu0  ;;  %v2774_v58 = vmul.f32 %v2705_v61, %v2705_v61  ;;  %v2775_v62 = vmul.f32 %v2706_v47, %v2706_v47 }
 0x206   : > { %v2734_v21 = vadd.f32 %v2733_v6, %v2703_v46  ;;  %v2772_v34 = vmul.f32 %v2703_v46, %v2703_v46  ;;  %v2802_v54 = vadd.f32 %v2801_v38, %v2771_v48  ;;  %v3814_v25 = vpop.f32.mrb[2].mxu1  ;;  %v3912_v49 = vadd.f32 %v5103_v13, %v2436_v7 }
 0x207   : > { %v3915_v35 = vadd.f32 %v5126_v55, %v3814_v25  ;;  %v3640_v39 = vadd.f32 %v3639_v15, %v3638_v51  ;;  %v2439_v26 = vpop.f32.mrb[3].mxu1  ;;  %v5156_v28 = vadd.f32 %v4989_v52, %v3637_v16  ;;  %v2773_v57 = vmul.f32 %v2704_v27, %v2704_v27 }
 0x208   : > { %v2735_v50 = vadd.f32 %v2734_v21, %v2704_v27  ;;  %v2803_v43 = vadd.f32 %v2802_v54, %v2772_v34  ;;  %v3918_v10 = vadd.f32 %v5114_v36, %v2439_v26 }
 0x209   : > { %v2540_v14 = vpack.c.bf16 %v3915_v35, %v3909_v12  ;;  %v5160_v41 = vadd.f32 %v4995_v40, %v3640_v39 }
 0x20a   : > { %v2736_v13 = vadd.f32 %v2735_v50, %v2705_v61  ;;  %v2804_v24 = vadd.f32 %v2803_v43, %v2773_v57  ;;  %v2539_v55 = vpack.c.bf16 %v3918_v10, %v3912_v49  ;;  %v3641_v30 = vpop.f32.mrb[132].mxu0 }
 0x20b   : > { %3268 = vst [vmem:[%s5110_s29 + $0x48] sm:$0xff] %v2540_v14   ;;  %v3642_v29 = vpop.f32.mrb[133].mxu0  ;;  %v2709_v36 = vunpack.c.l.bf16 %v2540_v14  ;;  %v2710_v8 = vunpack.c.h.bf16 %v2540_v14 }
 0x20c   : > { %v2805_v52 = vadd.f32 %v2804_v24, %v2774_v58  ;;  %3267 = vst [vmem:[%s5110_s29 + $0x40] sm:$0xff] %v2539_v55   ;;  %v2707_v56 = vunpack.c.l.bf16 %v2539_v55  ;;  %v2708_v32 = vunpack.c.h.bf16 %v2539_v55  ;;  %v2737_v23 = vadd.f32 %v2736_v13, %v2706_v47  ;;  %v3817_v19 = vpop.f32.mrb[4].mxu1  ;;  %v3644_v53 = vpop.f32.mrb[134].mxu0 }
 0x20d   : > { %v3921_v31 = vadd.f32 %v3920_v17, %v3817_v19  ;;  %v3643_v11 = vadd.f32 %v3642_v29, %v3641_v30  ;;  %v2452_v40 = vpop.f32.mrb[5].mxu1  ;;  %v3645_v20 = vpop.f32.mrb[135].mxu0  ;;  %v2778_v61 = vmul.f32 %v2709_v36, %v2709_v36 }
 0x20e   : > { %v2738_v59 = vadd.f32 %v2737_v23, %v2707_v56  ;;  %v2776_v18 = vmul.f32 %v2707_v56, %v2707_v56  ;;  %v2806_v4 = vadd.f32 %v2805_v52, %v2775_v62  ;;  %v3818_v2 = vpop.f32.mrb[6].mxu1  ;;  %v3924_v9 = vadd.f32 %v5134_v5, %v2452_v40 }
 0x20f   : > { %v3927_v1 = vadd.f32 %v5148_v22, %v3818_v2  ;;  %v3646_v48 = vadd.f32 %v3645_v20, %v3644_v53  ;;  %v2455_v60 = vpop.f32.mrb[7].mxu1  ;;  %v3932_v38 = vadd.f32 %v5011_v0, %v3643_v11  ;;  %v2777_v17 = vmul.f32 %v2708_v32, %v2708_v32 }
 0x210   : > { %v2739_v46 = vadd.f32 %v2738_v59, %v2708_v32  ;;  %v2807_v27 = vadd.f32 %v2806_v4, %v2776_v18  ;;  %v3930_v6 = vadd.f32 %v5138_v45, %v2455_v60  ;;  %v2779_v22 = vmul.f32 %v2710_v8, %v2710_v8 }
 0x211   : > { %v2542_v63 = vpack.c.bf16 %v3927_v1, %v3921_v31  ;;  %v3938_v51 = vadd.f32 %v5017_v33, %v3646_v48 }
 0x212   : > { %v2740_v12 = vadd.f32 %v2739_v46, %v2709_v36  ;;  %v2808_v16 = vadd.f32 %v2807_v27, %v2777_v17  ;;  %v2541_v5 = vpack.c.bf16 %v3930_v6, %v3924_v9  ;;  %v3647_v7 = vpop.f32.mrb[136].mxu0 }
 0x213   : > { %3270 = vst [vmem:[%s5110_s29 + $0x58] sm:$0xff] %v2542_v63   ;;  %v3648_v15 = vpop.f32.mrb[137].mxu0  ;;  %v2713_v49 = vunpack.c.l.bf16 %v2542_v63  ;;  %v2714_v26 = vunpack.c.h.bf16 %v2542_v63 }
 0x214   : > { %v2809_v47 = vadd.f32 %v2808_v16, %v2778_v61  ;;  %3269 = vst [vmem:[%s5110_s29 + $0x50] sm:$0xff] %v2541_v5   ;;  %v2711_v0 = vunpack.c.l.bf16 %v2541_v5  ;;  %v2712_v21 = vunpack.c.h.bf16 %v2541_v5  ;;  %v2741_v34 = vadd.f32 %v2740_v12, %v2710_v8  ;;  %v3821_v54 = vpop.f32.mrb[8].mxu1  ;;  %v3650_v25 = vpop.f32.mrb[138].mxu0 }
 0x215   : > { %v3933_v45 = vadd.f32 %v3932_v38, %v3821_v54  ;;  %v3649_v35 = vadd.f32 %v3648_v15, %v3647_v7  ;;  %v2468_v39 = vpop.f32.mrb[9].mxu1  ;;  %v3651_v33 = vpop.f32.mrb[139].mxu0  ;;  %v2782_v23 = vmul.f32 %v2713_v49, %v2713_v49  ;;  %v2783_v31 = vmul.f32 %v2714_v26, %v2714_v26 }
 0x216   : > { %v2742_v50 = vadd.f32 %v2741_v34, %v2711_v0  ;;  %v2780_v57 = vmul.f32 %v2711_v0, %v2711_v0  ;;  %v2810_v43 = vadd.f32 %v2809_v47, %v2779_v22  ;;  %v3822_v10 = vpop.f32.mrb[10].mxu1  ;;  %v3936_v14 = vadd.f32 %v5156_v28, %v2468_v39 }
 0x217   : > { %v3939_v58 = vadd.f32 %v3938_v51, %v3822_v10  ;;  %v3652_v13 = vadd.f32 %v3651_v33, %v3650_v25  ;;  %v2471_v24 = vpop.f32.mrb[11].mxu1  ;;  %v3947_v55 = vadd.f32 %v5033_v3, %v3649_v35  ;;  %v2781_v62 = vmul.f32 %v2712_v21, %v2712_v21 }
 0x218   : > { %v2743_v30 = vadd.f32 %v2742_v50, %v2712_v21  ;;  %v2811_v29 = vadd.f32 %v2810_v43, %v2780_v57  ;;  %v3942_v52 = vadd.f32 %v5160_v41, %v2471_v24 }
 0x219   : > { %v2544_v56 = vpack.c.bf16 %v3939_v58, %v3933_v45  ;;  %v3953_v32 = vadd.f32 %v5037_v42, %v3652_v13 }
 0x21a   : > { %v2744_v19 = vadd.f32 %v2743_v30, %v2713_v49  ;;  %v2812_v53 = vadd.f32 %v2811_v29, %v2781_v62  ;;  %v2543_v36 = vpack.c.bf16 %v3942_v52, %v3936_v14  ;;  %v3653_v28 = vpop.f32.mrb[140].mxu0 }
 0x21b   : > { %3272 = vst [vmem:[%s5110_s29 + $0x68] sm:$0xff] %v2544_v56   ;;  %v3654_v11 = vpop.f32.mrb[141].mxu0  ;;  %v2717_v9 = vunpack.c.l.bf16 %v2544_v56  ;;  %v2718_v38 = vunpack.c.h.bf16 %v2544_v56 }
 0x21c   : > { %v2813_v40 = vadd.f32 %v2812_v53, %v2782_v23  ;;  %3271 = vst [vmem:[%s5110_s29 + $0x60] sm:$0xff] %v2543_v36   ;;  %v2715_v3 = vunpack.c.l.bf16 %v2543_v36  ;;  %v2716_v20 = vunpack.c.h.bf16 %v2543_v36  ;;  %v2745_v8 = vadd.f32 %v2744_v19, %v2714_v26  ;;  %v3825_v59 = vpop.f32.mrb[12].mxu1  ;;  %v3656_v18 = vpop.f32.mrb[142].mxu0 }
 0x21d   : > { %v3655_v4 = vadd.f32 %v3654_v11, %v3653_v28  ;;  %v2484_v41 = vpop.f32.mrb[13].mxu1  ;;  %v3657_v2 = vpop.f32.mrb[143].mxu0  ;;  %v2786_v7 = vmul.f32 %v2717_v9, %v2717_v9  ;;  %v2787_v0 = vmul.f32 %v2718_v38, %v2718_v38 }
 0x21e   : > { %v2746_v42 = vadd.f32 %v2745_v8, %v2715_v3  ;;  %v2784_v1 = vmul.f32 %v2715_v3, %v2715_v3  ;;  %v2814_v48 = vadd.f32 %v2813_v40, %v2783_v31  ;;  %v3826_v60 = vpop.f32.mrb[14].mxu1  ;;  %v3948_v17 = vadd.f32 %v3947_v55, %v2484_v41 }
 0x21f   : > { %v3944_v46 = vadd.f32 %v5053_v44, %v3655_v4  ;;  %v3658_v27 = vadd.f32 %v3657_v2, %v3656_v18  ;;  %v2487_v6 = vpop.f32.mrb[15].mxu1  ;;  %v2785_v51 = vmul.f32 %v2716_v20, %v2716_v20 }
 0x220   : > { %v2747_v63 = vadd.f32 %v2746_v42, %v2716_v20  ;;  %v2815_v61 = vadd.f32 %v2814_v48, %v2784_v1  ;;  %v3954_v12 = vadd.f32 %v3953_v32, %v2487_v6 }
 0x221   : > { %v3945_v16 = vadd.f32 %v3944_v46, %v3825_v59  ;;  %v3950_v5 = vadd.f32 %v5057_v37, %v3658_v27 }
 0x222   : > { %v2748_v22 = vadd.f32 %v2747_v63, %v2717_v9  ;;  %v2816_v15 = vadd.f32 %v2815_v61, %v2785_v51  ;;  %v2545_v47 = vpack.c.bf16 %v3954_v12, %v3948_v17 }
 0x223   : > { %v3951_v21 = vadd.f32 %v3950_v5, %v3826_v60 }
 0x224   : > { %v2817_v34 = vadd.f32 %v2816_v15, %v2786_v7  ;;  %3273 = vst [vmem:[%s5110_s29 + $0x70] sm:$0xff] %v2545_v47   ;;  %v2719_v44 = vunpack.c.l.bf16 %v2545_v47  ;;  %v2720_v54 = vunpack.c.h.bf16 %v2545_v47  ;;  %v2749_v25 = vadd.f32 %v2748_v22, %v2718_v38 }
 0x225   : > { %v2546_v49 = vpack.c.bf16 %v3951_v21, %v3945_v16 }
 0x226   : > { %v2750_v45 = vadd.f32 %v2749_v25, %v2719_v44  ;;  %v2788_v35 = vmul.f32 %v2719_v44, %v2719_v44  ;;  %v2818_v39 = vadd.f32 %v2817_v34, %v2787_v0  ;;  %v2789_v50 = vmul.f32 %v2720_v54, %v2720_v54 }
 0x227   : > { %3274 = vst [vmem:[%s5110_s29 + $0x78] sm:$0xff] %v2546_v49   ;;  %v2721_v33 = vunpack.c.l.bf16 %v2546_v49  ;;  %v2722_v26 = vunpack.c.h.bf16 %v2546_v49 }
 0x228   : > { %v2751_v37 = vadd.f32 %v2750_v45, %v2720_v54  ;;  %v2819_v57 = vadd.f32 %v2818_v39, %v2788_v35 }
 0x229   : > { %v2790_v43 = vmul.f32 %v2721_v33, %v2721_v33  ;;  %v2791_v58 = vmul.f32 %v2722_v26, %v2722_v26 }
 0x22a   : > { %v2752_v10 = vadd.f32 %v2751_v37, %v2721_v33  ;;  %v2820_v14 = vadd.f32 %v2819_v57, %v2789_v50 }
 0x22c   : > { %v2753_v13 = vadd.f32 %v2752_v10, %v2722_v26  ;;  %v2821_v24 = vadd.f32 %v2820_v14, %v2790_v43 }
 0x22e   : > { %v2754_v55 = vrot.slane %v2753_v13, 4  ;;  %v2822_v30 = vadd.f32 %v2821_v24, %v2791_v58 }
 0x230   : > { %v2755_v62 = vadd.f32 %v2754_v55, %v2753_v13  ;;  %v2823_v29 = vrot.slane %v2822_v30, 4 }
 0x232   : > { %v2756_v52 = vrot.slane %v2755_v62, 2  ;;  %v2824_v56 = vadd.f32 %v2823_v29, %v2822_v30 }
 0x234   : > { %v2757_v32 = vadd.f32 %v2756_v52, %v2755_v62  ;;  %v2825_v23 = vrot.slane %v2824_v56, 2 }
 0x236   : > { %v2758_v19 = vrot.slane %v2757_v32, 1  ;;  %v2826_v53 = vadd.f32 %v2825_v23, %v2824_v56 }
 0x238   : > { %v2759_v36 = vadd.f32 %v2758_v19, %v2757_v32  ;;  %v2827_v28 = vrot.slane %v2826_v53, 1 }
 0x23a   : > { %v2828_v31 = vadd.f32 %v2827_v28, %v2826_v53  ;;  %2829 = vst [vmem:[%s268_s8] sm:$0xff] %v2759_v36 }
 0x23c   : > { %2830 = vst [vmem:[%s272_s10] sm:$0xff] %v2828_v31 }
 0x23d PF: > { %s17_s21 = sadd.s32 1, %s4091_s21  }
 0x23e   : > { %p14_p4 = scmp.ge.s32.totalorder %s17_s21, 4  }
 0x240   :  { %16 = sbr.rel (!%p14_p4) target bundleno = 1 (0x1), region = 93 }

</bundles_post_ra>
